<compile_context>
chip_gen: v5e
topology: v5e:2x2
jax: 0.10.0
libtpu: 0.0.40
codegen_flags: <defaults>
</compile_context>

<pallas_src>
import functools

import jax
import jax.numpy as jnp
from jax import lax
from jax.experimental import pallas as pl
from jax.experimental.pallas import tpu as pltpu


def ngram_kernel(idx_ref, tbl_ref, b1_ref, w2_ref, b2_ref, out_ref, *,
                 context_size, vocab, tile_b):
    """One batch tile: tile_b contexts -> (tile_b, V_pad) log-probs."""
    cv = context_size * vocab

    # idx_ref holds the whole (B, C) index array resident in VMEM; slice out
    # this grid step's rows (no per-step DMA for the narrow index tile).
    start = pl.multiple_of(pl.program_id(0) * tile_b, tile_b)
    idx = idx_ref[pl.ds(start, tile_b), :]                       # (tile_b, C) int32

    # Stacked one-hot selector, built directly in bf16 (values are exact 0/1):
    #   oh[b, c*V + v] = (idx[b, c] == v)  for valid idx, else 0.
    lanes = lax.broadcasted_iota(jnp.int32, (tile_b, cv), 1)
    oh = jnp.zeros((tile_b, cv), jnp.bfloat16)
    for c in range(context_size):                                # static, tiny
        col = idx[:, c:c + 1]                                    # (tile_b, 1)
        valid = (col >= 0) & (col < vocab)                       # mask OOB indices
        hit = ((col + c * vocab) == lanes) & valid
        oh = oh + hit.astype(jnp.bfloat16)

    # linear1 with the embedding folded in: one MXU dot, K = C*V.
    acc = jnp.dot(oh, tbl_ref[...], preferred_element_type=jnp.float32)
    h = jnp.maximum(acc + b1_ref[...], 0.0)                      # ReLU, f32
    # (b1 left as a VALU add — kernel is MXU/overhead bound, so it is free.)

    # linear2 (bf16 operands, f32 accumulate); padded vocab lanes carry a
    # -1e30 bias so they do not affect the softmax.
    o = jnp.dot(h.astype(jnp.bfloat16), w2_ref[...],
                preferred_element_type=jnp.float32) + b2_ref[...]  # (tile_b, V_pad)

    # Numerically stable log_softmax over the (single-block) vocab axis.
    m = jnp.max(o, axis=-1, keepdims=True)
    lse = m + jnp.log(jnp.sum(jnp.exp(o - m), axis=-1, keepdims=True))
    out_ref[...] = (o - lse).astype(out_ref.dtype)


def ngram_forward(idxs, emb, w1, b1, w2, b2, *, tile_b=512,
                  out_dtype=jnp.float32):
    """Batched NGramLanguageModeler forward.

    idxs: int32[B, C]  context word indices (each row = one n-gram context)
    emb : f32[V, E]    embedding table
    w1  : f32[C*E, H]  linear1 weight (transpose of PyTorch layout); b1: f32[1, H]
    w2  : f32[H, V]    linear2 weight (transpose of PyTorch layout); b2: f32[1, V]
    returns out_dtype[B, V] log-probabilities (row b == module.forward(idxs[b])).
    """
    B, C = idxs.shape
    V, E = emb.shape
    H = w1.shape[1]
    assert w1.shape == (C * E, H) and w2.shape == (H, V)
    assert b1.shape == (1, H) and b2.shape == (1, V)
    assert B % tile_b == 0, "pad the batch to a multiple of tile_b"

    # Fold the embedding into linear1:  x @ W1 == one_hot_stacked(idx) @ table
    # (exact reassociation: table[c*V + v, :] = emb[v] @ W1[c*E:(c+1)*E, :]).
    tbl = jnp.einsum("ve,ceh->cvh", emb, w1.reshape(C, E, H)).reshape(C * V, H)
    tbl = tbl.astype(jnp.bfloat16)

    # Lane-dense vocab: skip padding (and the wrapper slice) when already aligned.
    if V % 128 == 0:
        v_pad = V
        w2p = w2.astype(jnp.bfloat16)
        b2p = b2
    else:
        v_pad = ((V + 127) // 128) * 128
        w2p = jnp.zeros((H, v_pad), jnp.float32).at[:, :V].set(w2).astype(jnp.bfloat16)
        b2p = jnp.full((1, v_pad), -1e30, jnp.float32).at[:, :V].set(b2)

    kernel = functools.partial(ngram_kernel, context_size=C, vocab=V,
                               tile_b=tile_b)

    out = pl.pallas_call(
        kernel,
        out_shape=jax.ShapeDtypeStruct((B, v_pad), out_dtype),
        grid=(B // tile_b,),
        in_specs=[
            pl.BlockSpec((B, C), lambda i: (0, 0)),        # indices (resident, tiny)
            pl.BlockSpec((C * V, H), lambda i: (0, 0)),    # fused emb@W1 (resident)
            pl.BlockSpec((1, H), lambda i: (0, 0)),        # b1 (resident)
            pl.BlockSpec((H, v_pad), lambda i: (0, 0)),    # W2 (resident)
            pl.BlockSpec((1, v_pad), lambda i: (0, 0)),    # b2 (resident)
        ],
        out_specs=pl.BlockSpec((tile_b, v_pad), lambda i: (i, 0)),
        compiler_params=pltpu.CompilerParams(
            dimension_semantics=("parallel",)),
    )(idxs, tbl, b1, w2p, b2p)
    return out if v_pad == V else out[:, :V]


def reference_forward(idxs, emb, w1, b1, w2, b2):
    B = idxs.shape[0]
    x = emb[idxs].reshape(B, -1)                  # (B, C*E)
    h = jnp.maximum(x @ w1 + b1, 0.0)
    o = h @ w2 + b2
    return jax.nn.log_softmax(o, axis=-1)


if __name__ == "__main__":
    # Shapes consistent with NGramLanguageModeler(vocab_size, embedding_dim, context_size)
    VOCAB_SIZE = 64
    EMBEDDING_DIM = 10
    CONTEXT_SIZE = 2
    HIDDEN = 128
    TILE_B = 512
    BATCH = 4 * TILE_B      # 4 grid steps: even, >= 4, splits across v7x's 2 TCs

    key = jax.random.PRNGKey(0)
    k_emb, k_w1, k_b1, k_w2, k_b2, k_idx = jax.random.split(key, 6)

    # PyTorch-like init: Embedding ~ N(0,1), Linear ~ U(-1/sqrt(fan_in), +).
    emb = jax.random.normal(k_emb, (VOCAB_SIZE, EMBEDDING_DIM), jnp.float32)

    fan1 = CONTEXT_SIZE * EMBEDDING_DIM
    lim1 = 1.0 / jnp.sqrt(fan1)
    w1 = jax.random.uniform(k_w1, (fan1, HIDDEN), jnp.float32, -lim1, lim1)
    b1 = jax.random.uniform(k_b1, (1, HIDDEN), jnp.float32, -lim1, lim1)

    lim2 = 1.0 / jnp.sqrt(HIDDEN)
    w2 = jax.random.uniform(k_w2, (HIDDEN, VOCAB_SIZE), jnp.float32, -lim2, lim2)
    b2 = jax.random.uniform(k_b2, (1, VOCAB_SIZE), jnp.float32, -lim2, lim2)

    # A batch of context-index rows (each row is the module's `inputs`).
    idxs = jax.random.randint(k_idx, (BATCH, CONTEXT_SIZE), 0, VOCAB_SIZE, jnp.int32)

    log_probs = jax.block_until_ready(
        ngram_forward(idxs, emb, w1, b1, w2, b2, tile_b=TILE_B))

    # Sanity check against the pure-JAX f32 reference (bf16 MXU operands in
    # the kernel are intentional, hence the modest tolerance).
    ref = reference_forward(idxs, emb, w1, b1, w2, b2)
    assert log_probs.shape == (BATCH, VOCAB_SIZE)
    assert jnp.allclose(log_probs, ref, atol=2e-2, rtol=2e-2), float(
        jnp.max(jnp.abs(log_probs - ref)))

    print("KERNEL_OK")
</pallas_src>

<mosaic_0001>
module attributes {stable_mosaic.version = 11 : i64} {
  func.func @ngram_kernel(%arg0: i32, %arg1: memref<2048x2xi32, #tpu.memory_space<vmem>>, %arg2: memref<128x128xbf16, #tpu.memory_space<vmem>>, %arg3: memref<1x128xf32, #tpu.memory_space<vmem>>, %arg4: memref<128x128xbf16, #tpu.memory_space<vmem>>, %arg5: memref<1x128xf32, #tpu.memory_space<vmem>>, %arg6: memref<512x128xf32, #tpu.memory_space<vmem>>) attributes {dimension_semantics = [#tpu.dimension_semantics<parallel>], iteration_bounds = array<i64: 4>, scalar_prefetch = 0 : i64, scratch_operands = 0 : i64, tpu.core_type = #tpu.core_type<tc>, window_params = [{pipeline_mode = #tpu.pipeline_mode<synchronous>, transform_indices = @transform_0, window_bounds = array<i64: 2048, 2>}, {pipeline_mode = #tpu.pipeline_mode<synchronous>, transform_indices = @transform_1, window_bounds = array<i64: 128, 128>}, {pipeline_mode = #tpu.pipeline_mode<synchronous>, transform_indices = @transform_2, window_bounds = array<i64: 1, 128>}, {pipeline_mode = #tpu.pipeline_mode<synchronous>, transform_indices = @transform_3, window_bounds = array<i64: 128, 128>}, {pipeline_mode = #tpu.pipeline_mode<synchronous>, transform_indices = @transform_4, window_bounds = array<i64: 1, 128>}, {transform_indices = @transform_5, window_bounds = array<i64: 512, 128>}]} {
    %c512_i32 = arith.constant 512 : i32
    %0 = arith.muli %arg0, %c512_i32 : i32
    %1 = tpu.assume_multiple %0, 512 : i32
    %2 = arith.index_cast %1 : i32 to index
    %c0 = arith.constant 0 : index
    %3 = vector.load %arg1[%2, %c0] : memref<2048x2xi32, #tpu.memory_space<vmem>>, vector<512x2xi32>
    %4 = tpu.iota {dimensions = array<i32: 1>} : vector<512x128xi32>
    %cst = arith.constant 0.000000e+00 : bf16
    %5 = vector.broadcast %cst : bf16 to vector<512x128xbf16>
    %6 = vector.extract_strided_slice %3 {offsets = [0, 0], sizes = [512, 1], strides = [1, 1]} : vector<512x2xi32> to vector<512x1xi32>
    %c0_i32 = arith.constant 0 : i32
    %7 = vector.broadcast %c0_i32 : i32 to vector<512x1xi32>
    %8 = arith.cmpi sge, %6, %7 : vector<512x1xi32>
    %c64_i32 = arith.constant 64 : i32
    %9 = vector.broadcast %c64_i32 : i32 to vector<512x1xi32>
    %10 = arith.cmpi slt, %6, %9 : vector<512x1xi32>
    %11 = arith.andi %8, %10 : vector<512x1xi1>
    %c0_i32_0 = arith.constant 0 : i32
    %12 = vector.broadcast %c0_i32_0 : i32 to vector<512x1xi32>
    %13 = arith.addi %6, %12 : vector<512x1xi32>
    %14 = vector.broadcast %13 : vector<512x1xi32> to vector<512x128xi32>
    %15 = arith.cmpi eq, %14, %4 : vector<512x128xi32>
    %16 = vector.broadcast %11 : vector<512x1xi1> to vector<512x128xi1>
    %17 = arith.andi %15, %16 : vector<512x128xi1>
    %18 = arith.extui %17 : vector<512x128xi1> to vector<512x128xi32>
    %19 = arith.sitofp %18 : vector<512x128xi32> to vector<512x128xf32>
    %20 = arith.truncf %19 : vector<512x128xf32> to vector<512x128xbf16>
    %21 = arith.addf %5, %20 : vector<512x128xbf16>
    %22 = vector.extract_strided_slice %3 {offsets = [0, 1], sizes = [512, 1], strides = [1, 1]} : vector<512x2xi32> to vector<512x1xi32>
    %c0_i32_1 = arith.constant 0 : i32
    %23 = vector.broadcast %c0_i32_1 : i32 to vector<512x1xi32>
    %24 = arith.cmpi sge, %22, %23 : vector<512x1xi32>
    %c64_i32_2 = arith.constant 64 : i32
    %25 = vector.broadcast %c64_i32_2 : i32 to vector<512x1xi32>
    %26 = arith.cmpi slt, %22, %25 : vector<512x1xi32>
    %27 = arith.andi %24, %26 : vector<512x1xi1>
    %c64_i32_3 = arith.constant 64 : i32
    %28 = vector.broadcast %c64_i32_3 : i32 to vector<512x1xi32>
    %29 = arith.addi %22, %28 : vector<512x1xi32>
    %30 = vector.broadcast %29 : vector<512x1xi32> to vector<512x128xi32>
    %31 = arith.cmpi eq, %30, %4 : vector<512x128xi32>
    %32 = vector.broadcast %27 : vector<512x1xi1> to vector<512x128xi1>
    %33 = arith.andi %31, %32 : vector<512x128xi1>
    %34 = arith.extui %33 : vector<512x128xi1> to vector<512x128xi32>
    %35 = arith.sitofp %34 : vector<512x128xi32> to vector<512x128xf32>
    %36 = arith.truncf %35 : vector<512x128xf32> to vector<512x128xbf16>
    %37 = arith.addf %21, %36 : vector<512x128xbf16>
    %c0_4 = arith.constant 0 : index
    %c0_5 = arith.constant 0 : index
    %38 = vector.load %arg2[%c0_4, %c0_5] : memref<128x128xbf16, #tpu.memory_space<vmem>>, vector<128x128xbf16>
    %cst_6 = arith.constant dense<0.000000e+00> : vector<512x128xf32>
    %39 = tpu.matmul %37, %38, %cst_6 {dimension_numbers = #tpu.dot_dimension_numbers<[1], [0], [0], [1], [0, 0, 1, 1], [], []>} : vector<512x128xbf16>, vector<128x128xbf16>, vector<512x128xf32> -> vector<512x128xf32>
    %c0_7 = arith.constant 0 : index
    %c0_8 = arith.constant 0 : index
    %40 = vector.load %arg3[%c0_7, %c0_8] : memref<1x128xf32, #tpu.memory_space<vmem>>, vector<1x128xf32>
    %41 = vector.broadcast %40 : vector<1x128xf32> to vector<512x128xf32>
    %42 = arith.addf %39, %41 : vector<512x128xf32>
    %cst_9 = arith.constant 0.000000e+00 : f32
    %43 = vector.broadcast %cst_9 : f32 to vector<512x128xf32>
    %44 = arith.maximumf %42, %43 : vector<512x128xf32>
    %45 = arith.truncf %44 : vector<512x128xf32> to vector<512x128xbf16>
    %c0_10 = arith.constant 0 : index
    %c0_11 = arith.constant 0 : index
    %46 = vector.load %arg4[%c0_10, %c0_11] : memref<128x128xbf16, #tpu.memory_space<vmem>>, vector<128x128xbf16>
    %cst_12 = arith.constant dense<0.000000e+00> : vector<512x128xf32>
    %47 = tpu.matmul %45, %46, %cst_12 {dimension_numbers = #tpu.dot_dimension_numbers<[1], [0], [0], [1], [0, 0, 1, 1], [], []>} : vector<512x128xbf16>, vector<128x128xbf16>, vector<512x128xf32> -> vector<512x128xf32>
    %c0_13 = arith.constant 0 : index
    %c0_14 = arith.constant 0 : index
    %48 = vector.load %arg5[%c0_13, %c0_14] : memref<1x128xf32, #tpu.memory_space<vmem>>, vector<1x128xf32>
    %49 = vector.broadcast %48 : vector<1x128xf32> to vector<512x128xf32>
    %50 = arith.addf %47, %49 : vector<512x128xf32>
    %cst_15 = arith.constant dense<0xFF800000> : vector<512xf32>
    %51 = vector.multi_reduction <maximumf>, %50, %cst_15 [1] : vector<512x128xf32> to vector<512xf32>
    %52 = vector.shape_cast %51 : vector<512xf32> to vector<512x1xf32>
    %53 = vector.broadcast %52 : vector<512x1xf32> to vector<512x128xf32>
    %54 = arith.subf %50, %53 : vector<512x128xf32>
    %55 = math.exp %54 : vector<512x128xf32>
    %cst_16 = arith.constant dense<0.000000e+00> : vector<512xf32>
    %56 = vector.multi_reduction <add>, %55, %cst_16 [1] : vector<512x128xf32> to vector<512xf32>
    %57 = vector.shape_cast %56 : vector<512xf32> to vector<512x1xf32>
    %58 = math.log %57 : vector<512x1xf32>
    %59 = arith.addf %52, %58 : vector<512x1xf32>
    %60 = vector.broadcast %59 : vector<512x1xf32> to vector<512x128xf32>
    %61 = arith.subf %50, %60 : vector<512x128xf32>
    %c0_17 = arith.constant 0 : index
    %c0_18 = arith.constant 0 : index
    %62 = vector.load %arg6[%c0_17, %c0_18] : memref<512x128xf32, #tpu.memory_space<vmem>>, vector<512x128xf32>
    tpu.vector_store %arg6[%c0_17, %c0_18], %61 {strides = array<i32>} : memref<512x128xf32, #tpu.memory_space<vmem>>, vector<512x128xf32>,
    return
  }
  func.func @transform_0(%arg0: i32) -> (i32, i32) {
    %c0_i32 = arith.constant 0 : i32
    %c0_i32_0 = arith.constant 0 : i32
    %c0_i32_1 = arith.constant 0 : i32
    return %c0_i32, %c0_i32_0 : i32, i32
  }
  func.func @transform_1(%arg0: i32) -> (i32, i32) {
    %c0_i32 = arith.constant 0 : i32
    %c0_i32_0 = arith.constant 0 : i32
    %c0_i32_1 = arith.constant 0 : i32
    return %c0_i32, %c0_i32_0 : i32, i32
  }
  func.func @transform_2(%arg0: i32) -> (i32, i32) {
    %c0_i32 = arith.constant 0 : i32
    %c0_i32_0 = arith.constant 0 : i32
    %c0_i32_1 = arith.constant 0 : i32
    return %c0_i32, %c0_i32_0 : i32, i32
  }
  func.func @transform_3(%arg0: i32) -> (i32, i32) {
    %c0_i32 = arith.constant 0 : i32
    %c0_i32_0 = arith.constant 0 : i32
    %c0_i32_1 = arith.constant 0 : i32
    return %c0_i32, %c0_i32_0 : i32, i32
  }
  func.func @transform_4(%arg0: i32) -> (i32, i32) {
    %c0_i32 = arith.constant 0 : i32
    %c0_i32_0 = arith.constant 0 : i32
    %c0_i32_1 = arith.constant 0 : i32
    return %c0_i32, %c0_i32_0 : i32, i32
  }
  func.func @transform_5(%arg0: i32) -> (i32, i32) {
    %c0_i32 = arith.constant 0 : i32
    %c0_i32_0 = arith.constant 0 : i32
    return %arg0, %c0_i32 : i32, i32
  }
}

</mosaic_0001>

<bundles_post_ra>
// kernel: tpu_custom_call.1
= control target key start
LH: loop header
LB: loop body
LE: loop exit
PB: predicated region body
PF: predicated region fallthrough
CT: control target
= control target key end

     0   :  { %10 = vsyncpa [#allocation3], 0  ;;  %s7566_s0 = inlined_call_operand.vmem [shape: s32[2048,2], index: 0, kind: input, shape index: {}]   ;;  %s7567_s1 = inlined_call_operand.vmem [shape: bf16[128,128], index: 1, kind: input, shape index: {}]   ;;  %s7568_s2 = inlined_call_operand.vmem [shape: f32[1,128], index: 2, kind: input, shape index: {}]   ;;  %s7569_s3 = inlined_call_operand.vmem [shape: bf16[128,128], index: 3, kind: input, shape index: {}]   ;;  %s7570_s4 = inlined_call_operand.vmem [shape: f32[1,128], index: 4, kind: input, shape index: {}]   ;;  %s7571_s5 = inlined_call_operand.hbm [shape: f32[2048,128], index: 5, kind: output, shape index: {}]  }
   0x1   :  { %12 = vsyncpa [#allocation3 + $0x1], 0  ;;  %s4657_s18 = smov 0   ;;  %s4659_s19 = smov 0  }
   0x2   :  { %s4661_s20 = smov 0   ;;  %s4663_s21 = smov 0  }
   0x3 LB: > { %s3949_s22 = sadd.s32 4294967295, %s4620_s21   ;;  %s3950_s23 = sadd.s32 4294967294, %s4620_s21   ;;  %s4620_s21 = sphi %s4663_s21, %s8341_s21   ;;  %s4616_s20 = sphi %s4661_s20, %s8340_s20   ;;  %s4612_s19 = sphi %s4659_s19, %s8339_s19   ;;  %s4608_s18 = sphi %s4657_s18, %s8338_s18  }
   0x4   : > { %s4680_s24 = sadd.s32 1, %s4620_s21   ;;  %s130_s25 = sadd.s32 1, %s4616_s20 }
   0x5   : > { %s127_s26 = ssub.s32 %s4620_s21, %s4680_s24  ;;  %p140_p0 = scmp.ne.s32.totalorder %s4616_s20, %s4612_s19 }
   0x6   : > { %p128_p1 = scmp.eq.s32.totalorder %s127_s26, 0  ;;  %p141_p2 = scmp.eq.s32.totalorder %s3949_s22, 3 }
   0x7   : > { %p146_p3 = scmp.ne.s32.totalorder %s4612_s19, %s4608_s18  ;;  %p147_p4 = scmp.eq.s32.totalorder %s3950_s23, 3 }
   0x8   : > { %s4690_s27 = scalar_select %p128_p1, %s4616_s20, %s130_s25  }
   0x9   : > { %p4692_p5 = por %p141_p2, %p140_p0  ;;  %p4696_p6 = por %p147_p4, %p146_p3 }
   0xa   : > { %p3952_p7 = scmp.ge.s32.totalorder %s4620_s21, 1  ;;  %p180_p8 = scmp.lt.s32.totalorder %s4620_s21, 5 }
   0xc   : > { %p181_p9 = pnand %p3952_p7, %p180_p8 }
   0xe   : > { %184 = sbr.rel (%p181_p9) target bundleno = 1564 (0x61c), region = 40 }
  0x13   : > { %s4702_s30 = sshll.u32 %s3949_s22, 9  ;;  %v7572_v0 = vmov 0   ;;  %s200_s15 = sand.u32 1, %s4612_s19  }
  0x14   : > { %4231 = vset.pattern.permute.xlu2 %v7572_v0  ;;  %4230 = vset.pattern.permute.xlu1 %v7572_v0  ;;  %s4710_s8 = scalar_lea.vmem %s7566_s0, %s4702_s30  ;;  %s3953_s16 = sshll.u32 %s200_s15, 9 }
  0x15   : > { %4229 = vset.pattern.permute.xlu0 %v7572_v0  ;;  %v4714_v1 = vld [vmem:[%s4710_s8 + $0x20] sm:$0xff]  ;;  %v4717_v2 = vld [vmem:[%s4710_s8 + $0x10] sm:$0xff]  ;;  %v4726_v4 = vld [vmem:[%s4710_s8 + $0x28] sm:$0xff]  ;;  %s7317_s17 = scalar_lea.vmem [#allocation2], %s3953_s16  ;;  %s3894_s25 = scalar_lea.hbm %s7571_s5, %s4702_s30 }
  0x16   : > { %v4720_v3 = vld [vmem:[%s4710_s8] sm:$0xff]  ;;  %477 = vperm.xlu2 %4231, %v4714_v1   ;;  %471 = vperm.xlu1 %4230, %v4717_v2   ;;  %v4729_v5 = vld [vmem:[%s4710_s8 + $0x18] sm:$0xff]  ;;  %v4732_v6 = vld [vmem:[%s4710_s8 + $0x8] sm:$0xff]  ;;  %vm276_vm6 = vcmp.ge.s32.totalorder %v4714_v1, 0  ;;  %vm340_vm7 = vcmp.lt.s32.totalorder %v4714_v1, 64  ;;  %vm274_vm10 = vcmp.ge.s32.totalorder %v4717_v2, 0 }
  0x17   : > { %465 = vperm.xlu0 %4229, %v4720_v3   ;;  %v4738_v7 = vld [vmem:[%s4710_s8 + $0x40] sm:$0xff]  ;;  %v4741_v8 = vld [vmem:[%s4710_s8 + $0x38] sm:$0xff]  ;;  %v4744_v9 = vld [vmem:[%s4710_s8 + $0x30] sm:$0xff]  ;;  %vm273_vm0 = vcmp.ge.s32.totalorder %v4732_v6, 0  ;;  %vm337_vm1 = vcmp.lt.s32.totalorder %v4732_v6, 64  ;;  %vm272_vm2 = vcmp.ge.s32.totalorder %v4720_v3, 0 }
  0x18   : > { %v4750_v10 = vld [vmem:[%s4710_s8 + $0x58] sm:$0xff]  ;;  %v4753_v11 = vld [vmem:[%s4710_s8 + $0x50] sm:$0xff]  ;;  %v4756_v12 = vld [vmem:[%s4710_s8 + $0x48] sm:$0xff]  ;;  %vm336_vm3 = vcmp.lt.s32.totalorder %v4720_v3, 64  ;;  %vm275_vm8 = vcmp.ge.s32.totalorder %v4729_v5, 0  ;;  %vm339_vm9 = vcmp.lt.s32.totalorder %v4729_v5, 64 }
  0x19   : > { %v4762_v13 = vld [vmem:[%s4710_s8 + $0x70] sm:$0xff]  ;;  %v4765_v14 = vld [vmem:[%s4710_s8 + $0x68] sm:$0xff]  ;;  %v4768_v15 = vld [vmem:[%s4710_s8 + $0x60] sm:$0xff]  ;;  %vm338_vm11 = vcmp.lt.s32.totalorder %v4717_v2, 64  ;;  %vm279_vm15 = vcmp.ge.s32.totalorder %v4741_v8, 0  ;;  %s7529_s26 = sshll.u32 %s3894_s25, 4  ;;  %s3898_s26 = int_to_ptr.hbm [resolvable:$true] %s7529_s26 }
  0x1a   : > { %v4774_v16 = vld [vmem:[%s4710_s8 + $0x88] sm:$0xff]  ;;  %v4777_v17 = vld [vmem:[%s4710_s8 + $0x80] sm:$0xff]  ;;  %v4780_v18 = vld [vmem:[%s4710_s8 + $0x78] sm:$0xff]  ;;  %s3895_s6 = sshll.u32 %s7317_s17, 4  ;;  %s3883_s30 = scalar_lea.sflag [#allocation3], %s200_s15  ;;  %s3896_s6 = int_to_ptr.vmem [resolvable:$true] %s3895_s6 }
  0x1b   : > { %v4786_v19 = vld [vmem:[%s4710_s8 + $0xa0] sm:$0xff]  ;;  %v4789_v20 = vld [vmem:[%s4710_s8 + $0x98] sm:$0xff]  ;;  %v4792_v21 = vld [vmem:[%s4710_s8 + $0x90] sm:$0xff]  ;;  %s4572_s7 = sshra.s32 %s3898_s26, 4  ;;  %s4578_s11 = scalar_lea.hbm %s7571_s5, 2048  ;;  %s4573_s7 = int_to_ptr.hbm [resolvable:$true] %s4572_s7 }
  0x1c   : > { %v4798_v22 = vld [vmem:[%s4710_s8 + $0xb8] sm:$0xff]  ;;  %v4801_v23 = vld [vmem:[%s4710_s8 + $0xb0] sm:$0xff]  ;;  %v4804_v24 = vld [vmem:[%s4710_s8 + $0xa8] sm:$0xff]  ;;  %p4579_p13 = scmp.lt.s32.totalorder %s4573_s7, %s7571_s5 }
  0x1d   : > { %v4810_v25 = vld [vmem:[%s4710_s8 + $0xd0] sm:$0xff]  ;;  %v4813_v26 = vld [vmem:[%s4710_s8 + $0xc8] sm:$0xff]  ;;  %v4816_v27 = vld [vmem:[%s4710_s8 + $0xc0] sm:$0xff] }
  0x1e   : > { %480 = vperm.xlu2 %4231, %v4726_v4   ;;  %474 = vperm.xlu1 %4230, %v4729_v5   ;;  %v4822_v28 = vld [vmem:[%s4710_s8 + $0xe8] sm:$0xff]  ;;  %v4825_v29 = vld [vmem:[%s4710_s8 + $0xe0] sm:$0xff]  ;;  %v4828_v30 = vld [vmem:[%s4710_s8 + $0xd8] sm:$0xff] }
  0x1f   : > { %468 = vperm.xlu0 %4229, %v4732_v6   ;;  %v4834_v31 = vld [vmem:[%s4710_s8 + $0x100] sm:$0xff]  ;;  %v4837_v32 = vld [vmem:[%s4710_s8 + $0xf8] sm:$0xff]  ;;  %v4840_v33 = vld [vmem:[%s4710_s8 + $0xf0] sm:$0xff] }
  0x20   : > { %v4846_v34 = vld [vmem:[%s4710_s8 + $0x118] sm:$0xff]  ;;  %v4849_v35 = vld [vmem:[%s4710_s8 + $0x110] sm:$0xff]  ;;  %v4852_v36 = vld [vmem:[%s4710_s8 + $0x108] sm:$0xff] }
  0x21   : > { %v4860_v38 = vld [vmem:[%s4710_s8 + $0x130] sm:$0xff]  ;;  %v4863_v39 = vld [vmem:[%s4710_s8 + $0x128] sm:$0xff]  ;;  %v4866_v40 = vld [vmem:[%s4710_s8 + $0x120] sm:$0xff] }
  0x22   : > { %v4874_v42 = vld [vmem:[%s4710_s8 + $0x148] sm:$0xff]  ;;  %v4877_v43 = vld [vmem:[%s4710_s8 + $0x140] sm:$0xff]  ;;  %v4880_v44 = vld [vmem:[%s4710_s8 + $0x138] sm:$0xff] }
  0x23   : > { %v4888_v46 = vld [vmem:[%s4710_s8 + $0x160] sm:$0xff]  ;;  %v4891_v47 = vld [vmem:[%s4710_s8 + $0x158] sm:$0xff]  ;;  %v4894_v48 = vld [vmem:[%s4710_s8 + $0x150] sm:$0xff] }
  0x24   : > { %v4906_v52 = vld [vmem:[%s4710_s8 + $0x178] sm:$0xff]  ;;  %v4909_v53 = vld [vmem:[%s4710_s8 + $0x170] sm:$0xff]  ;;  %v4912_v54 = vld [vmem:[%s4710_s8 + $0x168] sm:$0xff] }
  0x25   : > { %v4924_v58 = vld [vmem:[%s4710_s8 + $0x190] sm:$0xff]  ;;  %v4927_v59 = vld [vmem:[%s4710_s8 + $0x188] sm:$0xff]  ;;  %v4930_v60 = vld [vmem:[%s4710_s8 + $0x180] sm:$0xff] }
  0x26   : > { %489 = vperm.xlu2 %4231, %v4738_v7   ;;  %486 = vperm.xlu1 %4230, %v4741_v8   ;;  %v4942_v0 = vld [vmem:[%s4710_s8 + $0x1a8] sm:$0xff]  ;;  %vm401_vm4 = vmand %vm273_vm0, %vm337_vm1  ;;  %v5024_v3 = vld [vmem:[%s4710_s8 + $0x1f8] sm:$0xff]  ;;  %vm343_vm0 = vcmp.lt.s32.totalorder %v4741_v8, 64  ;;  %vm278_vm1 = vcmp.ge.s32.totalorder %v4744_v9, 0 }
  0x27   : > { %483 = vperm.xlu0 %4229, %v4744_v9   ;;  %7733 = vst [vmem:[#allocation17_spill] sm:$0xff] %v4942_v0  ;;  %vm400_vm5 = vmand %vm272_vm2, %vm336_vm3  ;;  %vm342_vm2 = vcmp.lt.s32.totalorder %v4744_v9, 64  ;;  %vm277_vm3 = vcmp.ge.s32.totalorder %v4726_v4, 0 }
  0x28   : > { %vm404_vm12 = vmand %vm276_vm6, %vm340_vm7 }
  0x29   : > { %vm403_vm13 = vmand %vm275_vm8, %vm339_vm9  ;;  %vm282_vm8 = vcmp.ge.s32.totalorder %v4753_v11, 0  ;;  %vm346_vm9 = vcmp.lt.s32.totalorder %v4753_v11, 64 }
  0x2a   : > { %vm402_vm14 = vmand %vm274_vm10, %vm338_vm11  ;;  %vm281_vm10 = vcmp.ge.s32.totalorder %v4756_v12, 0  ;;  %vm345_vm11 = vcmp.lt.s32.totalorder %v4756_v12, 64 }
  0x2b   : > { %vm406_vm6 = vmand %vm278_vm1, %vm342_vm2  ;;  %vm285_vm1 = vcmp.ge.s32.totalorder %v4765_v14, 0  ;;  %vm349_vm2 = vcmp.lt.s32.totalorder %v4765_v14, 64 }
  0x2e   : > { %498 = vperm.xlu2 %4231, %v4750_v10   ;;  %495 = vperm.xlu1 %4230, %v4753_v11  }
  0x2f   : > { %492 = vperm.xlu0 %4229, %v4756_v12  }
  0x36   : > { %507 = vperm.xlu2 %4231, %v4762_v13   ;;  %504 = vperm.xlu1 %4230, %v4765_v14  }
  0x37   : > { %501 = vperm.xlu0 %4229, %v4768_v15  }
  0x3e   : > { %516 = vperm.xlu2 %4231, %v4774_v16   ;;  %513 = vperm.xlu1 %4230, %v4777_v17  }
  0x3f   : > { %510 = vperm.xlu0 %4229, %v4780_v18  }
  0x46   : > { %525 = vperm.xlu2 %4231, %v4786_v19   ;;  %522 = vperm.xlu1 %4230, %v4789_v20  }
  0x47   : > { %519 = vperm.xlu0 %4229, %v4792_v21  }
  0x4e   : > { %534 = vperm.xlu2 %4231, %v4798_v22   ;;  %531 = vperm.xlu1 %4230, %v4801_v23  }
  0x4f   : > { %528 = vperm.xlu0 %4229, %v4804_v24  }
  0x56   : > { %543 = vperm.xlu2 %4231, %v4810_v25   ;;  %540 = vperm.xlu1 %4230, %v4813_v26  }
  0x57   : > { %537 = vperm.xlu0 %4229, %v4816_v27  }
  0x5e   : > { %552 = vperm.xlu2 %4231, %v4822_v28   ;;  %549 = vperm.xlu1 %4230, %v4825_v29  }
  0x5f   : > { %546 = vperm.xlu0 %4229, %v4828_v30  }
  0x66   : > { %561 = vperm.xlu2 %4231, %v4834_v31   ;;  %558 = vperm.xlu1 %4230, %v4837_v32  }
  0x67   : > { %555 = vperm.xlu0 %4229, %v4840_v33  }
  0x6e   : > { %570 = vperm.xlu2 %4231, %v4846_v34   ;;  %567 = vperm.xlu1 %4230, %v4849_v35  }
  0x6f   : > { %564 = vperm.xlu0 %4229, %v4852_v36  }
  0x70   : > { %v4857_v37 = vpop.permute.xlu2 %477 }
  0x71   : > { %7721 = vst [vmem:[#allocation5_spill] sm:$0xff] %v4857_v37  ;;  %v4963_v37 = vld [vmem:[%s4710_s8 + $0x1b8] sm:$0xff] }
  0x76   : > { %579 = vperm.xlu2 %4231, %v4860_v38   ;;  %576 = vperm.xlu1 %4230, %v4863_v39  }
  0x77   : > { %573 = vperm.xlu0 %4229, %v4866_v40  }
  0x78   : > { %v4871_v41 = vpop.permute.xlu2 %480 }
  0x79   : > { %7722 = vst [vmem:[#allocation6_spill] sm:$0xff] %v4871_v41  ;;  %v4966_v41 = vld [vmem:[%s4710_s8 + $0x1b0] sm:$0xff] }
  0x7e   : > { %588 = vperm.xlu2 %4231, %v4874_v42   ;;  %585 = vperm.xlu1 %4230, %v4877_v43  }
  0x7f   : > { %582 = vperm.xlu0 %4229, %v4880_v44  }
  0x80   : > { %v4885_v45 = vpop.permute.xlu2 %489 }
  0x81   : > { %7723 = vst [vmem:[#allocation7_spill] sm:$0xff] %v4885_v45 }
  0x86   : > { %597 = vperm.xlu2 %4231, %v4888_v46   ;;  %594 = vperm.xlu1 %4230, %v4891_v47  }
  0x87   : > { %591 = vperm.xlu0 %4229, %v4894_v48  }
  0x88   : > { %v4899_v49 = vpop.permute.xlu2 %498  ;;  %v4901_v50 = vpop.permute.xlu1 %471 }
  0x89   : > { %7724 = vst [vmem:[#allocation8_spill] sm:$0xff] %v4899_v49  ;;  %v4903_v51 = vpop.permute.xlu0 %465  ;;  %v4948_v49 = vld [vmem:[%s4710_s8 + $0x198] sm:$0xff] }
  0x8a   : > { %7725 = vst [vmem:[#allocation9_spill] sm:$0xff] %v4901_v50  ;;  %v4978_v50 = vld [vmem:[%s4710_s8 + $0x1d8] sm:$0xff] }
  0x8b   : > { %7726 = vst [vmem:[#allocation10_spill] sm:$0xff] %v4903_v51  ;;  %v4984_v51 = vld [vmem:[%s4710_s8 + $0x1c8] sm:$0xff] }
  0x8c   : > { %7741 = vst [vmem:[#allocation25_spill] sm:$0xff] %v4978_v50 }
  0x8d   : > { %7742 = vst [vmem:[#allocation26_spill] sm:$0xff] %v4984_v51 }
  0x8e   : > { %606 = vperm.xlu2 %4231, %v4906_v52   ;;  %603 = vperm.xlu1 %4230, %v4909_v53  }
  0x8f   : > { %600 = vperm.xlu0 %4229, %v4912_v54  }
  0x90   : > { %v4917_v55 = vpop.permute.xlu2 %507  ;;  %v4919_v56 = vpop.permute.xlu1 %474 }
  0x91   : > { %7727 = vst [vmem:[#allocation11_spill] sm:$0xff] %v4917_v55  ;;  %v4921_v57 = vpop.permute.xlu0 %468  ;;  %v4945_v55 = vld [vmem:[%s4710_s8 + $0x1a0] sm:$0xff] }
  0x92   : > { %7728 = vst [vmem:[#allocation12_spill] sm:$0xff] %v4919_v56  ;;  %v4981_v56 = vld [vmem:[%s4710_s8 + $0x1d0] sm:$0xff] }
  0x93   : > { %7729 = vst [vmem:[#allocation13_spill] sm:$0xff] %v4921_v57 }
  0x96   : > { %615 = vperm.xlu2 %4231, %v4924_v58   ;;  %612 = vperm.xlu1 %4230, %v4927_v59  }
  0x97   : > { %609 = vperm.xlu0 %4229, %v4930_v60  }
  0x98   : > { %v4935_v61 = vpop.permute.xlu2 %516  ;;  %v4937_v62 = vpop.permute.xlu1 %486 }
  0x99   : > { %7730 = vst [vmem:[#allocation14_spill] sm:$0xff] %v4935_v61  ;;  %v4939_v63 = vpop.permute.xlu0 %483 }
  0x9a   : > { %7731 = vst [vmem:[#allocation15_spill] sm:$0xff] %v4937_v62  ;;  %v4960_v62 = vld [vmem:[%s4710_s8 + $0x1c0] sm:$0xff] }
  0x9b   : > { %7732 = vst [vmem:[#allocation16_spill] sm:$0xff] %v4939_v63 }
  0x9c   : > { %7737 = vst [vmem:[#allocation21_spill] sm:$0xff] %v4960_v62 }
  0x9e   : > { %624 = vperm.xlu2 %4231, %v4942_v0   ;;  %621 = vperm.xlu1 %4230, %v4945_v55   ;;  %v5002_v0 = vld [vmem:[%s4710_s8 + $0x1e0] sm:$0xff] }
  0x9f   : > { %618 = vperm.xlu0 %4229, %v4948_v49  }
  0xa0   : > { %v4953_v61 = vpop.permute.xlu2 %525  ;;  %v4955_v45 = vpop.permute.xlu1 %495 }
  0xa1   : > { %7734 = vst [vmem:[#allocation18_spill] sm:$0xff] %v4953_v61  ;;  %v4957_v63 = vpop.permute.xlu0 %492 }
  0xa2   : > { %7735 = vst [vmem:[#allocation19_spill] sm:$0xff] %v4955_v45 }
  0xa3   : > { %7736 = vst [vmem:[#allocation20_spill] sm:$0xff] %v4957_v63 }
  0xa6   : > { %633 = vperm.xlu2 %4231, %v4960_v62   ;;  %630 = vperm.xlu1 %4230, %v4963_v37  }
  0xa7   : > { %627 = vperm.xlu0 %4229, %v4966_v41  }
  0xa8   : > { %v4971_v61 = vpop.permute.xlu2 %534  ;;  %v4973_v45 = vpop.permute.xlu1 %504 }
  0xa9   : > { %7738 = vst [vmem:[#allocation22_spill] sm:$0xff] %v4971_v61  ;;  %v4975_v63 = vpop.permute.xlu0 %501 }
  0xaa   : > { %7739 = vst [vmem:[#allocation23_spill] sm:$0xff] %v4973_v45  ;;  %v4996_v45 = vld [vmem:[%s4710_s8 + $0x1f0] sm:$0xff] }
  0xab   : > { %7740 = vst [vmem:[#allocation24_spill] sm:$0xff] %v4975_v63  ;;  %v4999_v63 = vld [vmem:[%s4710_s8 + $0x1e8] sm:$0xff] }
  0xae   : > { %642 = vperm.xlu2 %4231, %v4978_v50   ;;  %639 = vperm.xlu1 %4230, %v4981_v56   ;;  %v7749_v50 = vmov 0  }
  0xaf   : > { %636 = vperm.xlu0 %4229, %v4984_v51   ;;  %v5018_v6 = vsel %vm401_vm4, 1, %v7749_v50  ;;  %v5021_v51 = vsel %vm400_vm5, 1, %v7749_v50  ;;  %v5042_v5 = vsel %vm404_vm12, 1, %v7749_v50  ;;  %vm341_vm4 = vcmp.lt.s32.totalorder %v4726_v4, 64  ;;  %vm407_vm5 = vmand %vm279_vm15, %vm343_vm0 }
  0xb0   : > { %v4989_v57 = vpop.permute.xlu2 %543  ;;  %v4991_v62 = vpop.permute.xlu1 %513  ;;  %7750 = vst [vmem:[#allocation33_spill] sm:$0xff] %v5021_v51  ;;  %vm405_vm7 = vmand %vm277_vm3, %vm341_vm4  ;;  %v5066_v9 = vsel %vm407_vm5, 1, %v7749_v50  ;;  %vm280_vm12 = vcmp.ge.s32.totalorder %v4738_v7, 0  ;;  %vm284_vm3 = vcmp.ge.s32.totalorder %v4768_v15, 0  ;;  %vm348_vm4 = vcmp.lt.s32.totalorder %v4768_v15, 64 }
  0xb1   : > { %7743 = vst [vmem:[#allocation27_spill] sm:$0xff] %v4989_v57  ;;  %v4993_v61 = vpop.permute.xlu0 %510  ;;  %vm409_vm15 = vmand %vm281_vm10, %vm345_vm11  ;;  %vm283_vm5 = vcmp.ge.s32.totalorder %v4750_v10, 0  ;;  %vm288_vm10 = vcmp.ge.s32.totalorder %v4777_v17, 0  ;;  %vm352_vm11 = vcmp.lt.s32.totalorder %v4777_v17, 64 }
  0xb2   : > { %7744 = vst [vmem:[#allocation28_spill] sm:$0xff] %v4991_v62 }
  0xb3   : > { %7745 = vst [vmem:[#allocation29_spill] sm:$0xff] %v4993_v61 }
  0xb6   : > { %651 = vperm.xlu2 %4231, %v4996_v45   ;;  %648 = vperm.xlu1 %4230, %v4999_v63  }
  0xb7   : > { %645 = vperm.xlu0 %4229, %v5002_v0  }
  0xb8   : > { %v5011_v57 = vpop.permute.xlu2 %552  ;;  %v5013_v62 = vpop.permute.xlu1 %522 }
  0xb9   : > { %7746 = vst [vmem:[#allocation30_spill] sm:$0xff] %v5011_v57  ;;  %v5015_v61 = vpop.permute.xlu0 %519 }
  0xba   : > { %7747 = vst [vmem:[#allocation31_spill] sm:$0xff] %v5013_v62  ;;  %v5045_v62 = vsel %vm403_vm13, 1, %v7749_v50  ;;  %vm344_vm13 = vcmp.lt.s32.totalorder %v4738_v7, 64 }
  0xbb   : > { %7748 = vst [vmem:[#allocation32_spill] sm:$0xff] %v5015_v61  ;;  %vm408_vm0 = vmand %vm280_vm12, %vm344_vm13  ;;  %vm287_vm12 = vcmp.ge.s32.totalorder %v4780_v18, 0  ;;  %vm351_vm13 = vcmp.lt.s32.totalorder %v4780_v18, 64 }
  0xbe   : > { %788 = vperm.xlu2 %4231, %v5018_v6   ;;  %785 = vperm.xlu1 %4230, %v5021_v51   ;;  %v5048_v51 = vsel %vm402_vm14, 1, %v7749_v50  ;;  %vm410_vm14 = vmand %vm282_vm8, %vm346_vm9 }
  0xbf   : > { %654 = vperm.xlu0 %4229, %v5024_v3   ;;  %v5090_v12 = vsel %vm410_vm14, 1, %v7749_v50  ;;  %vm412_vm8 = vmand %vm284_vm3, %vm348_vm4  ;;  %vm286_vm14 = vcmp.ge.s32.totalorder %v4762_v13, 0  ;;  %vm291_vm3 = vcmp.ge.s32.totalorder %v4789_v20, 0  ;;  %vm355_vm4 = vcmp.lt.s32.totalorder %v4789_v20, 64 }
  0xc0   : > { %v5035_v57 = vpop.permute.xlu2 %561  ;;  %v5037_v61 = vpop.permute.xlu1 %531 }
  0xc1   : > { %7751 = vst [vmem:[#allocation34_spill] sm:$0xff] %v5035_v57  ;;  %v5039_v1 = vpop.permute.xlu0 %528  ;;  %v5072_v57 = vsel %vm405_vm7, 1, %v7749_v50  ;;  %vm413_vm7 = vmand %vm285_vm1, %vm349_vm2 }
  0xc2   : > { %7752 = vst [vmem:[#allocation35_spill] sm:$0xff] %v5037_v61  ;;  %v5114_v15 = vsel %vm413_vm7, 1, %v7749_v50  ;;  %vm415_vm1 = vmand %vm287_vm12, %vm351_vm13  ;;  %vm289_vm7 = vcmp.ge.s32.totalorder %v4774_v16, 0  ;;  %vm294_vm12 = vcmp.ge.s32.totalorder %v4801_v23, 0  ;;  %vm358_vm13 = vcmp.lt.s32.totalorder %v4801_v23, 64 }
  0xc3   : > { %7753 = vst [vmem:[#allocation36_spill] sm:$0xff] %v5039_v1  ;;  %v5069_v1 = vsel %vm406_vm6, 1, %v7749_v50  ;;  %vm347_vm6 = vcmp.lt.s32.totalorder %v4750_v10, 64 }
  0xc4   : > { %vm411_vm9 = vmand %vm283_vm5, %vm347_vm6  ;;  %vm290_vm5 = vcmp.ge.s32.totalorder %v4792_v21, 0  ;;  %vm354_vm6 = vcmp.lt.s32.totalorder %v4792_v21, 64 }
  0xc6   : > { %797 = vperm.xlu2 %4231, %v5042_v5   ;;  %794 = vperm.xlu1 %4230, %v5045_v62  }
  0xc7   : > { %791 = vperm.xlu0 %4229, %v5048_v51  }
  0xc8   : > { %v5059_v2 = vpop.permute.xlu2 %570  ;;  %v5061_v61 = vpop.permute.xlu1 %540 }
  0xc9   : > { %7754 = vst [vmem:[#allocation37_spill] sm:$0xff] %v5059_v2  ;;  %v5063_v8 = vpop.permute.xlu0 %537  ;;  %v5096_v2 = vsel %vm408_vm0, 1, %v7749_v50  ;;  %vm416_vm0 = vmand %vm288_vm10, %vm352_vm11 }
  0xca   : > { %7755 = vst [vmem:[#allocation38_spill] sm:$0xff] %v5061_v61  ;;  %v5093_v61 = vsel %vm409_vm15, 1, %v7749_v50  ;;  %vm350_vm15 = vcmp.lt.s32.totalorder %v4762_v13, 64  ;;  %v5138_v18 = vsel %vm416_vm0, 1, %v7749_v50  ;;  %vm418_vm10 = vmand %vm290_vm5, %vm354_vm6  ;;  %vm292_vm0 = vcmp.ge.s32.totalorder %v4786_v19, 0 }
  0xcb   : > { %7756 = vst [vmem:[#allocation39_spill] sm:$0xff] %v5063_v8  ;;  %vm414_vm2 = vmand %vm286_vm14, %vm350_vm15  ;;  %vm293_vm14 = vcmp.ge.s32.totalorder %v4804_v24, 0  ;;  %vm357_vm15 = vcmp.lt.s32.totalorder %v4804_v24, 64  ;;  %vm297_vm5 = vcmp.ge.s32.totalorder %v4813_v26, 0  ;;  %vm361_vm6 = vcmp.lt.s32.totalorder %v4813_v26, 64 }
  0xce   : > { %806 = vperm.xlu2 %4231, %v5066_v9   ;;  %803 = vperm.xlu1 %4230, %v5069_v1  }
  0xcf   : > { %800 = vperm.xlu0 %4229, %v5072_v57  }
  0xd0   : > { %v5083_v4 = vpop.permute.xlu2 %579  ;;  %v5085_v8 = vpop.permute.xlu1 %549 }
  0xd1   : > { %7757 = vst [vmem:[#allocation40_spill] sm:$0xff] %v5083_v4  ;;  %v5087_v11 = vpop.permute.xlu0 %546  ;;  %v5120_v4 = vsel %vm411_vm9, 1, %v7749_v50  ;;  %vm419_vm9 = vmand %vm291_vm3, %vm355_vm4 }
  0xd2   : > { %7758 = vst [vmem:[#allocation41_spill] sm:$0xff] %v5085_v8  ;;  %v5162_v21 = vsel %vm419_vm9, 1, %v7749_v50  ;;  %vm421_vm3 = vmand %vm293_vm14, %vm357_vm15  ;;  %vm295_vm9 = vcmp.ge.s32.totalorder %v4798_v22, 0  ;;  %vm300_vm14 = vcmp.ge.s32.totalorder %v4825_v29, 0  ;;  %vm364_vm15 = vcmp.lt.s32.totalorder %v4825_v29, 64 }
  0xd3   : > { %7759 = vst [vmem:[#allocation42_spill] sm:$0xff] %v5087_v11  ;;  %v5117_v11 = vsel %vm412_vm8, 1, %v7749_v50  ;;  %vm353_vm8 = vcmp.lt.s32.totalorder %v4774_v16, 64 }
  0xd4   : > { %vm417_vm11 = vmand %vm289_vm7, %vm353_vm8  ;;  %vm296_vm7 = vcmp.ge.s32.totalorder %v4816_v27, 0  ;;  %vm360_vm8 = vcmp.lt.s32.totalorder %v4816_v27, 64 }
  0xd6   : > { %815 = vperm.xlu2 %4231, %v5090_v12   ;;  %812 = vperm.xlu1 %4230, %v5093_v61  }
  0xd7   : > { %809 = vperm.xlu0 %4229, %v5096_v2  }
  0xd8   : > { %v5107_v7 = vpop.permute.xlu2 %588  ;;  %v5109_v8 = vpop.permute.xlu1 %558 }
  0xd9   : > { %7760 = vst [vmem:[#allocation43_spill] sm:$0xff] %v5107_v7  ;;  %v5111_v14 = vpop.permute.xlu0 %555  ;;  %v5144_v7 = vsel %vm414_vm2, 1, %v7749_v50  ;;  %vm422_vm2 = vmand %vm294_vm12, %vm358_vm13 }
  0xda   : > { %7761 = vst [vmem:[#allocation44_spill] sm:$0xff] %v5109_v8  ;;  %v5141_v8 = vsel %vm415_vm1, 1, %v7749_v50  ;;  %vm356_vm1 = vcmp.lt.s32.totalorder %v4786_v19, 64  ;;  %v5186_v24 = vsel %vm422_vm2, 1, %v7749_v50  ;;  %vm424_vm12 = vmand %vm296_vm7, %vm360_vm8  ;;  %vm298_vm2 = vcmp.ge.s32.totalorder %v4810_v25, 0 }
  0xdb   : > { %7762 = vst [vmem:[#allocation45_spill] sm:$0xff] %v5111_v14  ;;  %vm420_vm4 = vmand %vm292_vm0, %vm356_vm1  ;;  %vm299_vm0 = vcmp.ge.s32.totalorder %v4828_v30, 0  ;;  %vm363_vm1 = vcmp.lt.s32.totalorder %v4828_v30, 64  ;;  %vm303_vm7 = vcmp.ge.s32.totalorder %v4837_v32, 0  ;;  %vm367_vm8 = vcmp.lt.s32.totalorder %v4837_v32, 64 }
  0xde   : > { %824 = vperm.xlu2 %4231, %v5114_v15   ;;  %821 = vperm.xlu1 %4230, %v5117_v11  }
  0xdf   : > { %818 = vperm.xlu0 %4229, %v5120_v4  }
  0xe0   : > { %v5131_v10 = vpop.permute.xlu2 %597  ;;  %v5133_v14 = vpop.permute.xlu1 %567 }
  0xe1   : > { %7763 = vst [vmem:[#allocation46_spill] sm:$0xff] %v5131_v10  ;;  %v5135_v17 = vpop.permute.xlu0 %564 }
  0xe2   : > { %7764 = vst [vmem:[#allocation47_spill] sm:$0xff] %v5133_v14  ;;  %v5165_v14 = vsel %vm418_vm10, 1, %v7749_v50  ;;  %vm359_vm10 = vcmp.lt.s32.totalorder %v4798_v22, 64 }
  0xe3   : > { %7765 = vst [vmem:[#allocation48_spill] sm:$0xff] %v5135_v17  ;;  %v5168_v17 = vsel %vm417_vm11, 1, %v7749_v50  ;;  %vm425_vm11 = vmand %vm297_vm5, %vm361_vm6 }
  0xe4   : > { %vm423_vm13 = vmand %vm295_vm9, %vm359_vm10  ;;  %v5210_v27 = vsel %vm425_vm11, 1, %v7749_v50  ;;  %vm302_vm9 = vcmp.ge.s32.totalorder %v4840_v33, 0  ;;  %vm366_vm10 = vcmp.lt.s32.totalorder %v4840_v33, 64  ;;  %vm301_vm11 = vcmp.ge.s32.totalorder %v4822_v28, 0 }
  0xe5   : > { %7775 = vst [vmem:[#allocation58_spill] sm:$0xff] %v5210_v27  ;;  %vm427_vm5 = vmand %vm299_vm0, %vm363_vm1  ;;  %vm306_vm0 = vcmp.ge.s32.totalorder %v4849_v35, 0  ;;  %vm370_vm1 = vcmp.lt.s32.totalorder %v4849_v35, 64 }
  0xe6   : > { %833 = vperm.xlu2 %4231, %v5138_v18   ;;  %830 = vperm.xlu1 %4230, %v5141_v8  }
  0xe7   : > { %827 = vperm.xlu0 %4229, %v5144_v7  }
  0xe8   : > { %v5155_v13 = vpop.permute.xlu2 %606  ;;  %v5157_v10 = vpop.permute.xlu1 %576 }
  0xe9   : > { %7766 = vst [vmem:[#allocation49_spill] sm:$0xff] %v5155_v13  ;;  %v5159_v20 = vpop.permute.xlu0 %573 }
  0xea   : > { %7767 = vst [vmem:[#allocation50_spill] sm:$0xff] %v5157_v10  ;;  %v5192_v10 = vsel %vm420_vm4, 1, %v7749_v50  ;;  %vm428_vm4 = vmand %vm300_vm14, %vm364_vm15 }
  0xeb   : > { %7768 = vst [vmem:[#allocation51_spill] sm:$0xff] %v5159_v20  ;;  %v5189_v20 = vsel %vm421_vm3, 1, %v7749_v50  ;;  %vm362_vm3 = vcmp.lt.s32.totalorder %v4810_v25, 64  ;;  %v5234_v30 = vsel %vm428_vm4, 1, %v7749_v50  ;;  %vm430_vm14 = vmand %vm302_vm9, %vm366_vm10  ;;  %vm304_vm4 = vcmp.ge.s32.totalorder %v4834_v31, 0 }
  0xec   : > { %vm426_vm6 = vmand %vm298_vm2, %vm362_vm3  ;;  %7780 = vst [vmem:[#allocation63_spill] sm:$0xff] %v5234_v30  ;;  %vm305_vm2 = vcmp.ge.s32.totalorder %v4852_v36, 0  ;;  %vm369_vm3 = vcmp.lt.s32.totalorder %v4852_v36, 64  ;;  %vm309_vm9 = vcmp.ge.s32.totalorder %v4863_v39, 0  ;;  %vm373_vm10 = vcmp.lt.s32.totalorder %v4863_v39, 64 }
  0xee   : > { %842 = vperm.xlu2 %4231, %v5162_v21   ;;  %839 = vperm.xlu1 %4230, %v5165_v14  }
  0xef   : > { %836 = vperm.xlu0 %4229, %v5168_v17  }
  0xf0   : > { %v5179_v16 = vpop.permute.xlu2 %615  ;;  %v5181_v13 = vpop.permute.xlu1 %585 }
  0xf1   : > { %7769 = vst [vmem:[#allocation52_spill] sm:$0xff] %v5179_v16  ;;  %v5183_v23 = vpop.permute.xlu0 %582 }
  0xf2   : > { %7770 = vst [vmem:[#allocation53_spill] sm:$0xff] %v5181_v13  ;;  %v5213_v13 = vsel %vm424_vm12, 1, %v7749_v50  ;;  %vm365_vm12 = vcmp.lt.s32.totalorder %v4822_v28, 64 }
  0xf3   : > { %7771 = vst [vmem:[#allocation54_spill] sm:$0xff] %v5183_v23  ;;  %v5216_v23 = vsel %vm423_vm13, 1, %v7749_v50  ;;  %vm431_vm13 = vmand %vm303_vm7, %vm367_vm8 }
  0xf4   : > { %7776 = vst [vmem:[#allocation59_spill] sm:$0xff] %v5213_v13  ;;  %vm429_vm15 = vmand %vm301_vm11, %vm365_vm12  ;;  %v5258_v33 = vsel %vm431_vm13, 1, %v7749_v50  ;;  %vm308_vm11 = vcmp.ge.s32.totalorder %v4866_v40, 0  ;;  %vm372_vm12 = vcmp.lt.s32.totalorder %v4866_v40, 64  ;;  %vm307_vm13 = vcmp.ge.s32.totalorder %v4846_v34, 0 }
  0xf5   : > { %7786 = vst [vmem:[#allocation69_spill] sm:$0xff] %v5258_v33  ;;  %vm433_vm7 = vmand %vm305_vm2, %vm369_vm3  ;;  %vm312_vm2 = vcmp.ge.s32.totalorder %v4877_v43, 0  ;;  %vm376_vm3 = vcmp.lt.s32.totalorder %v4877_v43, 64 }
  0xf6   : > { %851 = vperm.xlu2 %4231, %v5186_v24   ;;  %848 = vperm.xlu1 %4230, %v5189_v20  }
  0xf7   : > { %845 = vperm.xlu0 %4229, %v5192_v10  }
  0xf8   : > { %v5203_v19 = vpop.permute.xlu2 %624  ;;  %v5205_v16 = vpop.permute.xlu1 %594 }
  0xf9   : > { %7772 = vst [vmem:[#allocation55_spill] sm:$0xff] %v5203_v19  ;;  %v5207_v26 = vpop.permute.xlu0 %591 }
  0xfa   : > { %7773 = vst [vmem:[#allocation56_spill] sm:$0xff] %v5205_v16  ;;  %v5237_v16 = vsel %vm427_vm5, 1, %v7749_v50  ;;  %vm368_vm5 = vcmp.lt.s32.totalorder %v4834_v31, 64 }
  0xfb   : > { %7774 = vst [vmem:[#allocation57_spill] sm:$0xff] %v5207_v26  ;;  %v5240_v26 = vsel %vm426_vm6, 1, %v7749_v50  ;;  %vm434_vm6 = vmand %vm306_vm0, %vm370_vm1 }
  0xfc   : > { %7781 = vst [vmem:[#allocation64_spill] sm:$0xff] %v5237_v16  ;;  %vm432_vm8 = vmand %vm304_vm4, %vm368_vm5  ;;  %v5282_v36 = vsel %vm434_vm6, 1, %v7749_v50  ;;  %vm311_vm4 = vcmp.ge.s32.totalorder %v4880_v44, 0  ;;  %vm375_vm5 = vcmp.lt.s32.totalorder %v4880_v44, 64  ;;  %vm310_vm6 = vcmp.ge.s32.totalorder %v4860_v38, 0 }
  0xfd   : > { %7782 = vst [vmem:[#allocation65_spill] sm:$0xff] %v5240_v26  ;;  %vm436_vm0 = vmand %vm308_vm11, %vm372_vm12  ;;  %vm315_vm11 = vcmp.ge.s32.totalorder %v4891_v47, 0  ;;  %vm379_vm12 = vcmp.lt.s32.totalorder %v4891_v47, 64 }
  0xfe   : > { %860 = vperm.xlu2 %4231, %v5210_v27   ;;  %857 = vperm.xlu1 %4230, %v5213_v13   ;;  %v4495_v13 = vld [vmem:[%s4710_s8 + $0x8] sm:$0xff] }
  0xff   : > { %854 = vperm.xlu0 %4229, %v5216_v23  }
 0x100   : > { %v5227_v22 = vpop.permute.xlu2 %633  ;;  %v5229_v19 = vpop.permute.xlu1 %603 }
 0x101   : > { %7777 = vst [vmem:[#allocation60_spill] sm:$0xff] %v5227_v22  ;;  %v5231_v29 = vpop.permute.xlu0 %600 }
 0x102   : > { %7778 = vst [vmem:[#allocation61_spill] sm:$0xff] %v5229_v19  ;;  %v5261_v19 = vsel %vm430_vm14, 1, %v7749_v50  ;;  %vm371_vm14 = vcmp.lt.s32.totalorder %v4846_v34, 64 }
 0x103   : > { %7779 = vst [vmem:[#allocation62_spill] sm:$0xff] %v5231_v29  ;;  %v5264_v29 = vsel %vm429_vm15, 1, %v7749_v50  ;;  %vm437_vm15 = vmand %vm309_vm9, %vm373_vm10 }
 0x104   : > { %7787 = vst [vmem:[#allocation70_spill] sm:$0xff] %v5261_v19  ;;  %vm435_vm1 = vmand %vm307_vm13, %vm371_vm14  ;;  %v5306_v40 = vsel %vm437_vm15, 1, %v7749_v50  ;;  %vm314_vm13 = vcmp.ge.s32.totalorder %v4894_v48, 0  ;;  %vm378_vm14 = vcmp.lt.s32.totalorder %v4894_v48, 64  ;;  %vm313_vm15 = vcmp.ge.s32.totalorder %v4874_v42, 0 }
 0x105   : > { %7788 = vst [vmem:[#allocation71_spill] sm:$0xff] %v5264_v29  ;;  %vm439_vm9 = vmand %vm311_vm4, %vm375_vm5  ;;  %vm318_vm4 = vcmp.ge.s32.totalorder %v4909_v53, 0  ;;  %vm382_vm5 = vcmp.lt.s32.totalorder %v4909_v53, 64 }
 0x106   : > { %869 = vperm.xlu2 %4231, %v5234_v30   ;;  %866 = vperm.xlu1 %4230, %v5237_v16  }
 0x107   : > { %863 = vperm.xlu0 %4229, %v5240_v26  }
 0x108   : > { %v5251_v25 = vpop.permute.xlu2 %642  ;;  %v5253_v22 = vpop.permute.xlu1 %612 }
 0x109   : > { %7783 = vst [vmem:[#allocation66_spill] sm:$0xff] %v5251_v25  ;;  %v5255_v32 = vpop.permute.xlu0 %609 }
 0x10a   : > { %7784 = vst [vmem:[#allocation67_spill] sm:$0xff] %v5253_v22  ;;  %v5288_v22 = vsel %vm432_vm8, 1, %v7749_v50  ;;  %vm440_vm8 = vmand %vm312_vm2, %vm376_vm3 }
 0x10b   : > { %7785 = vst [vmem:[#allocation68_spill] sm:$0xff] %v5255_v32  ;;  %v5285_v32 = vsel %vm433_vm7, 1, %v7749_v50  ;;  %vm374_vm7 = vcmp.lt.s32.totalorder %v4860_v38, 64  ;;  %v5330_v44 = vsel %vm440_vm8, 1, %v7749_v50  ;;  %vm442_vm2 = vmand %vm314_vm13, %vm378_vm14  ;;  %vm316_vm8 = vcmp.ge.s32.totalorder %v4888_v46, 0 }
 0x10c   : > { %vm438_vm10 = vmand %vm310_vm6, %vm374_vm7  ;;  %vm317_vm6 = vcmp.ge.s32.totalorder %v4912_v54, 0  ;;  %vm381_vm7 = vcmp.lt.s32.totalorder %v4912_v54, 64  ;;  %vm321_vm13 = vcmp.ge.s32.totalorder %v4927_v59, 0  ;;  %vm385_vm14 = vcmp.lt.s32.totalorder %v4927_v59, 64 }
 0x10e   : > { %878 = vperm.xlu2 %4231, %v5258_v33   ;;  %875 = vperm.xlu1 %4230, %v5261_v19   ;;  %v5336_v33 = vsel %vm438_vm10, 1, %v7749_v50  ;;  %vm446_vm10 = vmand %vm318_vm4, %vm382_vm5 }
 0x10f   : > { %872 = vperm.xlu0 %4229, %v5264_v29   ;;  %v5378_v54 = vsel %vm446_vm10, 1, %v7749_v50  ;;  %vm322_vm10 = vcmp.ge.s32.totalorder %v4924_v58, 0 }
 0x110   : > { %v5275_v28 = vpop.permute.xlu2 %651  ;;  %v5277_v25 = vpop.permute.xlu1 %621 }
 0x111   : > { %7789 = vst [vmem:[#allocation72_spill] sm:$0xff] %v5275_v28  ;;  %v5279_v35 = vpop.permute.xlu0 %618 }
 0x112   : > { %7790 = vst [vmem:[#allocation73_spill] sm:$0xff] %v5277_v25  ;;  %v5309_v25 = vsel %vm436_vm0, 1, %v7749_v50  ;;  %vm377_vm0 = vcmp.lt.s32.totalorder %v4874_v42, 64 }
 0x113   : > { %7791 = vst [vmem:[#allocation74_spill] sm:$0xff] %v5279_v35  ;;  %v5312_v35 = vsel %vm435_vm1, 1, %v7749_v50  ;;  %vm443_vm1 = vmand %vm315_vm11, %vm379_vm12 }
 0x114   : > { %vm441_vm3 = vmand %vm313_vm15, %vm377_vm0  ;;  %v5354_v48 = vsel %vm443_vm1, 1, %v7749_v50  ;;  %vm320_vm15 = vcmp.ge.s32.totalorder %v4930_v60, 0  ;;  %vm384_vm0 = vcmp.lt.s32.totalorder %v4930_v60, 64  ;;  %vm319_vm1 = vcmp.ge.s32.totalorder %v4906_v52, 0 }
 0x115   : > { %v5360_v19 = vsel %vm441_vm3, 1, %v7749_v50  ;;  %vm445_vm11 = vmand %vm317_vm6, %vm381_vm7  ;;  %vm324_vm6 = vcmp.ge.s32.totalorder %v4945_v55, 0  ;;  %vm388_vm7 = vcmp.lt.s32.totalorder %v4945_v55, 64 }
 0x116   : > { %887 = vperm.xlu2 %4231, %v5282_v36   ;;  %884 = vperm.xlu1 %4230, %v5285_v32   ;;  %vm449_vm3 = vmand %vm321_vm13, %vm385_vm14 }
 0x117   : > { %881 = vperm.xlu0 %4229, %v5288_v22   ;;  %vm448_vm4 = vmand %vm320_vm15, %vm384_vm0  ;;  %v5402_v60 = vsel %vm449_vm3, 1, %v7749_v50  ;;  %vm327_vm15 = vcmp.ge.s32.totalorder %v4963_v37, 0  ;;  %vm391_vm0 = vcmp.lt.s32.totalorder %v4963_v37, 64 }
 0x118   : > { %v5299_v31 = vpop.permute.xlu1 %630  ;;  %v5301_v28 = vpop.permute.xlu2 %788 }
 0x119   : > { %7792 = vst [vmem:[#allocation75_spill] sm:$0xff] %v5299_v31  ;;  %v5303_v39 = vpop.permute.xlu0 %627  ;;  %v5333_v31 = vsel %vm439_vm9, 1, %v7749_v50  ;;  %vm380_vm9 = vcmp.lt.s32.totalorder %v4888_v46, 64 }
 0x11a   : > { %7793 = vst [vmem:[#allocation76_spill] sm:$0xff] %v5303_v39  ;;  %vm444_vm12 = vmand %vm316_vm8, %vm380_vm9  ;;  %vm323_vm8 = vcmp.ge.s32.totalorder %v4948_v49, 0  ;;  %vm387_vm9 = vcmp.lt.s32.totalorder %v4948_v49, 64 }
 0x11b   : > { %vm451_vm13 = vmand %vm323_vm8, %vm387_vm9  ;;  %vm330_vm8 = vcmp.ge.s32.totalorder %v4981_v56, 0  ;;  %vm394_vm9 = vcmp.lt.s32.totalorder %v4981_v56, 64 }
 0x11c   : > { %v5429_v30 = vsel %vm451_vm13, 1, %v7749_v50 }
 0x11e   : > { %896 = vperm.xlu2 %4231, %v5306_v40   ;;  %893 = vperm.xlu1 %4230, %v5309_v25  }
 0x11f   : > { %890 = vperm.xlu0 %4229, %v5312_v35  }
 0x120   : > { %v5323_v34 = vpop.permute.xlu1 %639  ;;  %v5325_v39 = vpop.permute.xlu2 %797 }
 0x121   : > { %7794 = vst [vmem:[#allocation77_spill] sm:$0xff] %v5323_v34  ;;  %v5327_v43 = vpop.permute.xlu0 %636 }
 0x122   : > { %7795 = vst [vmem:[#allocation78_spill] sm:$0xff] %v5325_v39 }
 0x123   : > { %7796 = vst [vmem:[#allocation79_spill] sm:$0xff] %v5327_v43  ;;  %v5357_v43 = vsel %vm442_vm2, 1, %v7749_v50  ;;  %vm383_vm2 = vcmp.lt.s32.totalorder %v4906_v52, 64 }
 0x124   : > { %vm447_vm5 = vmand %vm319_vm1, %vm383_vm2  ;;  %vm326_vm1 = vcmp.ge.s32.totalorder %v4966_v41, 0  ;;  %vm390_vm2 = vcmp.lt.s32.totalorder %v4966_v41, 64 }
 0x125   : > { %v5408_v29 = vsel %vm447_vm5, 1, %v7749_v50  ;;  %vm455_vm5 = vmand %vm327_vm15, %vm391_vm0 }
 0x126   : > { %905 = vperm.xlu2 %4231, %v5330_v44   ;;  %902 = vperm.xlu1 %4230, %v5333_v31   ;;  %v5450_v41 = vsel %vm455_vm5, 1, %v7749_v50 }
 0x127   : > { %899 = vperm.xlu0 %4229, %v5336_v33   ;;  %7812 = vst [vmem:[#allocation93_spill] sm:$0xff] %v5450_v41 }
 0x128   : > { %v5347_v38 = vpop.permute.xlu1 %648  ;;  %v5349_v34 = vpop.permute.xlu2 %806 }
 0x129   : > { %7797 = vst [vmem:[#allocation80_spill] sm:$0xff] %v5347_v38  ;;  %v5351_v47 = vpop.permute.xlu0 %645  ;;  %v5381_v38 = vsel %vm445_vm11, 1, %v7749_v50  ;;  %vm386_vm11 = vcmp.lt.s32.totalorder %v4924_v58, 64  ;;  %v7808_v58 = vld [vmem:[#allocation17_spill] sm:$0xff] }
 0x12a   : > { %7798 = vst [vmem:[#allocation81_spill] sm:$0xff] %v5349_v34  ;;  %v5384_v34 = vsel %vm444_vm12, 1, %v7749_v50  ;;  %vm452_vm12 = vmand %vm324_vm6, %vm388_vm7  ;;  %vm325_vm3 = vcmp.ge.s32.totalorder %v7808_v58, 0 }
 0x12b   : > { %7799 = vst [vmem:[#allocation82_spill] sm:$0xff] %v5351_v47  ;;  %vm450_vm14 = vmand %vm322_vm10, %vm386_vm11  ;;  %v5426_v49 = vsel %vm452_vm12, 1, %v7749_v50 }
 0x12c   : > { %v5432_v26 = vsel %vm450_vm14, 1, %v7749_v50  ;;  %vm454_vm6 = vmand %vm326_vm1, %vm390_vm2  ;;  %vm333_vm1 = vcmp.ge.s32.totalorder %v4999_v63, 0  ;;  %vm397_vm2 = vcmp.lt.s32.totalorder %v4999_v63, 64 }
 0x12d   : > { %v5453_v39 = vsel %vm454_vm6, 1, %v7749_v50  ;;  %vm458_vm14 = vmand %vm330_vm8, %vm394_vm9 }
 0x12e   : > { %914 = vperm.xlu2 %4231, %v5354_v48   ;;  %911 = vperm.xlu1 %4230, %v5357_v43  }
 0x12f   : > { %908 = vperm.xlu0 %4229, %v5360_v19  }
 0x130   : > { %v5371_v42 = vpop.permute.xlu2 %815  ;;  %v5373_v47 = vpop.permute.xlu1 %785 }
 0x131   : > { %7800 = vst [vmem:[#allocation83_spill] sm:$0xff] %v5371_v42  ;;  %v5375_v53 = vpop.permute.xlu0 %654  ;;  %v5405_v42 = vsel %vm448_vm4, 1, %v7749_v50  ;;  %vm389_vm4 = vcmp.lt.s32.totalorder %v7808_v58, 64  ;;  %v7814_v58 = vld [vmem:[#allocation26_spill] sm:$0xff] }
 0x132   : > { %7801 = vst [vmem:[#allocation84_spill] sm:$0xff] %v5375_v53  ;;  %vm453_vm7 = vmand %vm325_vm3, %vm389_vm4  ;;  %vm329_vm10 = vcmp.ge.s32.totalorder %v7814_v58, 0  ;;  %vm393_vm11 = vcmp.lt.s32.totalorder %v7814_v58, 64  ;;  %v5474_v58 = vsel %vm458_vm14, 1, %v7749_v50  ;;  %vm332_vm3 = vcmp.ge.s32.totalorder %v5002_v0, 0 }
 0x133   : > { %v5456_v16 = vsel %vm453_vm7, 1, %v7749_v50  ;;  %vm457_vm15 = vmand %vm329_vm10, %vm393_vm11  ;;  %7819 = vst [vmem:[#allocation96_spill] sm:$0xff] %v5474_v58  ;;  %vm396_vm4 = vcmp.lt.s32.totalorder %v5002_v0, 64  ;;  %vm335_vm10 = vcmp.ge.s32.totalorder %v5024_v3, 0  ;;  %vm399_vm11 = vcmp.lt.s32.totalorder %v5024_v3, 64 }
 0x134   : > { %7813 = vst [vmem:[#allocation94_spill] sm:$0xff] %v5456_v16  ;;  %vm461_vm7 = vmand %vm333_vm1, %vm397_vm2  ;;  %vm977_vm1 = vcmp.eq.s32.totalorder %v5301_v28, 1  ;;  %vm976_vm2 = vcmp.eq.s32.totalorder %v5373_v47, 1 }
 0x135   : > { %vm460_vm8 = vmand %vm332_vm3, %vm396_vm4  ;;  %v5498_v0 = vsel %vm461_vm7, 1, %v7749_v50 }
 0x136   : > { %923 = vperm.xlu2 %4231, %v5378_v54   ;;  %920 = vperm.xlu1 %4230, %v5381_v38   ;;  %7826 = vst [vmem:[#allocation101_spill] sm:$0xff] %v5498_v0  ;;  %vm463_vm14 = vmand %vm335_vm10, %vm399_vm11 }
 0x137   : > { %917 = vperm.xlu0 %4229, %v5384_v34   ;;  %v5520_v3 = vsel %vm463_vm14, 1, %v7749_v50 }
 0x138   : > { %v5395_v46 = vpop.permute.xlu2 %824  ;;  %v5397_v53 = vpop.permute.xlu1 %794  ;;  %7832 = vst [vmem:[#allocation107_spill] sm:$0xff] %v5520_v3 }
 0x139   : > { %7802 = vst [vmem:[#allocation85_spill] sm:$0xff] %v5395_v46  ;;  %v5399_v59 = vpop.permute.xlu0 %791 }
 0x13a   : > { %7803 = vst [vmem:[#allocation86_spill] sm:$0xff] %v5397_v53  ;;  %v4544_v53 = vld [vmem:[%s4710_s8 + $0x188] sm:$0xff] }
 0x13b   : > { %7804 = vst [vmem:[#allocation87_spill] sm:$0xff] %v5399_v59 }
 0x13e   : > { %932 = vperm.xlu2 %4231, %v5402_v60   ;;  %929 = vperm.xlu1 %4230, %v5405_v42  }
 0x13f   : > { %926 = vperm.xlu0 %4229, %v5408_v29  }
 0x140   : > { %v5419_v52 = vpop.permute.xlu2 %833  ;;  %v5421_v46 = vpop.permute.xlu1 %803 }
 0x141   : > { %7805 = vst [vmem:[#allocation88_spill] sm:$0xff] %v5419_v52  ;;  %v5423_v55 = vpop.permute.xlu0 %800 }
 0x142   : > { %7806 = vst [vmem:[#allocation89_spill] sm:$0xff] %v5421_v46 }
 0x143   : > { %7807 = vst [vmem:[#allocation90_spill] sm:$0xff] %v5423_v55  ;;  %v5477_v55 = vsel %vm457_vm15, 1, %v7749_v50 }
 0x144   : > { %7820 = vst [vmem:[#allocation97_spill] sm:$0xff] %v5477_v55 }
 0x146   : > { %941 = vperm.xlu2 %4231, %v5426_v49   ;;  %938 = vperm.xlu1 %4230, %v5429_v30  }
 0x147   : > { %935 = vperm.xlu0 %4229, %v5432_v26  }
 0x148   : > { %v5443_v52 = vpop.permute.xlu2 %842  ;;  %v5445_v46 = vpop.permute.xlu1 %812 }
 0x149   : > { %7809 = vst [vmem:[#allocation17_spill] sm:$0xff] %v5443_v52  ;;  %v5447_v37 = vpop.permute.xlu0 %809  ;;  %v7815_v52 = vld [vmem:[#allocation21_spill] sm:$0xff] }
 0x14a   : > { %7810 = vst [vmem:[#allocation91_spill] sm:$0xff] %v5445_v46  ;;  %vm328_vm12 = vcmp.ge.s32.totalorder %v7815_v52, 0  ;;  %vm392_vm13 = vcmp.lt.s32.totalorder %v7815_v52, 64  ;;  %v7822_v52 = vld [vmem:[#allocation25_spill] sm:$0xff] }
 0x14b   : > { %7811 = vst [vmem:[#allocation92_spill] sm:$0xff] %v5447_v37  ;;  %vm456_vm0 = vmand %vm328_vm12, %vm392_vm13  ;;  %vm331_vm5 = vcmp.ge.s32.totalorder %v7822_v52, 0  ;;  %vm395_vm6 = vcmp.lt.s32.totalorder %v7822_v52, 64  ;;  %vm334_vm12 = vcmp.ge.s32.totalorder %v4996_v45, 0  ;;  %vm398_vm13 = vcmp.lt.s32.totalorder %v4996_v45, 64 }
 0x14c   : > { %v5480_v27 = vsel %vm456_vm0, 1, %v7749_v50  ;;  %vm459_vm9 = vmand %vm331_vm5, %vm395_vm6 }
 0x14d   : > { %7821 = vst [vmem:[#allocation98_spill] sm:$0xff] %v5480_v27  ;;  %v5504_v52 = vsel %vm459_vm9, 1, %v7749_v50  ;;  %vm462_vm15 = vmand %vm334_vm12, %vm398_vm13 }
 0x14e   : > { %950 = vperm.xlu2 %4231, %v5450_v41   ;;  %947 = vperm.xlu1 %4230, %v5453_v39   ;;  %7828 = vst [vmem:[#allocation103_spill] sm:$0xff] %v5504_v52  ;;  %v5524_v45 = vsel %vm462_vm15, 1, %v7749_v50 }
 0x14f   : > { %944 = vperm.xlu0 %4229, %v5456_v16   ;;  %7833 = vst [vmem:[#allocation108_spill] sm:$0xff] %v5524_v45  ;;  %v4556_v16 = vld [vmem:[%s4710_s8 + $0x1e8] sm:$0xff] }
 0x150   : > { %v5467_v37 = vpop.permute.xlu2 %851  ;;  %v5469_v46 = vpop.permute.xlu1 %821  ;;  %v1549_v41 = vadd.s32 64, %v4556_v16 }
 0x151   : > { %7816 = vst [vmem:[#allocation26_spill] sm:$0xff] %v5467_v37  ;;  %v5471_v56 = vpop.permute.xlu0 %818 }
 0x152   : > { %7817 = vst [vmem:[#allocation21_spill] sm:$0xff] %v5469_v46 }
 0x153   : > { %7818 = vst [vmem:[#allocation95_spill] sm:$0xff] %v5471_v56  ;;  %v5501_v56 = vsel %vm460_vm8, 1, %v7749_v50  ;;  %v1489_v50 = vadd.s32 64, %v4495_v13 }
 0x154   : > { %7827 = vst [vmem:[#allocation102_spill] sm:$0xff] %v5501_v56 }
 0x156   : > { %959 = vperm.xlu2 %4231, %v5474_v58   ;;  %956 = vperm.xlu1 %4230, %v5477_v55   ;;  %v4494_v58 = vld [vmem:[%s4710_s8 + $0x18] sm:$0xff]  ;;  %v4496_v55 = vld [vmem:[%s4710_s8 + $0x10] sm:$0xff] }
 0x157   : > { %953 = vperm.xlu0 %4229, %v5480_v27   ;;  %v1490_v59 = vadd.s32 64, %v4496_v55  ;;  %v4532_v27 = vld [vmem:[%s4710_s8 + $0x128] sm:$0xff] }
 0x158   : > { %v5491_v37 = vpop.permute.xlu2 %860  ;;  %v5493_v46 = vpop.permute.xlu1 %830 }
 0x159   : > { %7823 = vst [vmem:[#allocation25_spill] sm:$0xff] %v5491_v37  ;;  %v5495_v63 = vpop.permute.xlu0 %827 }
 0x15a   : > { %7824 = vst [vmem:[#allocation99_spill] sm:$0xff] %v5493_v46 }
 0x15b   : > { %7825 = vst [vmem:[#allocation100_spill] sm:$0xff] %v5495_v63 }
 0x15e   : > { %968 = vperm.xlu2 %4231, %v5498_v0   ;;  %965 = vperm.xlu1 %4230, %v5501_v56   ;;  %v4493_v0 = vld [vmem:[%s4710_s8] sm:$0xff] }
 0x15f   : > { %962 = vperm.xlu0 %4229, %v5504_v52   ;;  %v1488_v56 = vadd.s32 64, %v4493_v0  ;;  %v4623_v52 = vmov 1   ;;  %v1491_v0 = vadd.s32 64, %v4494_v58 }
 0x160   : > { %v5513_v37 = vpop.permute.xlu2 %869  ;;  %v5515_v63 = vpop.permute.xlu1 %839 }
 0x161   : > { %7829 = vst [vmem:[#allocation104_spill] sm:$0xff] %v5513_v37  ;;  %v5517_v46 = vpop.permute.xlu0 %836 }
 0x162   : > { %7830 = vst [vmem:[#allocation105_spill] sm:$0xff] %v5515_v63 }
 0x163   : > { %7831 = vst [vmem:[#allocation106_spill] sm:$0xff] %v5517_v46 }
 0x166   : > { %4232 = vset.pattern.permute.xlu2 %v4623_v52  ;;  %974 = vperm.xlu1 %4230, %v5520_v3   ;;  %v4499_v3 = vld [vmem:[%s4710_s8 + $0x20] sm:$0xff] }
 0x167   : > { %971 = vperm.xlu0 %4229, %v5524_v45   ;;  %1553 = vperm.xlu2 %4232, %v1488_v56   ;;  %v4498_v45 = vld [vmem:[%s4710_s8 + $0x30] sm:$0xff]  ;;  %v1492_v55 = vadd.s32 64, %v4499_v3 }
 0x168   : > { %v5528_v37 = vpop.permute.xlu2 %878  ;;  %v5530_v63 = vpop.permute.xlu1 %848  ;;  %v1494_v13 = vadd.s32 64, %v4498_v45 }
 0x169   : > { %7834 = vst [vmem:[#allocation109_spill] sm:$0xff] %v5528_v37  ;;  %v5532_v46 = vpop.permute.xlu0 %845 }
 0x16a   : > { %7835 = vst [vmem:[#allocation110_spill] sm:$0xff] %v5530_v63  ;;  %v4497_v63 = vld [vmem:[%s4710_s8 + $0x28] sm:$0xff] }
 0x16b   : > { %7836 = vst [vmem:[#allocation111_spill] sm:$0xff] %v5532_v46  ;;  %v1493_v58 = vadd.s32 64, %v4497_v63 }
 0x16e   : > { %4234 = vset.pattern.permute.xlu1 %v4623_v52 }
 0x16f   : > { %4233 = vset.pattern.permute.xlu0 %v4623_v52  ;;  %1562 = vperm.xlu2 %4232, %v1491_v0  }
 0x170   : > { %1556 = vperm.xlu0 %4233, %v1489_v50   ;;  %1559 = vperm.xlu1 %4234, %v1490_v59   ;;  %v5537_v56 = vpop.permute.xlu2 %887  ;;  %v5539_v37 = vpop.permute.xlu1 %857  ;;  %v4500_v50 = vld [vmem:[%s4710_s8 + $0x40] sm:$0xff] }
 0x171   : > { %7837 = vst [vmem:[#allocation112_spill] sm:$0xff] %v5537_v56  ;;  %v5541_v46 = vpop.permute.xlu0 %854  ;;  %v4502_v56 = vld [vmem:[%s4710_s8 + $0x38] sm:$0xff] }
 0x172   : > { %7838 = vst [vmem:[#allocation113_spill] sm:$0xff] %v5539_v37  ;;  %v1496_v37 = vadd.s32 64, %v4500_v50  ;;  %v1495_v45 = vadd.s32 64, %v4502_v56 }
 0x173   : > { %7839 = vst [vmem:[#allocation114_spill] sm:$0xff] %v5541_v46  ;;  %v4501_v46 = vld [vmem:[%s4710_s8 + $0x48] sm:$0xff] }
 0x174   : > { %v1497_v63 = vadd.s32 64, %v4501_v46 }
 0x177   : > { %1568 = vperm.xlu2 %4232, %v1493_v58  }
 0x178   : > { %1571 = vperm.xlu0 %4233, %v1494_v13   ;;  %1565 = vperm.xlu1 %4234, %v1492_v55   ;;  %v5546_v59 = vpop.permute.xlu2 %896  ;;  %v5548_v52 = vpop.permute.xlu1 %866  ;;  %v4503_v55 = vld [vmem:[%s4710_s8 + $0x58] sm:$0xff] }
 0x179   : > { %7840 = vst [vmem:[#allocation115_spill] sm:$0xff] %v5546_v59  ;;  %v5550_v0 = vpop.permute.xlu0 %863  ;;  %v4505_v59 = vld [vmem:[%s4710_s8 + $0x50] sm:$0xff] }
 0x17a   : > { %7841 = vst [vmem:[#allocation116_spill] sm:$0xff] %v5548_v52  ;;  %v1499_v52 = vadd.s32 64, %v4503_v55  ;;  %v1498_v46 = vadd.s32 64, %v4505_v59 }
 0x17b   : > { %7842 = vst [vmem:[#allocation117_spill] sm:$0xff] %v5550_v0  ;;  %v4504_v0 = vld [vmem:[%s4710_s8 + $0x60] sm:$0xff] }
 0x17c   : > { %v1500_v50 = vadd.s32 64, %v4504_v0 }
 0x17f   : > { %1577 = vperm.xlu2 %4232, %v1496_v37  }
 0x180   : > { %1580 = vperm.xlu0 %4233, %v1497_v63   ;;  %1574 = vperm.xlu1 %4234, %v1495_v45   ;;  %v5555_v3 = vpop.permute.xlu2 %905  ;;  %v5557_v58 = vpop.permute.xlu1 %875  ;;  %v4506_v45 = vld [vmem:[%s4710_s8 + $0x70] sm:$0xff] }
 0x181   : > { %7843 = vst [vmem:[#allocation118_spill] sm:$0xff] %v5555_v3  ;;  %v5559_v13 = vpop.permute.xlu0 %872  ;;  %v4508_v3 = vld [vmem:[%s4710_s8 + $0x68] sm:$0xff] }
 0x182   : > { %7844 = vst [vmem:[#allocation119_spill] sm:$0xff] %v5557_v58  ;;  %v1502_v58 = vadd.s32 64, %v4506_v45  ;;  %v1501_v0 = vadd.s32 64, %v4508_v3 }
 0x183   : > { %7845 = vst [vmem:[#allocation120_spill] sm:$0xff] %v5559_v13  ;;  %v4507_v13 = vld [vmem:[%s4710_s8 + $0x78] sm:$0xff] }
 0x184   : > { %v1503_v55 = vadd.s32 64, %v4507_v13 }
 0x187   : > { %1586 = vperm.xlu2 %4232, %v1499_v52  }
 0x188   : > { %1589 = vperm.xlu0 %4233, %v1500_v50   ;;  %1583 = vperm.xlu1 %4234, %v1498_v46   ;;  %v5564_v37 = vpop.permute.xlu2 %914  ;;  %v5566_v56 = vpop.permute.xlu1 %884  ;;  %v4509_v46 = vld [vmem:[%s4710_s8 + $0x88] sm:$0xff] }
 0x189   : > { %7846 = vst [vmem:[#allocation121_spill] sm:$0xff] %v5564_v37  ;;  %v5568_v63 = vpop.permute.xlu0 %881  ;;  %v1505_v37 = vadd.s32 64, %v4509_v46 }
 0x18a   : > { %7847 = vst [vmem:[#allocation122_spill] sm:$0xff] %v5566_v56  ;;  %v4510_v56 = vld [vmem:[%s4710_s8 + $0x90] sm:$0xff] }
 0x18b   : > { %7848 = vst [vmem:[#allocation123_spill] sm:$0xff] %v5568_v63  ;;  %v1506_v45 = vadd.s32 64, %v4510_v56  ;;  %v4511_v63 = vld [vmem:[%s4710_s8 + $0x80] sm:$0xff] }
 0x18c   : > { %v1504_v13 = vadd.s32 64, %v4511_v63 }
 0x18f   : > { %1595 = vperm.xlu2 %4232, %v1502_v58  }
 0x190   : > { %1598 = vperm.xlu0 %4233, %v1503_v55   ;;  %1592 = vperm.xlu1 %4234, %v1501_v0   ;;  %v5573_v59 = vpop.permute.xlu2 %923  ;;  %v5575_v52 = vpop.permute.xlu1 %893  ;;  %v4512_v0 = vld [vmem:[%s4710_s8 + $0xa0] sm:$0xff] }
 0x191   : > { %7849 = vst [vmem:[#allocation124_spill] sm:$0xff] %v5573_v59  ;;  %v5577_v50 = vpop.permute.xlu0 %890  ;;  %v1508_v59 = vadd.s32 64, %v4512_v0 }
 0x192   : > { %7850 = vst [vmem:[#allocation125_spill] sm:$0xff] %v5575_v52  ;;  %v4513_v52 = vld [vmem:[%s4710_s8 + $0xa8] sm:$0xff] }
 0x193   : > { %7851 = vst [vmem:[#allocation126_spill] sm:$0xff] %v5577_v50  ;;  %v1509_v46 = vadd.s32 64, %v4513_v52  ;;  %v4514_v50 = vld [vmem:[%s4710_s8 + $0x98] sm:$0xff] }
 0x194   : > { %v1507_v56 = vadd.s32 64, %v4514_v50 }
 0x197   : > { %1604 = vperm.xlu2 %4232, %v1505_v37  }
 0x198   : > { %1607 = vperm.xlu0 %4233, %v1506_v45   ;;  %1601 = vperm.xlu1 %4234, %v1504_v13   ;;  %v5582_v3 = vpop.permute.xlu2 %932  ;;  %v5584_v58 = vpop.permute.xlu1 %902  ;;  %v4515_v13 = vld [vmem:[%s4710_s8 + $0xb8] sm:$0xff] }
 0x199   : > { %7852 = vst [vmem:[#allocation127_spill] sm:$0xff] %v5582_v3  ;;  %v5586_v55 = vpop.permute.xlu0 %899  ;;  %v1511_v3 = vadd.s32 64, %v4515_v13 }
 0x19a   : > { %7853 = vst [vmem:[#allocation128_spill] sm:$0xff] %v5584_v58  ;;  %v4517_v58 = vld [vmem:[%s4710_s8 + $0xb0] sm:$0xff] }
 0x19b   : > { %7854 = vst [vmem:[#allocation129_spill] sm:$0xff] %v5586_v55  ;;  %v4516_v55 = vld [vmem:[%s4710_s8 + $0xc0] sm:$0xff]  ;;  %v1510_v52 = vadd.s32 64, %v4517_v58 }
 0x19c   : > { %v1512_v0 = vadd.s32 64, %v4516_v55 }
 0x19f   : > { %1613 = vperm.xlu2 %4232, %v1508_v59  }
 0x1a0   : > { %1616 = vperm.xlu0 %4233, %v1509_v46   ;;  %1610 = vperm.xlu1 %4234, %v1507_v56   ;;  %v5591_v37 = vpop.permute.xlu2 %941  ;;  %v5593_v63 = vpop.permute.xlu1 %911  ;;  %v4518_v56 = vld [vmem:[%s4710_s8 + $0xd0] sm:$0xff] }
 0x1a1   : > { %7855 = vst [vmem:[#allocation130_spill] sm:$0xff] %v5591_v37  ;;  %v5595_v45 = vpop.permute.xlu0 %908  ;;  %v1514_v37 = vadd.s32 64, %v4518_v56 }
 0x1a2   : > { %7856 = vst [vmem:[#allocation131_spill] sm:$0xff] %v5593_v63  ;;  %v4519_v63 = vld [vmem:[%s4710_s8 + $0xd8] sm:$0xff] }
 0x1a3   : > { %7857 = vst [vmem:[#allocation132_spill] sm:$0xff] %v5595_v45  ;;  %v1515_v13 = vadd.s32 64, %v4519_v63  ;;  %v4520_v45 = vld [vmem:[%s4710_s8 + $0xc8] sm:$0xff] }
 0x1a4   : > { %v1513_v55 = vadd.s32 64, %v4520_v45 }
 0x1a7   : > { %1622 = vperm.xlu2 %4232, %v1511_v3  }
 0x1a8   : > { %1625 = vperm.xlu0 %4233, %v1512_v0   ;;  %1619 = vperm.xlu1 %4234, %v1510_v52   ;;  %v5600_v59 = vpop.permute.xlu2 %950  ;;  %v5602_v50 = vpop.permute.xlu1 %920  ;;  %v4521_v52 = vld [vmem:[%s4710_s8 + $0xe8] sm:$0xff] }
 0x1a9   : > { %7858 = vst [vmem:[#allocation133_spill] sm:$0xff] %v5600_v59  ;;  %v5604_v46 = vpop.permute.xlu0 %917  ;;  %v1517_v59 = vadd.s32 64, %v4521_v52 }
 0x1aa   : > { %7859 = vst [vmem:[#allocation134_spill] sm:$0xff] %v5602_v50  ;;  %v4522_v50 = vld [vmem:[%s4710_s8 + $0xf0] sm:$0xff] }
 0x1ab   : > { %7860 = vst [vmem:[#allocation135_spill] sm:$0xff] %v5604_v46  ;;  %v1518_v56 = vadd.s32 64, %v4522_v50  ;;  %v4523_v46 = vld [vmem:[%s4710_s8 + $0xe0] sm:$0xff] }
 0x1ac   : > { %v1516_v63 = vadd.s32 64, %v4523_v46 }
 0x1af   : > { %1631 = vperm.xlu2 %4232, %v1514_v37  }
 0x1b0   : > { %1634 = vperm.xlu0 %4233, %v1515_v13   ;;  %1628 = vperm.xlu1 %4234, %v1513_v55   ;;  %v5609_v3 = vpop.permute.xlu2 %959  ;;  %v5611_v58 = vpop.permute.xlu1 %929  ;;  %v4524_v55 = vld [vmem:[%s4710_s8 + $0x100] sm:$0xff] }
 0x1b1   : > { %7861 = vst [vmem:[#allocation136_spill] sm:$0xff] %v5609_v3  ;;  %v5613_v0 = vpop.permute.xlu0 %926  ;;  %v1520_v3 = vadd.s32 64, %v4524_v55 }
 0x1b2   : > { %7862 = vst [vmem:[#allocation137_spill] sm:$0xff] %v5611_v58  ;;  %v4525_v58 = vld [vmem:[%s4710_s8 + $0x108] sm:$0xff] }
 0x1b3   : > { %7863 = vst [vmem:[#allocation138_spill] sm:$0xff] %v5613_v0  ;;  %v1521_v52 = vadd.s32 64, %v4525_v58  ;;  %v4526_v0 = vld [vmem:[%s4710_s8 + $0xf8] sm:$0xff] }
 0x1b4   : > { %v1519_v50 = vadd.s32 64, %v4526_v0 }
 0x1b7   : > { %1640 = vperm.xlu2 %4232, %v1517_v59  }
 0x1b8   : > { %1643 = vperm.xlu0 %4233, %v1518_v56   ;;  %1637 = vperm.xlu1 %4234, %v1516_v63   ;;  %v5618_v37 = vpop.permute.xlu2 %968  ;;  %v5620_v45 = vpop.permute.xlu1 %938  ;;  %v4527_v63 = vld [vmem:[%s4710_s8 + $0x118] sm:$0xff] }
 0x1b9   : > { %7864 = vst [vmem:[#allocation139_spill] sm:$0xff] %v5618_v37  ;;  %v5622_v13 = vpop.permute.xlu0 %935  ;;  %v1523_v37 = vadd.s32 64, %v4527_v63 }
 0x1ba   : > { %7865 = vst [vmem:[#allocation140_spill] sm:$0xff] %v5620_v45  ;;  %v4529_v45 = vld [vmem:[%s4710_s8 + $0x110] sm:$0xff] }
 0x1bb   : > { %7866 = vst [vmem:[#allocation141_spill] sm:$0xff] %v5622_v13  ;;  %v4528_v13 = vld [vmem:[%s4710_s8 + $0x120] sm:$0xff]  ;;  %v1522_v58 = vadd.s32 64, %v4529_v45 }
 0x1bc   : > { %v1524_v55 = vadd.s32 64, %v4528_v13  ;;  %v1525_v13 = vadd.s32 64, %v4532_v27 }
 0x1bf   : > { %1649 = vperm.xlu2 %4232, %v1520_v3  }
 0x1c0   : > { %1652 = vperm.xlu0 %4233, %v1521_v52   ;;  %1646 = vperm.xlu1 %4234, %v1519_v50   ;;  %v5627_v59 = vpop.permute.xlu1 %947  ;;  %v4530_v50 = vld [vmem:[%s4710_s8 + $0x130] sm:$0xff] }
 0x1c1   : > { %7867 = vst [vmem:[#allocation142_spill] sm:$0xff] %v5627_v59  ;;  %v5629_v46 = vpop.permute.xlu0 %944  ;;  %v5631_v56 = vpop.permute.xlu2 %1553  ;;  %v1526_v59 = vadd.s32 64, %v4530_v50 }
 0x1c2   : > { %7868 = vst [vmem:[#allocation143_spill] sm:$0xff] %v5629_v46  ;;  %v4531_v46 = vld [vmem:[%s4710_s8 + $0x138] sm:$0xff] }
 0x1c3   : > { %v1527_v63 = vadd.s32 64, %v4531_v46 }
 0x1c7   : > { %1658 = vperm.xlu2 %4232, %v1523_v37  }
 0x1c8   : > { %1661 = vperm.xlu0 %4233, %v1524_v55   ;;  %1655 = vperm.xlu1 %4234, %v1522_v58   ;;  %v5636_v3 = vpop.permute.xlu1 %956  ;;  %v4533_v58 = vld [vmem:[%s4710_s8 + $0x148] sm:$0xff] }
 0x1c9   : > { %7869 = vst [vmem:[#allocation144_spill] sm:$0xff] %v5636_v3  ;;  %v5638_v0 = vpop.permute.xlu0 %953  ;;  %v5640_v52 = vpop.permute.xlu2 %1562  ;;  %v4534_v3 = vld [vmem:[%s4710_s8 + $0x150] sm:$0xff] }
 0x1ca   : > { %7870 = vst [vmem:[#allocation145_spill] sm:$0xff] %v5638_v0  ;;  %v1529_v0 = vadd.s32 64, %v4533_v58  ;;  %v1530_v50 = vadd.s32 64, %v4534_v3 }
 0x1cb   : > { %7871 = vst [vmem:[#allocation146_spill] sm:$0xff] %v5640_v52  ;;  %v4535_v52 = vld [vmem:[%s4710_s8 + $0x140] sm:$0xff] }
 0x1cc   : > { %v1528_v46 = vadd.s32 64, %v4535_v52 }
 0x1cf   : > { %1667 = vperm.xlu2 %4232, %v1526_v59  }
 0x1d0   : > { %1670 = vperm.xlu0 %4233, %v1527_v63   ;;  %1664 = vperm.xlu1 %4234, %v1525_v13   ;;  %v5645_v37 = vpop.permute.xlu1 %965  ;;  %v4536_v13 = vld [vmem:[%s4710_s8 + $0x160] sm:$0xff] }
 0x1d1   : > { %7872 = vst [vmem:[#allocation147_spill] sm:$0xff] %v5645_v37  ;;  %v5647_v45 = vpop.permute.xlu0 %962  ;;  %v5649_v55 = vpop.permute.xlu2 %1568  ;;  %v1532_v37 = vadd.s32 64, %v4536_v13 }
 0x1d2   : > { %7873 = vst [vmem:[#allocation148_spill] sm:$0xff] %v5647_v45  ;;  %v4537_v45 = vld [vmem:[%s4710_s8 + $0x168] sm:$0xff] }
 0x1d3   : > { %7874 = vst [vmem:[#allocation149_spill] sm:$0xff] %v5649_v55  ;;  %v1533_v58 = vadd.s32 64, %v4537_v45  ;;  %v4538_v55 = vld [vmem:[%s4710_s8 + $0x158] sm:$0xff] }
 0x1d4   : > { %v1531_v3 = vadd.s32 64, %v4538_v55 }
 0x1d7   : > { %1676 = vperm.xlu2 %4232, %v1529_v0  }
 0x1d8   : > { %1679 = vperm.xlu0 %4233, %v1530_v50   ;;  %1673 = vperm.xlu1 %4234, %v1528_v46   ;;  %v5654_v27 = vpop.permute.xlu1 %974  ;;  %v4539_v46 = vld [vmem:[%s4710_s8 + $0x178] sm:$0xff] }
 0x1d9   : > { %7875 = vst [vmem:[#allocation150_spill] sm:$0xff] %v5654_v27  ;;  %v5656_v59 = vpop.permute.xlu0 %971  ;;  %v5658_v63 = vpop.permute.xlu2 %1577  ;;  %v1535_v27 = vadd.s32 64, %v4539_v46 }
 0x1da   : > { %7876 = vst [vmem:[#allocation151_spill] sm:$0xff] %v5656_v59  ;;  %v4540_v59 = vld [vmem:[%s4710_s8 + $0x180] sm:$0xff] }
 0x1db   : > { %7877 = vst [vmem:[#allocation152_spill] sm:$0xff] %v5658_v63  ;;  %v1536_v13 = vadd.s32 64, %v4540_v59  ;;  %v4541_v63 = vld [vmem:[%s4710_s8 + $0x170] sm:$0xff]  ;;  %v1537_v59 = vadd.s32 64, %v4544_v53 }
 0x1dc   : > { %v1534_v45 = vadd.s32 64, %v4541_v63 }
 0x1df   : > { %1685 = vperm.xlu2 %4232, %v1532_v37  }
 0x1e0   : > { %1688 = vperm.xlu0 %4233, %v1533_v58   ;;  %1682 = vperm.xlu1 %4234, %v1531_v3   ;;  %v4542_v3 = vld [vmem:[%s4710_s8 + $0x190] sm:$0xff] }
 0x1e1   : > { %v5663_v0 = vpop.permute.xlu2 %1586 }
 0x1e2   : > { %7878 = vst [vmem:[#allocation153_spill] sm:$0xff] %v5663_v0  ;;  %v5665_v52 = vpop.permute.xlu0 %1556  ;;  %v5667_v50 = vpop.permute.xlu1 %1559  ;;  %v1538_v0 = vadd.s32 64, %v4542_v3 }
 0x1e3   : > { %7879 = vst [vmem:[#allocation154_spill] sm:$0xff] %v5667_v50  ;;  %v4543_v50 = vld [vmem:[%s4710_s8 + $0x198] sm:$0xff] }
 0x1e4   : > { %v1539_v46 = vadd.s32 64, %v4543_v50 }
 0x1e7   : > { %1694 = vperm.xlu2 %4232, %v1535_v27  }
 0x1e8   : > { %1697 = vperm.xlu0 %4233, %v1536_v13   ;;  %1691 = vperm.xlu1 %4234, %v1534_v45   ;;  %v4545_v45 = vld [vmem:[%s4710_s8 + $0x1a8] sm:$0xff] }
 0x1e9   : > { %v5672_v37 = vpop.permute.xlu2 %1595 }
 0x1ea   : > { %7880 = vst [vmem:[#allocation155_spill] sm:$0xff] %v5672_v37  ;;  %v5674_v55 = vpop.permute.xlu0 %1571  ;;  %v5676_v58 = vpop.permute.xlu1 %1565  ;;  %v1541_v37 = vadd.s32 64, %v4545_v45 }
 0x1eb   : > { %7881 = vst [vmem:[#allocation156_spill] sm:$0xff] %v5674_v55  ;;  %v4546_v55 = vld [vmem:[%s4710_s8 + $0x1b0] sm:$0xff] }
 0x1ec   : > { %7882 = vst [vmem:[#allocation157_spill] sm:$0xff] %v5676_v58  ;;  %v1542_v3 = vadd.s32 64, %v4546_v55  ;;  %v4547_v58 = vld [vmem:[%s4710_s8 + $0x1a0] sm:$0xff] }
 0x1ed   : > { %v1540_v50 = vadd.s32 64, %v4547_v58 }
 0x1ef   : > { %1703 = vperm.xlu2 %4232, %v1538_v0  }
 0x1f0   : > { %1706 = vperm.xlu0 %4233, %v1539_v46   ;;  %1700 = vperm.xlu1 %4234, %v1537_v59   ;;  %v4548_v59 = vld [vmem:[%s4710_s8 + $0x1c0] sm:$0xff] }
 0x1f1   : > { %v5681_v27 = vpop.permute.xlu2 %1604 }
 0x1f2   : > { %7883 = vst [vmem:[#allocation158_spill] sm:$0xff] %v5681_v27  ;;  %v5683_v63 = vpop.permute.xlu0 %1580  ;;  %v5685_v13 = vpop.permute.xlu1 %1574  ;;  %v1544_v27 = vadd.s32 64, %v4548_v59 }
 0x1f3   : > { %7884 = vst [vmem:[#allocation159_spill] sm:$0xff] %v5683_v63  ;;  %v4549_v63 = vld [vmem:[%s4710_s8 + $0x1c8] sm:$0xff] }
 0x1f4   : > { %7885 = vst [vmem:[#allocation160_spill] sm:$0xff] %v5685_v13  ;;  %v1545_v45 = vadd.s32 64, %v4549_v63  ;;  %v4550_v13 = vld [vmem:[%s4710_s8 + $0x1b8] sm:$0xff] }
 0x1f5   : > { %v1543_v55 = vadd.s32 64, %v4550_v13 }
 0x1f7   : > { %1712 = vperm.xlu2 %4232, %v1541_v37  }
 0x1f8   : > { %1715 = vperm.xlu0 %4233, %v1542_v3   ;;  %1709 = vperm.xlu1 %4234, %v1540_v50   ;;  %v4551_v50 = vld [vmem:[%s4710_s8 + $0x1d8] sm:$0xff] }
 0x1f9   : > { %v5690_v53 = vpop.permute.xlu2 %1613 }
 0x1fa   : > { %7886 = vst [vmem:[#allocation161_spill] sm:$0xff] %v5690_v53  ;;  %v5692_v0 = vpop.permute.xlu0 %1589  ;;  %v5694_v46 = vpop.permute.xlu1 %1583  ;;  %v1547_v53 = vadd.s32 64, %v4551_v50  ;;  %v7892_v50 = vld [vmem:[#allocation33_spill] sm:$0xff] }
 0x1fb   : > { %7887 = vst [vmem:[#allocation162_spill] sm:$0xff] %v5692_v0  ;;  %v4552_v0 = vld [vmem:[%s4710_s8 + $0x1e0] sm:$0xff] }
 0x1fc   : > { %7888 = vst [vmem:[#allocation163_spill] sm:$0xff] %v5694_v46  ;;  %v1548_v59 = vadd.s32 64, %v4552_v0  ;;  %v4553_v46 = vld [vmem:[%s4710_s8 + $0x1d0] sm:$0xff] }
 0x1fd   : > { %v1546_v63 = vadd.s32 64, %v4553_v46 }
 0x1ff   : > { %1721 = vperm.xlu2 %4232, %v1544_v27  }
 0x200   : > { %1724 = vperm.xlu0 %4233, %v1545_v45   ;;  %1718 = vperm.xlu1 %4234, %v1543_v55   ;;  %v4554_v55 = vld [vmem:[%s4710_s8 + $0x1f0] sm:$0xff] }
 0x201   : > { %v5699_v37 = vpop.permute.xlu2 %1622 }
 0x202   : > { %7889 = vst [vmem:[#allocation164_spill] sm:$0xff] %v5699_v37  ;;  %v5701_v58 = vpop.permute.xlu0 %1598  ;;  %v5703_v3 = vpop.permute.xlu1 %1592  ;;  %v1550_v37 = vadd.s32 64, %v4554_v55 }
 0x203   : > { %7890 = vst [vmem:[#allocation165_spill] sm:$0xff] %v5701_v58  ;;  %v4555_v58 = vld [vmem:[%s4710_s8 + $0x1f8] sm:$0xff]  ;;  %s4574_s8 = scalar_lea.hbm %s4573_s7, 512 }
 0x204   : > { %7891 = vst [vmem:[#allocation166_spill] sm:$0xff] %v5703_v3  ;;  %v1551_v3 = vadd.s32 64, %v4555_v58  ;;  %p4575_p10 = scmp.ne.s32.totalorder %s4573_s7, %s4574_s8  ;;  %p4580_p0 = scmp.lt.s32.totalorder %s4578_s11, %s4574_s8 }
 0x206   : > { %p4576_p11 = pnand %p4575_p10, %p4692_p5  ;;  %p4581_p1 = por %p4580_p0, %p4579_p13 }
 0x207   : > { %1730 = vperm.xlu2 %4232, %v1547_v53  }
 0x208   : > { %1733 = vperm.xlu0 %4233, %v1548_v59   ;;  %1727 = vperm.xlu1 %4234, %v1546_v63   ;;  %v4155_v63 = vld [vmem:[%s7567_s1 + $0x18] sm:$0xff]  ;;  %p4577_p12 = pneg %p4576_p11 }
 0x209   : > { %v5708_v27 = vpop.permute.xlu2 %1631 }
 0x20a   : > { %v5710_v13 = vpop.permute.xlu0 %1607  ;;  %v5712_v45 = vpop.permute.xlu1 %1601  ;;  %p4582_p2 = pnand %p4581_p1, %p4577_p12 }
 0x20f   : > { %1739 = vperm.xlu2 %4232, %v1550_v37  }
 0x210   : > { %1742 = vperm.xlu0 %4233, %v1551_v3   ;;  %1736 = vperm.xlu1 %4234, %v1549_v41  }
 0x211   : > { %v5717_v0 = vpop.permute.xlu2 %1640 }
 0x212   : > { %v5719_v53 = vpop.permute.xlu0 %1616  ;;  %v5721_v46 = vpop.permute.xlu1 %1610 }
 0x217   : > { %1812 = vperm.xlu2 %4232, %v5018_v6  }
 0x218   : > { %1815 = vperm.xlu0 %4233, %v5048_v51   ;;  %1809 = vperm.xlu1 %4234, %v7892_v50   ;;  %v4153_v50 = vld [vmem:[%s7567_s1 + $0x8] sm:$0xff] }
 0x219   : > { %v5726_v59 = vpop.permute.xlu2 %1649 }
 0x21a   : > { %v5728_v58 = vpop.permute.xlu0 %1625  ;;  %v5730_v16 = vpop.permute.xlu1 %1619 }
 0x21f   : > { %1821 = vperm.xlu2 %4232, %v5042_v5  }
 0x220   : > { %1824 = vperm.xlu0 %4233, %v5072_v57   ;;  %1818 = vperm.xlu1 %4234, %v5045_v62  }
 0x221   : > { %v5735_v41 = vpop.permute.xlu2 %1658 }
 0x222   : > { %v5737_v37 = vpop.permute.xlu0 %1634  ;;  %v5739_v6 = vpop.permute.xlu1 %1628 }
 0x227   : > { %1830 = vperm.xlu2 %4232, %v5066_v9  }
 0x228   : > { %1833 = vperm.xlu0 %4233, %v5096_v2   ;;  %1827 = vperm.xlu1 %4234, %v5069_v1  }
 0x229   : > { %v5744_v51 = vpop.permute.xlu2 %1667 }
 0x22a   : > { %v5746_v3 = vpop.permute.xlu0 %1643  ;;  %v5748_v5 = vpop.permute.xlu1 %1637 }
 0x22b   : > { %7893 = vst [vmem:[#allocation33_spill] sm:$0xff] %v5746_v3  ;;  %v7948_v3 = vld [vmem:[#allocation20_spill] sm:$0xff] }
 0x22f   : > { %1839 = vperm.xlu2 %4232, %v5090_v12  }
 0x230   : > { %1842 = vperm.xlu0 %4233, %v5120_v4   ;;  %1836 = vperm.xlu1 %4234, %v5093_v61  }
 0x231   : > { %v5757_v9 = vpop.permute.xlu2 %1676 }
 0x232   : > { %v5753_v57 = vpop.permute.xlu0 %1652  ;;  %v5755_v62 = vpop.permute.xlu1 %1646 }
 0x237   : > { %1848 = vperm.xlu2 %4232, %v5114_v15  }
 0x238   : > { %1851 = vperm.xlu0 %4233, %v5144_v7   ;;  %1845 = vperm.xlu1 %4234, %v5117_v11  }
 0x239   : > { %v5766_v12 = vpop.permute.xlu2 %1685 }
 0x23a   : > { %v5762_v1 = vpop.permute.xlu0 %1661  ;;  %v5764_v2 = vpop.permute.xlu1 %1655 }
 0x23f   : > { %1857 = vperm.xlu2 %4232, %v5138_v18  }
 0x240   : > { %1905 = vperm.xlu0 %4233, %v5288_v22   ;;  %1854 = vperm.xlu1 %4234, %v5141_v8  }
 0x241   : > { %v5775_v15 = vpop.permute.xlu2 %1694 }
 0x242   : > { %v5771_v61 = vpop.permute.xlu0 %1670  ;;  %v5773_v4 = vpop.permute.xlu1 %1664 }
 0x247   : > { %1860 = vperm.xlu2 %4232, %v5168_v17   ;;  %v4159_v17 = vld [vmem:[%s7567_s1 + $0x38] sm:$0xff] }
 0x248   : > { %1911 = vperm.xlu0 %4233, %v5282_v36   ;;  %1908 = vperm.xlu1 %4234, %v5285_v32   ;;  %v4157_v36 = vld [vmem:[%s7567_s1 + $0x28] sm:$0xff] }
 0x249   : > { %v5787_v8 = vpop.permute.xlu2 %1703  ;;  %2612 = vmatpush.bf16.msra.mxu0 %v4159_v17  ;;  %4169 = vmatpush.bf16.msra.mxu2 %v4159_v17 }
 0x24a   : > { %v5780_v11 = vpop.permute.xlu0 %1679  ;;  %v5782_v7 = vpop.permute.xlu1 %1673 }
 0x24f   : > { %1917 = vperm.xlu2 %4232, %v5309_v25   ;;  %v4158_v25 = vld [vmem:[%s7567_s1 + $0x30] sm:$0xff] }
 0x250   : > { %1920 = vperm.xlu0 %4233, %v5306_v40   ;;  %1914 = vperm.xlu1 %4234, %v5312_v35  }
 0x251   : > { %2613 = vmatpush.bf16.msra.mxu0 %v4158_v25  ;;  %4170 = vmatpush.bf16.msra.mxu2 %v4158_v25  ;;  %v5809_v40 = vpop.permute.xlu2 %1712 }
 0x252   : > { %v5789_v18 = vpop.permute.xlu0 %1688  ;;  %v5791_v22 = vpop.permute.xlu1 %1682 }
 0x255   : > { %2614 = vmatpush.bf16.msra.mxu0 %v4157_v36  ;;  %4171 = vmatpush.bf16.msra.mxu2 %v4157_v36 }
 0x257   : > { %1923 = vperm.xlu2 %4232, %v5336_v33   ;;  %v4156_v33 = vld [vmem:[%s7567_s1 + $0x20] sm:$0xff] }
 0x258   : > { %1926 = vperm.xlu0 %4233, %v5333_v31   ;;  %1863 = vperm.xlu1 %4234, %v5165_v14  }
 0x259   : > { %2615 = vmatpush.bf16.msra.mxu0 %v4156_v33  ;;  %4172 = vmatpush.bf16.msra.mxu2 %v4156_v33  ;;  %v5824_v55 = vpop.permute.xlu2 %1721 }
 0x25a   : > { %v5802_v32 = vpop.permute.xlu0 %1697  ;;  %v5804_v35 = vpop.permute.xlu1 %1691 }
 0x25d   : > { %2616 = vmatpush.bf16.msra.mxu0 %v4155_v63  ;;  %4173 = vmatpush.bf16.msra.mxu2 %v4155_v63 }
 0x25f   : > { %1929 = vperm.xlu2 %4232, %v5330_v44   ;;  %v4154_v44 = vld [vmem:[%s7567_s1 + $0x10] sm:$0xff] }
 0x260   : > { %1932 = vperm.xlu0 %4233, %v5360_v19   ;;  %1866 = vperm.xlu1 %4234, %v5162_v21  }
 0x261   : > { %2617 = vmatpush.bf16.msra.mxu0 %v4154_v44  ;;  %4174 = vmatpush.bf16.msra.mxu2 %v4154_v44  ;;  %v5842_v17 = vpop.permute.xlu2 %1730  ;;  %v7902_v44 = vld [vmem:[#allocation93_spill] sm:$0xff] }
 0x262   : > { %v5817_v14 = vpop.permute.xlu0 %1706  ;;  %v5819_v31 = vpop.permute.xlu1 %1700  ;;  %7894 = vst [vmem:[#allocation167_spill] sm:$0xff] %v5842_v17  ;;  %v7947_v17 = vld [vmem:[#allocation126_spill] sm:$0xff] }
 0x265   : > { %2618 = vmatpush.bf16.msra.mxu0 %v4153_v50  ;;  %4175 = vmatpush.bf16.msra.mxu2 %v4153_v50  ;;  %v7903_v50 = vld [vmem:[#allocation94_spill] sm:$0xff] }
 0x267   : > { %1938 = vperm.xlu2 %4232, %v5354_v48   ;;  %v4152_v48 = vld [vmem:[%s7567_s1] sm:$0xff] }
 0x268   : > { %1869 = vperm.xlu0 %4233, %v5192_v10   ;;  %1935 = vperm.xlu1 %4234, %v5357_v43  }
 0x269   : > { %2619 = vmatpush.bf16.msra.mxu0 %v4152_v48  ;;  %4176 = vmatpush.bf16.msra.mxu2 %v4152_v48  ;;  %v5854_v25 = vpop.permute.xlu2 %1739 }
 0x26a   : > { %v5832_v21 = vpop.permute.xlu0 %1715  ;;  %v5834_v19 = vpop.permute.xlu1 %1709  ;;  %7895 = vst [vmem:[#allocation168_spill] sm:$0xff] %v5854_v25  ;;  %v7928_v25 = vld [vmem:[#allocation81_spill] sm:$0xff] }
 0x26f   : > { %1944 = vperm.xlu2 %4232, %v5381_v38  }
 0x270   : > { %1872 = vperm.xlu0 %4233, %v5189_v20   ;;  %1941 = vperm.xlu1 %4234, %v5384_v34   ;;  %v270_v20 = vlaneseq }
 0x272   : > { %v5847_v10 = vpop.permute.xlu0 %1724  ;;  %v5849_v43 = vpop.permute.xlu1 %1718  ;;  %v5867_v33 = vand.u32 127, %v270_v20 }
 0x274   : > { %vm1745_vm3 = vcmp.eq.s32.totalorder %v5665_v52, %v5867_v33  ;;  %vm1744_vm10 = vcmp.eq.s32.totalorder %v5631_v56, %v5867_v33 }
 0x277   : > { %1950 = vperm.xlu2 %4232, %v5408_v29  }
 0x278   : > { %1953 = vperm.xlu0 %4233, %v5405_v42   ;;  %1947 = vperm.xlu1 %4234, %v5378_v54   ;;  %v1813_v42 = vpop.permute.xlu2 %1812 }
 0x279   : > { %vm2001_vm0 = vcmp.eq.s32.totalorder %v1813_v42, 1  ;;  %v7904_v42 = vld [vmem:[#allocation86_spill] sm:$0xff] }
 0x27a   : > { %v5856_v36 = vpop.permute.xlu0 %1733  ;;  %v5858_v38 = vpop.permute.xlu1 %1727  ;;  %vm2065_vm5 = vmand %vm1745_vm3, %vm2001_vm0  ;;  %vm979_vm13 = vcmp.eq.s32.totalorder %v7904_v42, 1 }
 0x27b   : > { %7896 = vst [vmem:[#allocation169_spill] sm:$0xff] %v5856_v36 }
 0x27c   : > { %7897 = vst [vmem:[#allocation170_spill] sm:$0xff] %v5858_v38 }
 0x27f   : > { %1875 = vperm.xlu2 %4232, %v5186_v24   ;;  %v7900_v24 = vld [vmem:[#allocation13_spill] sm:$0xff] }
 0x280   : > { %1959 = vperm.xlu0 %4233, %v5432_v26   ;;  %1956 = vperm.xlu1 %4234, %v5402_v60   ;;  %vm657_vm4 = vcmp.eq.s32.totalorder %v7900_v24, %v5867_v33  ;;  %v7901_v26 = vld [vmem:[#allocation10_spill] sm:$0xff] }
 0x281   : > { %vm656_vm6 = vcmp.eq.s32.totalorder %v7901_v26, %v5867_v33  ;;  %vm1041_vm7 = vmand %vm657_vm4, %vm977_vm1  ;;  %v7905_v24 = vld [vmem:[#allocation146_spill] sm:$0xff]  ;;  %v7906_v26 = vld [vmem:[#allocation12_spill] sm:$0xff] }
 0x282   : > { %v5863_v34 = vpop.permute.xlu0 %1742  ;;  %v5865_v29 = vpop.permute.xlu1 %1736  ;;  %vm1040_vm8 = vmand %vm656_vm6, %vm976_vm2  ;;  %vm1747_vm14 = vcmp.eq.s32.totalorder %v7905_v24, %v5867_v33  ;;  %vm659_vm0 = vcmp.eq.s32.totalorder %v7906_v26, %v5867_v33  ;;  %v7913_v24 = vld [vmem:[#allocation96_spill] sm:$0xff] }
 0x283   : > { %7898 = vst [vmem:[#allocation171_spill] sm:$0xff] %v5863_v34  ;;  %vm1043_vm3 = vmand %vm659_vm0, %vm979_vm13  ;;  %v7916_v34 = vld [vmem:[#allocation90_spill] sm:$0xff] }
 0x284   : > { %7899 = vst [vmem:[#allocation172_spill] sm:$0xff] %v5865_v29  ;;  %v7929_v29 = vld [vmem:[#allocation89_spill] sm:$0xff] }
 0x287   : > { %1878 = vperm.xlu2 %4232, %v5216_v23   ;;  %v7604_v23 = vmov 0.0  }
 0x288   : > { %1965 = vperm.xlu0 %4233, %v5426_v49   ;;  %1962 = vperm.xlu1 %4234, %v5429_v30   ;;  %v4020_v47 = vsel %vm2065_vm5, 1.0, %v7604_v23  ;;  %v3956_v30 = vsel %vm1041_vm7, 1.0, %v7604_v23  ;;  %v3955_v60 = vsel %vm1040_vm8, 1.0, %v7604_v23 }
 0x289   : > { %v2449_v63 = vadd.f32 %v4020_v47, %v3956_v30  ;;  %v7908_v47 = vld [vmem:[#allocation87_spill] sm:$0xff]  ;;  %v7909_v30 = vld [vmem:[#allocation154_spill] sm:$0xff] }
 0x28a   : > { %v1816_v28 = vpop.permute.xlu0 %1815  ;;  %v1810_v54 = vpop.permute.xlu1 %1809  ;;  %vm978_vm2 = vcmp.eq.s32.totalorder %v7908_v47, 1  ;;  %vm1746_vm4 = vcmp.eq.s32.totalorder %v7909_v30, %v5867_v33  ;;  %v7915_v47 = vld [vmem:[#allocation58_spill] sm:$0xff] }
 0x28b   : > { %vm2000_vm9 = vcmp.eq.s32.totalorder %v1810_v54, 1  ;;  %vm2002_vm15 = vcmp.eq.s32.totalorder %v1816_v28, 1  ;;  %v7907_v54 = vld [vmem:[#allocation98_spill] sm:$0xff]  ;;  %v7912_v28 = vld [vmem:[#allocation9_spill] sm:$0xff] }
 0x28c   : > { %vm2064_vm11 = vmand %vm1744_vm10, %vm2000_vm9  ;;  %vm658_vm6 = vcmp.eq.s32.totalorder %v7912_v28, %v5867_v33  ;;  %vm981_vm9 = vcmp.eq.s32.totalorder %v7916_v34, 1  ;;  %v7924_v34 = vld [vmem:[#allocation5_spill] sm:$0xff] }
 0x28d   : > { %v4019_v49 = vsel %vm2064_vm11, 1.0, %v7604_v23  ;;  %vm2066_vm5 = vmand %vm1746_vm4, %vm2002_vm15  ;;  %vm983_vm4 = vcmp.eq.s32.totalorder %v7928_v25, 1 }
 0x28e   : > { %v2448_v52 = vadd.f32 %v4019_v49, %v3955_v60  ;;  %v7910_v60 = vld [vmem:[#allocation97_spill] sm:$0xff]  ;;  %v7911_v49 = vld [vmem:[#allocation59_spill] sm:$0xff]  ;;  %vm1042_vm7 = vmand %vm658_vm6, %vm978_vm2  ;;  %vm660_vm2 = vcmp.eq.s32.totalorder %v7924_v34, %v5867_v33 }
 0x28f   : > { %1971 = vperm.xlu2 %4232, %v5453_v39   ;;  %v1822_v39 = vpop.permute.xlu2 %1821  ;;  %v3957_v42 = vsel %vm1042_vm7, 1.0, %v7604_v23 }
 0x290   : > { %1974 = vperm.xlu0 %4233, %v7902_v44   ;;  %1968 = vperm.xlu1 %4234, %v7903_v50   ;;  %v2512_v48 = vpack.c.bf16 %v2449_v63, %v2448_v52  ;;  %v3958_v50 = vsel %vm1043_vm3, 1.0, %v7604_v23  ;;  %vm2004_vm11 = vcmp.eq.s32.totalorder %v1822_v39, 1 }
 0x292   : > { %v1825_v56 = vpop.permute.xlu0 %1824  ;;  %v1819_v20 = vpop.permute.xlu1 %1818  ;;  %2620 = vmatmul.bf16.vlgmr.msra.gmra.mxu0 %v2512_v48  ;;  %v4021_v48 = vsel %vm2066_vm5, 1.0, %v7604_v23  ;;  %vm982_vm5 = vcmp.eq.s32.totalorder %v7929_v29, 1  ;;  %v7936_v29 = vld [vmem:[#allocation156_spill] sm:$0xff] }
 0x293   : > { %vm2003_vm12 = vcmp.eq.s32.totalorder %v1819_v20, 1  ;;  %v2450_v26 = vadd.f32 %v4021_v48, %v3957_v42  ;;  %vm2005_vm8 = vcmp.eq.s32.totalorder %v1825_v56, 1  ;;  %v7919_v48 = vld [vmem:[#allocation64_spill] sm:$0xff]  ;;  %v7920_v42 = vld [vmem:[#allocation78_spill] sm:$0xff]  ;;  %v7923_v56 = vld [vmem:[#allocation65_spill] sm:$0xff] }
 0x294   : > { %vm2067_vm1 = vmand %vm1747_vm14, %vm2003_vm12  ;;  %vm980_vm14 = vcmp.eq.s32.totalorder %v7920_v42, 1  ;;  %v7925_v42 = vld [vmem:[#allocation63_spill] sm:$0xff] }
 0x295   : > { %v4022_v52 = vsel %vm2067_vm1, 1.0, %v7604_v23  ;;  %vm1044_vm3 = vmand %vm660_vm2, %vm980_vm14  ;;  %vm1776_vm2 = vcmp.eq.s32.totalorder %v5726_v59, %v5867_v33 }
 0x296   : > { %v2451_v20 = vadd.f32 %v4022_v52, %v3958_v50  ;;  %v7917_v52 = vld [vmem:[#allocation149_spill] sm:$0xff]  ;;  %v7918_v50 = vld [vmem:[#allocation6_spill] sm:$0xff] }
 0x297   : > { %1977 = vperm.xlu2 %4232, %v7907_v54   ;;  %v7914_v54 = vld [vmem:[#allocation103_spill] sm:$0xff]  ;;  %v1831_v30 = vpop.permute.xlu2 %1830  ;;  %vm1749_vm10 = vcmp.eq.s32.totalorder %v7917_v52, %v5867_v33  ;;  %vm661_vm12 = vcmp.eq.s32.totalorder %v7918_v50, %v5867_v33 }
 0x298   : > { %1980 = vperm.xlu0 %4233, %v7910_v60   ;;  %1881 = vperm.xlu1 %4234, %v7911_v49   ;;  %v2513_v60 = vpack.c.bf16 %v2451_v20, %v2450_v26  ;;  %vm2069_vm13 = vmand %vm1749_vm10, %vm2005_vm8  ;;  %v7921_v20 = vld [vmem:[#allocation157_spill] sm:$0xff]  ;;  %vm2007_vm10 = vcmp.eq.s32.totalorder %v1831_v30, 1  ;;  %v7941_v30 = vld [vmem:[#allocation70_spill] sm:$0xff] }
 0x299   : > { %vm1045_vm15 = vmand %vm661_vm12, %vm981_vm9  ;;  %vm1748_vm0 = vcmp.eq.s32.totalorder %v7921_v20, %v5867_v33  ;;  %v4024_v39 = vsel %vm2069_vm13, 1.0, %v7604_v23  ;;  %vm1750_vm12 = vcmp.eq.s32.totalorder %v7936_v29, %v5867_v33 }
 0x29a   : > { %v5903_v63 = vpop.permute.xlu0 %1833  ;;  %v1828_v44 = vpop.permute.xlu1 %1827  ;;  %vm2068_vm1 = vmand %vm1748_vm0, %vm2004_vm11 }
 0x29b   : > { %v4023_v52 = vsel %vm2068_vm1, 1.0, %v7604_v23  ;;  %vm2006_vm7 = vcmp.eq.s32.totalorder %v1828_v44, 1  ;;  %v7938_v44 = vld [vmem:[#allocation160_spill] sm:$0xff] }
 0x29c   : > { %vm2070_vm0 = vmand %vm1750_vm12, %vm2006_vm7 }
 0x29f   : > { %1983 = vperm.xlu2 %4232, %v7913_v24   ;;  %v7922_v24 = vld [vmem:[#allocation102_spill] sm:$0xff] }
 0x2a0   : > { %1986 = vperm.xlu0 %4233, %v7914_v54   ;;  %1884 = vperm.xlu1 %4234, %v7915_v47   ;;  %v5933_v47 = vpop.permute.xlu2 %1839 }
 0x2a2   : > { %v5911_v49 = vpop.permute.xlu0 %1842  ;;  %v5913_v28 = vpop.permute.xlu1 %1836  ;;  %2625 = vmatmul.bf16.gmra.mxu0 %v2513_v60  ;;  %v3960_v60 = vsel %vm1045_vm15, 1.0, %v7604_v23  ;;  %vm1751_vm15 = vcmp.eq.s32.totalorder %v7938_v44, %v5867_v33 }
 0x2a3   : > { %v2453_v50 = vadd.f32 %v4024_v39, %v3960_v60  ;;  %v7930_v39 = vld [vmem:[#allocation15_spill] sm:$0xff]  ;;  %v7931_v60 = vld [vmem:[#allocation16_spill] sm:$0xff] }
 0x2a4   : > { %vm663_vm6 = vcmp.eq.s32.totalorder %v7930_v39, %v5867_v33  ;;  %vm662_vm8 = vcmp.eq.s32.totalorder %v7931_v60, %v5867_v33 }
 0x2a5   : > { %vm5949_vm9 = vmand %vm663_vm6, %vm983_vm4 }
 0x2a6   : > { %vm5955_vm11 = vmand %vm662_vm8, %vm982_vm5  ;;  %v3962_v44 = vsel %vm5949_vm9, 1.0, %v7604_v23  ;;  %vm665_vm9 = vcmp.eq.s32.totalorder %v7948_v3, %v5867_v33  ;;  %v7955_v3 = vld [vmem:[#allocation92_spill] sm:$0xff] }
 0x2a7   : > { %1890 = vperm.xlu2 %4232, %v7919_v48   ;;  %v3959_v48 = vsel %vm1044_vm3, 1.0, %v7604_v23  ;;  %vm2071_vm3 = vmand %vm1751_vm15, %vm2007_vm10  ;;  %v3961_v59 = vsel %vm5955_vm11, 1.0, %v7604_v23  ;;  %vm1777_vm10 = vcmp.eq.s32.totalorder %v5753_v57, %v5867_v33  ;;  %vm2009_vm15 = vcmp.eq.s32.totalorder %v5913_v28, 1  ;;  %v7956_v28 = vld [vmem:[#allocation152_spill] sm:$0xff] }
 0x2a8   : > { %1989 = vperm.xlu0 %4233, %v7922_v24   ;;  %1887 = vperm.xlu1 %4234, %v7923_v56   ;;  %v2452_v20 = vadd.f32 %v4023_v52, %v3959_v48  ;;  %v7926_v24 = vld [vmem:[#allocation71_spill] sm:$0xff]  ;;  %v7927_v56 = vld [vmem:[#allocation101_spill] sm:$0xff]  ;;  %v4026_v60 = vsel %vm2071_vm3, 1.0, %v7604_v23 }
 0x2a9   : > { %v7937_v48 = vld [vmem:[#allocation123_spill] sm:$0xff] }
 0x2aa   : > { %v5929_v26 = vpop.permute.xlu0 %1851  ;;  %v5931_v54 = vpop.permute.xlu1 %1845  ;;  %v2514_v34 = vpack.c.bf16 %v2453_v50, %v2452_v20  ;;  %vm1008_vm14 = vcmp.eq.s32.totalorder %v7937_v48, 1  ;;  %v7940_v20 = vld [vmem:[#allocation122_spill] sm:$0xff] }
 0x2ab   : > { %v5953_v50 = vpop.permute.xlu2 %1848  ;;  %vm1009_vm1 = vcmp.eq.s32.totalorder %v7940_v20, 1 }
 0x2af   : > { %1893 = vperm.xlu2 %4232, %v7925_v42   ;;  %v7939_v42 = vld [vmem:[#allocation107_spill] sm:$0xff] }
 0x2b0   : > { %1896 = vperm.xlu0 %4233, %v7926_v24   ;;  %1992 = vperm.xlu1 %4234, %v7927_v56   ;;  %v7942_v24 = vld [vmem:[#allocation108_spill] sm:$0xff] }
 0x2b1   : > { %v7944_v56 = vld [vmem:[#allocation48_spill] sm:$0xff] }
 0x2b2   : > { %v5942_v36 = vpop.permute.xlu1 %1854  ;;  %v1906_v38 = vpop.permute.xlu0 %1905  ;;  %2630 = vmatmul.bf16.gmra.mxu0 %v2514_v34  ;;  %vm689_vm6 = vcmp.eq.s32.totalorder %v7944_v56, %v5867_v33  ;;  %v4025_v34 = vsel %vm2070_vm0, 1.0, %v7604_v23  ;;  %v7945_v56 = vld [vmem:[#allocation69_spill] sm:$0xff] }
 0x2b3   : > { %vm2032_vm13 = vcmp.eq.s32.totalorder %v1906_v38, 1  ;;  %v7943_v38 = vld [vmem:[#allocation34_spill] sm:$0xff]  ;;  %vm1073_vm8 = vmand %vm689_vm6, %vm1009_vm1  ;;  %v2454_v48 = vadd.f32 %v4025_v34, %v3961_v59  ;;  %vm1779_vm6 = vcmp.eq.s32.totalorder %v5735_v41, %v5867_v33  ;;  %v7959_v41 = vld [vmem:[#allocation47_spill] sm:$0xff] }
 0x2b4   : > { %vm688_vm4 = vcmp.eq.s32.totalorder %v7943_v38, %v5867_v33  ;;  %vm2096_vm5 = vmand %vm1776_vm2, %vm2032_vm13  ;;  %v3988_v20 = vsel %vm1073_vm8, 1.0, %v7604_v23 }
 0x2b5   : > { %vm1072_vm7 = vmand %vm688_vm4, %vm1008_vm14  ;;  %v4051_v29 = vsel %vm2096_vm5, 1.0, %v7604_v23  ;;  %vm1011_vm14 = vcmp.eq.s32.totalorder %v7947_v17, 1  ;;  %v7954_v17 = vld [vmem:[#allocation159_spill] sm:$0xff]  ;;  %vm2008_vm5 = vcmp.eq.s32.totalorder %v5903_v63, 1 }
 0x2b6   : > { %vm1753_vm4 = vcmp.eq.s32.totalorder %v7954_v17, %v5867_v33  ;;  %v7962_v17 = vld [vmem:[#allocation95_spill] sm:$0xff] }
 0x2b7   : > { %1998 = vperm.xlu2 %4232, %v7939_v42   ;;  %v3987_v42 = vsel %vm1072_vm7, 1.0, %v7604_v23  ;;  %vm2073_vm7 = vmand %vm1753_vm4, %vm2009_vm15  ;;  %vm690_vm15 = vcmp.eq.s32.totalorder %v7959_v41, %v5867_v33  ;;  %v7965_v41 = vld [vmem:[#allocation50_spill] sm:$0xff] }
 0x2b8   : > { %1899 = vperm.xlu0 %4233, %v7941_v30   ;;  %1995 = vperm.xlu1 %4234, %v7942_v24   ;;  %v5988_v30 = vpop.permute.xlu2 %1857  ;;  %v2455_v24 = vadd.f32 %v4026_v60, %v3962_v44  ;;  %v2480_v57 = vadd.f32 %v4051_v29, %v3987_v42  ;;  %v7949_v60 = vld [vmem:[#allocation37_spill] sm:$0xff]  ;;  %v7957_v44 = vld [vmem:[#allocation112_spill] sm:$0xff]  ;;  %v7958_v42 = vld [vmem:[#allocation7_spill] sm:$0xff] }
 0x2b9   : > { %vm691_vm0 = vcmp.eq.s32.totalorder %v7949_v60, %v5867_v33 }
 0x2ba   : > { %v1909_v39 = vpop.permute.xlu1 %1908  ;;  %v2515_v34 = vpack.c.bf16 %v2455_v24, %v2454_v48  ;;  %vm6002_vm3 = vmand %vm691_vm0, %vm1011_vm14  ;;  %v7952_v48 = vmov 0  ;;  %vm1778_vm14 = vcmp.eq.s32.totalorder %v5764_v2, %v5867_v33  ;;  %vm664_vm0 = vcmp.eq.s32.totalorder %v7958_v42, %v5867_v33 }
 0x2bb   : > { %vm2033_vm12 = vcmp.eq.s32.totalorder %v1909_v39, 1  ;;  %v7946_v39 = vld [vmem:[#allocation91_spill] sm:$0xff]  ;;  %v7953_v48 = vsel %vm6002_vm3, 4294967295, %v7952_v48 }
 0x2bc   : > { %vm2097_vm13 = vmand %vm1777_vm10, %vm2033_vm12  ;;  %vm985_vm11 = vcmp.eq.s32.totalorder %v7946_v39, 1  ;;  %vm984_vm12 = vcmp.eq.s32.totalorder %v7955_v3, 1  ;;  %vm1752_vm10 = vcmp.eq.s32.totalorder %v7956_v28, %v5867_v33 }
 0x2bd   : > { %v4052_v25 = vsel %vm2097_vm13, 1.0, %v7604_v23  ;;  %v1912_v23 = vpop.permute.xlu0 %1911  ;;  %vm5998_vm1 = vmand %vm665_vm9, %vm985_vm11  ;;  %vm1010_vm11 = vcmp.eq.s32.totalorder %v7957_v44, 1  ;;  %v7963_v44 = vld [vmem:[#allocation115_spill] sm:$0xff] }
 0x2be   : > { %v2481_v38 = vadd.f32 %v4052_v25, %v3988_v20  ;;  %vm2034_vm8 = vcmp.eq.s32.totalorder %v1912_v23, 1  ;;  %vm2072_vm9 = vmand %vm1752_vm10, %vm2008_vm5  ;;  %v7960_v23 = vmov 0.0   ;;  %vm7961_vm5 = vnez %v7953_v48  ;;  %v7964_v48 = vld [vmem:[#allocation8_spill] sm:$0xff] }
 0x2bf   : > { %vm2098_vm3 = vmand %vm1778_vm14, %vm2034_vm8  ;;  %v4028_v20 = vsel %vm2073_vm7, 1.0, %v7960_v23  ;;  %v3964_v2 = vsel %vm5998_vm1, 1.0, %v7960_v23  ;;  %v3990_v24 = vsel %vm7961_vm5, 1.0, %v7960_v23  ;;  %vm1013_vm1 = vcmp.eq.s32.totalorder %v7963_v44, 1 }
 0x2c0   : > { %1902 = vperm.xlu1 %4234, %v7945_v56   ;;  %v2528_v59 = vpack.c.bf16 %v2481_v38, %v2480_v57  ;;  %v6019_v63 = vpop.permute.xlu2 %1860  ;;  %vm1048_vm4 = vmand %vm664_vm0, %vm984_vm12  ;;  %v4027_v57 = vsel %vm2072_vm9, 1.0, %v7960_v23  ;;  %v4053_v38 = vsel %vm2098_vm3, 1.0, %v7960_v23  ;;  %v2457_v56 = vadd.f32 %v4028_v20, %v3964_v2  ;;  %v7970_v2 = vld [vmem:[#allocation153_spill] sm:$0xff] }
 0x2c1   : > { %vm667_vm7 = vcmp.eq.s32.totalorder %v7964_v48, %v5867_v33  ;;  %vm2011_vm3 = vcmp.eq.s32.totalorder %v5911_v49, 1  ;;  %vm693_vm8 = vcmp.eq.s32.totalorder %v7965_v41, %v5867_v33  ;;  %v7966_v20 = vmov 0  ;;  %v7971_v49 = vld [vmem:[#allocation83_spill] sm:$0xff]  ;;  %v7978_v48 = vld [vmem:[#allocation21_spill] sm:$0xff] }
 0x2c2   : > { %v1915_v52 = vpop.permute.xlu1 %1914  ;;  %2635 = vmatmul.bf16.gmra.mxu0 %v2515_v34  ;;  %2700 = vmatmul.bf16.vlgmr.msra.gmra.mxu2 %v2528_v59  ;;  %v3963_v34 = vsel %vm1048_vm4, 1.0, %v7960_v23  ;;  %vm2010_vm14 = vcmp.eq.s32.totalorder %v5933_v47, 1  ;;  %vm1781_vm9 = vcmp.eq.s32.totalorder %v5773_v4, %v5867_v33  ;;  %vm986_vm4 = vcmp.eq.s32.totalorder %v7971_v49, 1  ;;  %v7975_v4 = vld [vmem:[#allocation51_spill] sm:$0xff]  ;;  %v7980_v49 = vld [vmem:[#allocation24_spill] sm:$0xff] }
 0x2c3   : > { %vm2035_vm2 = vcmp.eq.s32.totalorder %v1915_v52, 1  ;;  %v2456_v52 = vadd.f32 %v4027_v57, %v3963_v34  ;;  %v7973_v57 = vld [vmem:[#allocation125_spill] sm:$0xff] }
 0x2c4   : > { %vm2099_vm13 = vmand %vm1779_vm6, %vm2035_vm2  ;;  %vm987_vm6 = vcmp.eq.s32.totalorder %v7962_v17, 1 }
 0x2c5   : > { %v4054_v25 = vsel %vm2099_vm13, 1.0, %v7960_v23  ;;  %vm1074_vm2 = vmand %vm690_vm15, %vm1010_vm11  ;;  %v1921_v29 = vpop.permute.xlu0 %1920  ;;  %v2516_v3 = vpack.c.bf16 %v2457_v56, %v2456_v52  ;;  %vm1755_vm11 = vcmp.eq.s32.totalorder %v7970_v2, %v5867_v33  ;;  %v4166_v2 = vld [vmem:[%s7569_s3 + $0x30] sm:$0xff] }
 0x2c6   : > { %v2483_v39 = vadd.f32 %v4054_v25, %v3990_v24  ;;  %v3989_v59 = vsel %vm1074_vm2, 1.0, %v7960_v23  ;;  %vm6042_vm12 = vmand %vm667_vm7, %vm987_vm6  ;;  %vm2037_vm10 = vcmp.eq.s32.totalorder %v1921_v29, 1  ;;  %v7968_v25 = vmov 0  ;;  %v7972_v24 = vld [vmem:[#allocation163_spill] sm:$0xff] }
 0x2c7   : > { %v2482_v60 = vadd.f32 %v4053_v38, %v3989_v59  ;;  %v7967_v20 = vsel %vm6042_vm12, 4294967295, %v7966_v20  ;;  %vm6046_vm13 = vmand %vm693_vm8, %vm1013_vm1  ;;  %vm1754_vm2 = vcmp.eq.s32.totalorder %v7972_v24, %v5867_v33  ;;  %vm1012_vm6 = vcmp.eq.s32.totalorder %v7973_v57, 1  ;;  %v7974_v38 = vld [vmem:[#allocation19_spill] sm:$0xff]  ;;  %v7981_v57 = vld [vmem:[#allocation54_spill] sm:$0xff] }
 0x2c8   : > { %v1918_v42 = vpop.permute.xlu2 %1917  ;;  %v7969_v25 = vsel %vm6046_vm13, 4294967295, %v7968_v25  ;;  %vm2075_vm0 = vmand %vm1755_vm11, %vm2011_vm3  ;;  %vm1780_vm1 = vcmp.eq.s32.totalorder %v5762_v1, %v5867_v33  ;;  %vm666_vm8 = vcmp.eq.s32.totalorder %v7974_v38, %v5867_v33  ;;  %vm692_vm3 = vcmp.eq.s32.totalorder %v7975_v4, %v5867_v33 }
 0x2c9   : > { %v2529_v28 = vpack.c.bf16 %v2483_v39, %v2482_v60  ;;  %vm2036_vm15 = vcmp.eq.s32.totalorder %v1918_v42, 1  ;;  %vm2101_vm5 = vmand %vm1781_vm9, %vm2037_vm10  ;;  %v4030_v47 = vsel %vm2075_vm0, 1.0, %v7960_v23  ;;  %vm7976_vm10 = vnez %v7967_v20 }
 0x2ca   : > { %vm2074_vm7 = vmand %vm1754_vm2, %vm2010_vm14  ;;  %v4056_v56 = vsel %vm2101_vm5, 1.0, %v7960_v23  ;;  %v3966_v39 = vsel %vm7976_vm10, 1.0, %v7960_v23  ;;  %vm7977_vm14 = vnez %v7969_v25  ;;  %vm988_vm9 = vcmp.eq.s32.totalorder %v7978_v48, 1  ;;  %v7979_v25 = vld [vmem:[#allocation128_spill] sm:$0xff] }
 0x2cb   : > { %vm2100_vm13 = vmand %vm1780_vm1, %vm2036_vm15  ;;  %v3992_v1 = vsel %vm7977_vm14, 1.0, %v7960_v23  ;;  %v4029_v34 = vsel %vm2074_vm7, 1.0, %v7960_v23  ;;  %v2459_v52 = vadd.f32 %v4030_v47, %v3966_v39  ;;  %vm2012_vm0 = vcmp.eq.s32.totalorder %v5931_v54, 1  ;;  %v7986_v47 = vld [vmem:[#allocation162_spill] sm:$0xff]  ;;  %v7989_v39 = vld [vmem:[#allocation85_spill] sm:$0xff] }
 0x2cc   : > { %vm1050_vm11 = vmand %vm666_vm8, %vm986_vm4  ;;  %v4055_v59 = vsel %vm2100_vm13, 1.0, %v7960_v23  ;;  %v2485_v60 = vadd.f32 %v4056_v56, %v3992_v1  ;;  %vm1015_vm13 = vcmp.eq.s32.totalorder %v7979_v25, 1  ;;  %vm695_vm15 = vcmp.eq.s32.totalorder %v7981_v57, %v5867_v33  ;;  %v4165_v56 = vld [vmem:[%s7569_s3 + $0x28] sm:$0xff]  ;;  %v4162_v54 = vld [vmem:[%s7569_s3 + $0x10] sm:$0xff] }
 0x2cd   : > { %vm1076_vm12 = vmand %vm692_vm3, %vm1012_vm6  ;;  %v3965_v17 = vsel %vm1050_vm11, 1.0, %v7960_v23  ;;  %v1927_v42 = vpop.permute.xlu0 %1926  ;;  %v7984_v4 = vmov 0  ;;  %vm1756_vm6 = vcmp.eq.s32.totalorder %v7986_v47, %v5867_v33  ;;  %vm2013_vm1 = vcmp.eq.s32.totalorder %v5953_v50, 1  ;;  %v7990_v1 = vld [vmem:[#allocation166_spill] sm:$0xff]  ;;  %v7991_v50 = vld [vmem:[#allocation129_spill] sm:$0xff] }
 0x2ce   : > { %v3991_v29 = vsel %vm1076_vm12, 1.0, %v7960_v23  ;;  %vm668_vm12 = vcmp.eq.s32.totalorder %v7980_v49, %v5867_v33  ;;  %vm2039_vm2 = vcmp.eq.s32.totalorder %v1927_v42, 1  ;;  %vm6094_vm5 = vmand %vm695_vm15, %vm1015_vm13  ;;  %vm1783_vm7 = vcmp.eq.s32.totalorder %v5771_v61, %v5867_v33  ;;  %v7992_v61 = vld [vmem:[#allocation23_spill] sm:$0xff]  ;;  %v7996_v47 = vld [vmem:[#allocation132_spill] sm:$0xff] }
 0x2cf   : > { %v2484_v44 = vadd.f32 %v4055_v59, %v3991_v29  ;;  %vm6090_vm4 = vmand %vm668_vm12, %vm988_vm9  ;;  %v7985_v4 = vsel %vm6094_vm5, 4294967295, %v7984_v4  ;;  %vm989_vm11 = vcmp.eq.s32.totalorder %v7989_v39, 1  ;;  %vm1757_vm10 = vcmp.eq.s32.totalorder %v7990_v1, %v5867_v33  ;;  %v7993_v59 = vld [vmem:[#allocation40_spill] sm:$0xff]  ;;  %v7995_v49 = vld [vmem:[#allocation99_spill] sm:$0xff] }
 0x2d0   : > { %v1924_v24 = vpop.permute.xlu2 %1923  ;;  %vm6103_vm8 = vmand %vm1756_vm6, %vm2012_vm0  ;;  %vm1014_vm9 = vcmp.eq.s32.totalorder %v7991_v50, 1  ;;  %vm1782_vm13 = vcmp.eq.s32.totalorder %v5744_v51, %v5867_v33  ;;  %vm669_vm0 = vcmp.eq.s32.totalorder %v7992_v61, %v5867_v33  ;;  %vm694_vm6 = vcmp.eq.s32.totalorder %v7993_v59, %v5867_v33  ;;  %v4164_v51 = vld [vmem:[%s7569_s3 + $0x20] sm:$0xff]  ;;  %v7998_v1 = vld [vmem:[#allocation43_spill] sm:$0xff] }
 0x2d1   : > { %v2530_v20 = vpack.c.bf16 %v2485_v60, %v2484_v44  ;;  %vm2038_vm3 = vcmp.eq.s32.totalorder %v1924_v24, 1  ;;  %vm2103_vm14 = vmand %vm1783_vm7, %vm2039_vm2  ;;  %vm1017_vm7 = vcmp.eq.s32.totalorder %v7996_v47, 1  ;;  %v8001_v61 = vmov 0  ;;  %v8003_v59 = vld [vmem:[#allocation165_spill] sm:$0xff] }
 0x2d2   : > { %2640 = vmatmul.bf16.gmra.mxu0 %v2516_v3  ;;  %2705 = vmatmul.bf16.gmra.mxu2 %v2529_v28  ;;  %v4167_v3 = vld [vmem:[%s7569_s3 + $0x38] sm:$0xff]  ;;  %v2458_v28 = vadd.f32 %v4029_v34, %v3965_v17  ;;  %v6113_v34 = vpop.permute.xlu1 %1863  ;;  %vm2077_vm12 = vmand %vm1757_vm10, %vm2013_vm1  ;;  %v4058_v60 = vsel %vm2103_vm14, 1.0, %v7960_v23  ;;  %v3967_v17 = vsel %vm6090_vm4, 1.0, %v7960_v23  ;;  %vm7994_vm1 = vnez %v7985_v4  ;;  %v8015_v50 = vld [vmem:[#allocation57_spill] sm:$0xff] }
 0x2d3   : > { %2945 = vmatpush.bf16.msra.mxu1 %v4167_v3  ;;  %4177 = vmatpush.bf16.msra.mxu3 %v4167_v3  ;;  %vm2102_vm15 = vmand %vm1782_vm13, %vm2038_vm3  ;;  %v3994_v29 = vsel %vm7994_vm1, 1.0, %v7960_v23  ;;  %v4032_v3 = vsel %vm2077_vm12, 1.0, %v7960_v23  ;;  %vm991_vm4 = vcmp.eq.s32.totalorder %v7995_v49, 1  ;;  %vm697_vm3 = vcmp.eq.s32.totalorder %v7998_v1, %v5867_v33 }
 0x2d4   : > { %v2517_v41 = vpack.c.bf16 %v2459_v52, %v2458_v28  ;;  %vm1053_vm5 = vmand %vm669_vm0, %vm989_vm11  ;;  %v4031_v52 = vsel %vm6103_vm8, 1.0, %v7960_v23  ;;  %v4057_v28 = vsel %vm2102_vm15, 1.0, %v7960_v23  ;;  %v2487_v48 = vadd.f32 %v4058_v60, %v3994_v29  ;;  %v8006_v60 = vld [vmem:[#allocation100_spill] sm:$0xff] }
 0x2d5   : > { %vm1078_vm2 = vmand %vm694_vm6, %vm1014_vm9  ;;  %v2460_v44 = vadd.f32 %v4031_v52, %v3967_v17  ;;  %v3968_v42 = vsel %vm1053_vm5, 1.0, %v7960_v23  ;;  %v1933_v24 = vpop.permute.xlu0 %1932  ;;  %vm2015_vm8 = vcmp.eq.s32.totalorder %v5942_v36, 1  ;;  %vm1759_vm9 = vcmp.eq.s32.totalorder %v8003_v59, %v5867_v33  ;;  %v4161_v52 = vld [vmem:[%s7569_s3 + $0x8] sm:$0xff] }
 0x2d6   : > { %v2461_v25 = vadd.f32 %v4032_v3, %v3968_v42  ;;  %vm2041_vm10 = vcmp.eq.s32.totalorder %v1933_v24, 1  ;;  %vm6158_vm14 = vmand %vm697_vm3, %vm1017_vm7  ;;  %vm2014_vm13 = vcmp.eq.s32.totalorder %v5929_v26, 1  ;;  %vm1785_vm12 = vcmp.eq.s32.totalorder %v5757_v9, %v5867_v33  ;;  %v8008_v17 = vld [vmem:[#allocation118_spill] sm:$0xff]  ;;  %v8009_v9 = vld [vmem:[#allocation11_spill] sm:$0xff] }
 0x2d7   : > { %2946 = vmatpush.bf16.msra.mxu1 %v4166_v2  ;;  %4178 = vmatpush.bf16.msra.mxu3 %v4166_v2  ;;  %v8002_v61 = vsel %vm6158_vm14, 4294967295, %v8001_v61  ;;  %vm6167_vm0 = vmand %vm1759_vm9, %vm2015_vm8  ;;  %vm990_vm6 = vcmp.eq.s32.totalorder %v8006_v60, 1  ;;  %vm1784_vm7 = vcmp.eq.s32.totalorder %v5782_v7, %v5867_v33  ;;  %vm670_vm8 = vcmp.eq.s32.totalorder %v8009_v9, %v5867_v33  ;;  %v8010_v26 = vld [vmem:[#allocation53_spill] sm:$0xff]  ;;  %v8020_v36 = vld [vmem:[#allocation158_spill] sm:$0xff] }
 0x2d8   : > { %v2518_v38 = vpack.c.bf16 %v2461_v25, %v2460_v44  ;;  %v1930_v39 = vpop.permute.xlu2 %1929  ;;  %vm2105_vm1 = vmand %vm1785_vm12, %vm2041_vm10  ;;  %vm696_vm9 = vcmp.eq.s32.totalorder %v8010_v26, %v5867_v33  ;;  %v4034_v29 = vsel %vm6167_vm0, 1.0, %v7960_v23  ;;  %v4160_v7 = vld [vmem:[%s7569_s3] sm:$0xff]  ;;  %v8018_v59 = vmov 0 }
 0x2d9   : > { %vm2040_vm15 = vcmp.eq.s32.totalorder %v1930_v39, 1  ;;  %vm1054_vm14 = vmand %vm670_vm8, %vm990_vm6  ;;  %v4060_v3 = vsel %vm2105_vm1, 1.0, %v7960_v23  ;;  %v8014_v39 = vld [vmem:[#allocation14_spill] sm:$0xff] }
 0x2da   : > { %v6143_v57 = vpop.permute.xlu1 %1866  ;;  %vm2104_vm3 = vmand %vm1784_vm7, %vm2040_vm15  ;;  %vm673_vm0 = vcmp.eq.s32.totalorder %v8014_v39, %v5867_v33  ;;  %vm2017_vm15 = vcmp.eq.s32.totalorder %v6019_v63, 1  ;;  %vm2016_vm7 = vcmp.eq.s32.totalorder %v5988_v30, 1  ;;  %v8023_v30 = vld [vmem:[#allocation28_spill] sm:$0xff]  ;;  %v8046_v39 = vld [vmem:[#allocation61_spill] sm:$0xff] }
 0x2db   : > { %2947 = vmatpush.bf16.msra.mxu1 %v4165_v56  ;;  %4179 = vmatpush.bf16.msra.mxu3 %v4165_v56  ;;  %v7997_v56 = vld [vmem:[#allocation29_spill] sm:$0xff] }
 0x2dc   : > { %vm671_vm5 = vcmp.eq.s32.totalorder %v7997_v56, %v5867_v33  ;;  %v8013_v56 = vld [vmem:[#allocation131_spill] sm:$0xff] }
 0x2dd   : > { %vm6154_vm11 = vmand %vm671_vm5, %vm991_vm4  ;;  %vm1016_vm4 = vcmp.eq.s32.totalorder %v8008_v17, 1  ;;  %vm1018_vm12 = vcmp.eq.s32.totalorder %v8013_v56, 1  ;;  %v6224_v60 = vpop.permute.xlu0 %1869  ;;  %v8030_v56 = vld [vmem:[#allocation46_spill] sm:$0xff] }
 0x2de   : > { %vm1080_vm10 = vmand %vm696_vm9, %vm1016_vm4  ;;  %v3970_v44 = vsel %vm6154_vm11, 1.0, %v7960_v23  ;;  %vm1761_vm4 = vcmp.eq.s32.totalorder %v8020_v36, %v5867_v33  ;;  %v8041_v36 = vld [vmem:[#allocation32_spill] sm:$0xff] }
 0x2df   : > { %2948 = vmatpush.bf16.msra.mxu1 %v4164_v51  ;;  %4180 = vmatpush.bf16.msra.mxu3 %v4164_v51  ;;  %v8007_v51 = vld [vmem:[#allocation155_spill] sm:$0xff]  ;;  %v3995_v49 = vsel %vm1080_vm10, 1.0, %v7960_v23  ;;  %vm2081_vm8 = vmand %vm1761_vm4, %vm2017_vm15  ;;  %vm1760_vm10 = vcmp.eq.s32.totalorder %v5712_v45, %v5867_v33 }
 0x2e0   : > { %v1939_v1 = vpop.permute.xlu2 %1938  ;;  %v4036_v17 = vsel %vm2081_vm8, 1.0, %v7960_v23 }
 0x2e2   : > { %2645 = vmatmul.bf16.gmra.mxu0 %v2517_v41  ;;  %2710 = vmatmul.bf16.gmra.mxu2 %v2530_v20  ;;  %v3993_v41 = vsel %vm1078_vm2, 1.0, %v7960_v23  ;;  %v4163_v20 = vld [vmem:[%s7569_s3 + $0x18] sm:$0xff]  ;;  %vm1758_vm2 = vcmp.eq.s32.totalorder %v8007_v51, %v5867_v33  ;;  %v8022_v51 = vld [vmem:[#allocation121_spill] sm:$0xff] }
 0x2e3   : > { %v2486_v2 = vadd.f32 %v4057_v28, %v3993_v41  ;;  %2949 = vmatpush.bf16.msra.mxu1 %v4163_v20  ;;  %4181 = vmatpush.bf16.msra.mxu3 %v4163_v20  ;;  %vm2078_vm5 = vmand %vm1758_vm2, %vm2014_vm13  ;;  %v1936_v28 = vpop.permute.xlu1 %1935  ;;  %vm8011_vm13 = vnez %v8002_v61  ;;  %v4059_v41 = vsel %vm2104_vm3, 1.0, %v7960_v23  ;;  %v2463_v20 = vadd.f32 %v4034_v29, %v3970_v44 }
 0x2e4   : > { %v4033_v42 = vsel %vm2078_vm5, 1.0, %v7960_v23  ;;  %v8016_v61 = vmov 0  ;;  %vm2042_vm2 = vcmp.eq.s32.totalorder %v1936_v28, 1  ;;  %vm1786_vm5 = vcmp.eq.s32.totalorder %v5780_v11, %v5867_v33  ;;  %v8024_v11 = vld [vmem:[#allocation56_spill] sm:$0xff] }
 0x2e5   : > { %v2531_v4 = vpack.c.bf16 %v2487_v48, %v2486_v2  ;;  %v3996_v48 = vsel %vm8011_vm13, 1.0, %v7960_v23  ;;  %v3969_v2 = vsel %vm1054_vm14, 1.0, %v7960_v23  ;;  %vm698_vm14 = vcmp.eq.s32.totalorder %v8015_v50, %v5867_v33  ;;  %vm2106_vm13 = vmand %vm1786_vm5, %vm2042_vm2  ;;  %v8037_v50 = vld [vmem:[#allocation105_spill] sm:$0xff] }
 0x2e6   : > { %v2489_v25 = vadd.f32 %v4060_v3, %v3996_v48  ;;  %v2462_v24 = vadd.f32 %v4033_v42, %v3969_v2  ;;  %vm6212_vm1 = vmand %vm698_vm14, %vm1018_vm12  ;;  %vm2043_vm3 = vcmp.eq.s32.totalorder %v1939_v1, 1  ;;  %vm1787_vm12 = vcmp.eq.s32.totalorder %v5791_v22, %v5867_v33  ;;  %v8027_v2 = vld [vmem:[#allocation17_spill] sm:$0xff] }
 0x2e7   : > { %2950 = vmatpush.bf16.msra.mxu1 %v4162_v54  ;;  %4182 = vmatpush.bf16.msra.mxu3 %v4162_v54  ;;  %v8019_v59 = vsel %vm6212_vm1, 4294967295, %v8018_v59  ;;  %vm672_vm14 = vcmp.eq.s32.totalorder %v8023_v30, %v5867_v33  ;;  %vm2107_vm1 = vmand %vm1787_vm12, %vm2043_vm3  ;;  %vm699_vm15 = vcmp.eq.s32.totalorder %v8024_v11, %v5867_v33  ;;  %v4061_v45 = vsel %vm2106_vm13, 1.0, %v7960_v23 }
 0x2e8   : > { %v2519_v47 = vpack.c.bf16 %v2463_v20, %v2462_v24  ;;  %v4062_v29 = vsel %vm2107_vm1, 1.0, %v7960_v23  ;;  %v1945_v3 = vpop.permute.xlu2 %1944  ;;  %vm995_vm5 = vcmp.eq.s32.totalorder %v8027_v2, 1  ;;  %vm2019_vm3 = vcmp.eq.s32.totalorder %v6143_v57, 1 }
 0x2e9   : > { %vm2045_vm12 = vcmp.eq.s32.totalorder %v1945_v3, 1  ;;  %v8049_v57 = vmov 0 }
 0x2eb   : > { %2951 = vmatpush.bf16.msra.mxu1 %v4161_v52  ;;  %4183 = vmatpush.bf16.msra.mxu3 %v4161_v52  ;;  %v1942_v63 = vpop.permute.xlu1 %1941  ;;  %v8021_v52 = vld [vmem:[#allocation88_spill] sm:$0xff] }
 0x2ec   : > { %vm992_vm9 = vcmp.eq.s32.totalorder %v8021_v52, 1  ;;  %v8042_v52 = vld [vmem:[#allocation62_spill] sm:$0xff] }
 0x2ed   : > { %vm1056_vm4 = vmand %vm672_vm14, %vm992_vm9  ;;  %vm2018_vm14 = vcmp.eq.s32.totalorder %v6113_v34, 1 }
 0x2ee   : > { %v3971_v44 = vsel %vm1056_vm4, 1.0, %v7960_v23  ;;  %vm994_vm4 = vcmp.eq.s32.totalorder %v8037_v50, 1  ;;  %v8051_v50 = vld [vmem:[#allocation111_spill] sm:$0xff] }
 0x2ef   : > { %2952 = vmatpush.bf16.msra.mxu1 %v4160_v7  ;;  %4184 = vmatpush.bf16.msra.mxu3 %v4160_v7 }
 0x2f2   : > { %2650 = vmatmul.bf16.gmra.mxu0 %v2518_v38  ;;  %2715 = vmatmul.bf16.gmra.mxu2 %v2531_v4  ;;  %v2488_v38 = vadd.f32 %v4059_v41, %v3995_v49  ;;  %v8012_v4 = vld [vmem:[#allocation106_spill] sm:$0xff]  ;;  %v6248_v49 = vpop.permute.xlu0 %1872 }
 0x2f3   : > { %vm993_vm11 = vcmp.eq.s32.totalorder %v8012_v4, 1  ;;  %v6245_v42 = vpop.permute.xlu1 %1947  ;;  %v8028_v4 = vld [vmem:[#allocation135_spill] sm:$0xff] }
 0x2f4   : > { %v2532_v54 = vpack.c.bf16 %v2489_v25, %v2488_v38  ;;  %vm6208_vm6 = vmand %vm673_vm0, %vm993_vm11  ;;  %vm1019_vm11 = vcmp.eq.s32.totalorder %v8022_v51, 1  ;;  %vm1020_vm1 = vcmp.eq.s32.totalorder %v8028_v4, 1  ;;  %v8044_v4 = vld [vmem:[#allocation124_spill] sm:$0xff] }
 0x2f5   : > { %v8017_v61 = vsel %vm6208_vm6, 4294967295, %v8016_v61  ;;  %vm2080_vm0 = vmand %vm1760_vm10, %vm2016_vm7  ;;  %vm8026_vm7 = vnez %v8019_v59  ;;  %vm2044_vm10 = vcmp.eq.s32.totalorder %v1942_v63, 1 }
 0x2f6   : > { %vm1083_vm6 = vmand %vm699_vm15, %vm1019_vm11  ;;  %vm8025_vm2 = vnez %v8017_v61  ;;  %v3997_v22 = vsel %vm8026_vm7, 1.0, %v7960_v23  ;;  %v4035_v26 = vsel %vm2080_vm0, 1.0, %v7960_v23  ;;  %vm1763_vm11 = vcmp.eq.s32.totalorder %v5721_v46, %v5867_v33  ;;  %v1951_v61 = vpop.permute.xlu2 %1950  ;;  %v8038_v46 = vld [vmem:[#allocation134_spill] sm:$0xff] }
 0x2f7   : > { %v3972_v9 = vsel %vm8025_vm2, 1.0, %v7960_v23  ;;  %v2490_v28 = vadd.f32 %v4061_v45, %v3997_v22  ;;  %v3998_v48 = vsel %vm1083_vm6, 1.0, %v7960_v23  ;;  %v2464_v41 = vadd.f32 %v4035_v26, %v3971_v44  ;;  %vm6274_vm15 = vmand %vm1763_vm11, %vm2019_vm3 }
 0x2f8   : > { %v2465_v7 = vadd.f32 %v4036_v17, %v3972_v9  ;;  %v2491_v20 = vadd.f32 %v4062_v29, %v3998_v48  ;;  %vm700_vm6 = vcmp.eq.s32.totalorder %v8030_v56, %v5867_v33  ;;  %vm1788_vm0 = vcmp.eq.s32.totalorder %v5766_v12, %v5867_v33 }
 0x2f9   : > { %vm6265_vm13 = vmand %vm700_vm6, %vm1020_vm1  ;;  %vm1789_vm2 = vcmp.eq.s32.totalorder %v5789_v18, %v5867_v33  ;;  %vm1762_vm1 = vcmp.eq.s32.totalorder %v5710_v13, %v5867_v33  ;;  %vm674_vm3 = vcmp.eq.s32.totalorder %v8041_v36, %v5867_v33  ;;  %v4038_v13 = vsel %vm6274_vm15, 1.0, %v7960_v23 }
 0x2fa   : > { %v2520_v24 = vpack.c.bf16 %v2465_v7, %v2464_v41  ;;  %v2533_v38 = vpack.c.bf16 %v2491_v20, %v2490_v28  ;;  %vm2108_vm7 = vmand %vm1788_vm0, %vm2044_vm10  ;;  %vm701_vm10 = vcmp.eq.s32.totalorder %v8042_v52, %v5867_v33  ;;  %v6300_v30 = vpop.permute.xlu0 %1953  ;;  %v3999_v9 = vsel %vm6265_vm13, 1.0, %v7960_v23 }
 0x2fb   : > { %vm2082_vm6 = vmand %vm1762_vm1, %vm2018_vm14  ;;  %v6291_v63 = vpop.permute.xlu1 %1956  ;;  %v4063_v51 = vsel %vm2108_vm7, 1.0, %v7960_v23  ;;  %vm1022_vm13 = vcmp.eq.s32.totalorder %v8044_v4, 1  ;;  %vm2021_vm14 = vcmp.eq.s32.totalorder %v6248_v49, 1  ;;  %vm702_vm15 = vcmp.eq.s32.totalorder %v8046_v39, %v5867_v33  ;;  %v8065_v39 = vld [vmem:[#allocation164_spill] sm:$0xff]  ;;  %v8082_v4 = vld [vmem:[#allocation113_spill] sm:$0xff] }
 0x2fc   : > { %vm1058_vm11 = vmand %vm674_vm3, %vm994_vm4  ;;  %v4037_v26 = vsel %vm2082_vm6, 1.0, %v7960_v23  ;;  %v2492_v7 = vadd.f32 %v4063_v51, %v3999_v9  ;;  %vm2047_vm1 = vcmp.eq.s32.totalorder %v1951_v61, 1  ;;  %vm2020_vm3 = vcmp.eq.s32.totalorder %v6224_v60, 1 }
 0x2fd   : > { %v3973_v28 = vsel %vm1058_vm11, 1.0, %v7960_v23  ;;  %vm6330_vm7 = vmand %vm702_vm15, %vm1022_vm13  ;;  %vm1791_vm11 = vcmp.eq.s32.totalorder %v5775_v15, %v5867_v33 }
 0x2fe   : > { %v2466_v48 = vadd.f32 %v4037_v26, %v3973_v28  ;;  %v6315_v2 = vpop.permute.xlu2 %1875  ;;  %v8050_v57 = vsel %vm6330_vm7, 4294967295, %v8049_v57 }
 0x302   : > { %2655 = vmatmul.bf16.gmra.mxu0 %v2519_v47  ;;  %2720 = vmatmul.bf16.gmra.mxu2 %v2532_v54  ;;  %v8029_v47 = vld [vmem:[#allocation31_spill] sm:$0xff]  ;;  %v6257_v54 = vld [vmem:[%s7568_s2] ss:$0 sm:$0xff]  ;;  %v6336_v49 = vpop.permute.xlu0 %1959 }
 0x303   : > { %vm675_vm8 = vcmp.eq.s32.totalorder %v8029_v47, %v5867_v33  ;;  %v8045_v47 = vld [vmem:[#allocation36_spill] sm:$0xff]  ;;  %v6321_v56 = vpop.permute.xlu1 %1962 }
 0x304   : > { %vm6261_vm9 = vmand %vm675_vm8, %vm995_vm5  ;;  %vm1021_vm5 = vcmp.eq.s32.totalorder %v8038_v46, 1  ;;  %vm677_vm0 = vcmp.eq.s32.totalorder %v8045_v47, %v5867_v33  ;;  %v8055_v46 = vld [vmem:[#allocation49_spill] sm:$0xff] }
 0x305   : > { %vm6285_vm8 = vmand %vm1789_vm2, %vm2045_vm12  ;;  %v3974_v45 = vsel %vm6261_vm9, 1.0, %v7960_v23  ;;  %vm2046_vm2 = vcmp.eq.s32.totalorder %v6245_v42, 1 }
 0x306   : > { %vm1085_vm12 = vmand %vm701_vm10, %vm1021_vm5  ;;  %v4064_v22 = vsel %vm6285_vm8, 1.0, %v7960_v23  ;;  %v2467_v3 = vadd.f32 %v4038_v13, %v3974_v45  ;;  %vm1765_vm5 = vcmp.eq.s32.totalorder %v5719_v53, %v5867_v33  ;;  %vm1790_vm8 = vcmp.eq.s32.totalorder %v5804_v35, %v5867_v33  ;;  %v8053_v53 = vld [vmem:[#allocation161_spill] sm:$0xff]  ;;  %v8054_v35 = vld [vmem:[#allocation18_spill] sm:$0xff] }
 0x307   : > { %v4000_v44 = vsel %vm1085_vm12, 1.0, %v7960_v23  ;;  %vm2085_vm6 = vmand %vm1765_vm5, %vm2021_vm14  ;;  %vm996_vm10 = vcmp.eq.s32.totalorder %v8051_v50, 1  ;;  %vm1764_vm13 = vcmp.eq.s32.totalorder %v8053_v53, %v5867_v33  ;;  %vm676_vm15 = vcmp.eq.s32.totalorder %v8054_v35, %v5867_v33 }
 0x308   : > { %v2493_v41 = vadd.f32 %v4064_v22, %v4000_v44  ;;  %vm2110_vm12 = vmand %vm1790_vm8, %vm2046_vm2  ;;  %vm703_vm14 = vcmp.eq.s32.totalorder %v8055_v46, %v5867_v33  ;;  %v4040_v15 = vsel %vm2085_vm6, 1.0, %v7960_v23 }
 0x309   : > { %vm2084_vm7 = vmand %vm1764_vm13, %vm2020_vm3  ;;  %v4065_v12 = vsel %vm2110_vm12, 1.0, %v7960_v23  ;;  %vm2022_vm13 = vcmp.eq.s32.totalorder %v6315_v2, 1 }
 0x30a   : > { %vm1060_vm5 = vmand %vm676_vm15, %vm996_vm10 }
 0x30b   : > { %v3975_v26 = vsel %vm1060_vm5, 1.0, %v7960_v23 }
 0x30f   : > { %v2621_v25 = vpop.f32.mrf.mxu0 }
 0x310   : > { %v2622_v59 = vadd.f32 %v6257_v54, %v2621_v25  ;;  %v8043_v25 = vld [vmem:[#allocation110_spill] sm:$0xff] }
 0x311   : > { %vm997_vm9 = vcmp.eq.s32.totalorder %v8043_v25, 1  ;;  %v8058_v25 = vld [vmem:[#allocation127_spill] sm:$0xff] }
 0x312   : > { %2660 = vmatmul.bf16.gmra.mxu0 %v2520_v24  ;;  %2725 = vmatmul.bf16.gmra.mxu2 %v2533_v38  ;;  %v2781_v11 = vmax.f32 %v2622_v59, 0.0  ;;  %v2521_v24 = vpack.c.bf16 %v2467_v3, %v2466_v48  ;;  %v2534_v38 = vpack.c.bf16 %v2493_v41, %v2492_v7  ;;  %vm6325_vm4 = vmand %vm677_vm0, %vm997_vm9  ;;  %v8052_v59 = vld [vmem:[#allocation138_spill] sm:$0xff]  ;;  %v6367_v3 = vpop.permute.xlu0 %1965 }
 0x313   : > { %vm1023_vm9 = vcmp.eq.s32.totalorder %v8052_v59, 1  ;;  %vm2111_vm0 = vmand %vm1791_vm11, %vm2047_vm1  ;;  %v3976_v52 = vsel %vm6325_vm4, 1.0, %v7960_v23  ;;  %vm8056_vm1 = vnez %v8050_v57  ;;  %v8057_v48 = vld [vmem:[#allocation114_spill] sm:$0xff]  ;;  %vm2049_vm11 = vcmp.eq.s32.totalorder %v6291_v63, 1  ;;  %v8070_v59 = vld [vmem:[#allocation35_spill] sm:$0xff] }
 0x314   : > { %vm1087_vm2 = vmand %vm703_vm14, %vm1023_vm9  ;;  %v4001_v13 = vsel %vm8056_vm1, 1.0, %v7960_v23  ;;  %v4066_v51 = vsel %vm2111_vm0, 1.0, %v7960_v23  ;;  %v2469_v9 = vadd.f32 %v4040_v15, %v3976_v52  ;;  %vm999_vm4 = vcmp.eq.s32.totalorder %v8057_v48, 1  ;;  %v8068_v63 = vld [vmem:[#allocation26_spill] sm:$0xff] }
 0x315   : > { %v2494_v22 = vadd.f32 %v4065_v12, %v4001_v13  ;;  %vm1767_vm9 = vcmp.eq.s32.totalorder %v8065_v39, %v5867_v33  ;;  %vm1793_vm0 = vcmp.eq.s32.totalorder %v5819_v31, %v5867_v33  ;;  %vm2048_vm14 = vcmp.eq.s32.totalorder %v6300_v30, 1  ;;  %v8074_v48 = vld [vmem:[#allocation38_spill] sm:$0xff] }
 0x316   : > { %vm998_vm5 = vcmp.eq.s32.totalorder %v8068_v63, 1  ;;  %vm2113_vm1 = vmand %vm1793_vm0, %vm2049_vm11  ;;  %vm681_vm0 = vcmp.eq.s32.totalorder %v8074_v48, %v5867_v33  ;;  %v8089_v48 = vld [vmem:[#allocation55_spill] sm:$0xff] }
 0x317   : > { %v2623_v34 = vpop.f32.mrf.mxu0 }
 0x318   : > { %v2624_v18 = vadd.f32 %v6257_v54, %v2623_v34  ;;  %v1879_v34 = vpop.permute.xlu2 %1878 }
 0x319   : > { %vm2023_vm3 = vcmp.eq.s32.totalorder %v1879_v34, 1 }
 0x31a   : > { %v2782_v17 = vmax.f32 %v2624_v18, 0.0  ;;  %vm6391_vm15 = vmand %vm1767_vm9, %vm2023_vm3  ;;  %vm678_vm3 = vcmp.eq.s32.totalorder %v8070_v59, %v5867_v33  ;;  %v6405_v30 = vpop.permute.xlu0 %1974 }
 0x31b   : > { %vm1062_vm9 = vmand %vm678_vm3, %vm998_vm5 }
 0x31c   : > { %v2845_v29 = vpack.c.bf16 %v2782_v17, %v2781_v11  ;;  %v4039_v11 = vsel %vm2084_vm7, 1.0, %v7960_v23  ;;  %v6363_v17 = vpop.permute.xlu1 %1968  ;;  %vm1025_vm7 = vcmp.eq.s32.totalorder %v8058_v25, 1  ;;  %v3977_v13 = vsel %vm1062_vm9, 1.0, %v7960_v23 }
 0x31d   : > { %v2468_v7 = vadd.f32 %v4039_v11, %v3975_v26  ;;  %v8072_v26 = vld [vmem:[#allocation25_spill] sm:$0xff]  ;;  %vm1794_vm9 = vcmp.eq.s32.totalorder %v5787_v8, %v5867_v33  ;;  %v8085_v8 = vld [vmem:[#allocation52_spill] sm:$0xff]  ;;  %v8092_v25 = vmov 0 }
 0x31e   : > { %2953 = vmatmul.bf16.vlgmr.msra.gmra.mxu1 %v2845_v29  ;;  %v4002_v29 = vsel %vm1087_vm2, 1.0, %v7960_v23  ;;  %vm1766_vm2 = vcmp.eq.s32.totalorder %v5730_v16, %v5867_v33  ;;  %v8071_v16 = vld [vmem:[#allocation68_spill] sm:$0xff] }
 0x31f   : > { %v2626_v20 = vpop.f32.mrf.mxu0  ;;  %v2495_v28 = vadd.f32 %v4066_v51, %v4002_v29  ;;  %v2522_v41 = vpack.c.bf16 %v2469_v9, %v2468_v7  ;;  %vm704_vm11 = vcmp.eq.s32.totalorder %v8071_v16, %v5867_v33 }
 0x320   : > { %v2627_v42 = vadd.f32 %v6257_v54, %v2626_v20  ;;  %v6387_v1 = vpop.permute.xlu2 %1971 }
 0x321   : > { %v2535_v20 = vpack.c.bf16 %v2495_v28, %v2494_v22 }
 0x322   : > { %2665 = vmatmul.bf16.gmra.mxu0 %v2521_v24  ;;  %2730 = vmatmul.bf16.gmra.mxu2 %v2534_v38  ;;  %v2783_v36 = vmax.f32 %v2627_v42, 0.0  ;;  %v8059_v24 = vld [vmem:[#allocation22_spill] sm:$0xff]  ;;  %v8060_v38 = vld [vmem:[#allocation67_spill] sm:$0xff]  ;;  %v8069_v42 = vld [vmem:[#allocation137_spill] sm:$0xff] }
 0x323   : > { %vm679_vm8 = vcmp.eq.s32.totalorder %v8059_v24, %v5867_v33  ;;  %vm705_vm6 = vcmp.eq.s32.totalorder %v8060_v38, %v5867_v33 }
 0x324   : > { %vm6375_vm10 = vmand %vm679_vm8, %vm999_vm4  ;;  %v1882_v50 = vpop.permute.xlu1 %1881  ;;  %vm1024_vm4 = vcmp.eq.s32.totalorder %v8069_v42, 1 }
 0x325   : > { %vm6380_vm12 = vmand %vm705_vm6, %vm1025_vm7  ;;  %vm1792_vm7 = vcmp.eq.s32.totalorder %v5802_v32, %v5867_v33  ;;  %v4068_v32 = vsel %vm2113_vm1, 1.0, %v7960_v23  ;;  %v3978_v46 = vsel %vm6375_vm10, 1.0, %v7960_v23  ;;  %vm1001_vm10 = vcmp.eq.s32.totalorder %v8072_v26, 1 }
 0x326   : > { %vm2086_vm8 = vmand %vm1766_vm2, %vm2022_vm13  ;;  %v4004_v15 = vsel %vm6380_vm12, 1.0, %v7960_v23 }
 0x327   : > { %v2628_v61 = vpop.f32.mrf.mxu0  ;;  %vm2112_vm6 = vmand %vm1792_vm7, %vm2048_vm14  ;;  %v4041_v12 = vsel %vm2086_vm8, 1.0, %v7960_v23  ;;  %v2497_v52 = vadd.f32 %v4068_v32, %v4004_v15  ;;  %vm2050_vm7 = vcmp.eq.s32.totalorder %v6336_v49, 1  ;;  %vm1769_vm8 = vcmp.eq.s32.totalorder %v5739_v6, %v5867_v33  ;;  %v8084_v49 = vld [vmem:[#allocation39_spill] sm:$0xff] }
 0x328   : > { %v2629_v60 = vadd.f32 %v6257_v54, %v2628_v61  ;;  %v4042_v61 = vsel %vm6391_vm15, 1.0, %v7960_v23  ;;  %vm1088_vm13 = vmand %vm704_vm11, %vm1024_vm4  ;;  %v4067_v34 = vsel %vm2112_vm6, 1.0, %v7960_v23  ;;  %v6424_v11 = vpop.permute.xlu2 %1977  ;;  %vm2051_vm15 = vcmp.eq.s32.totalorder %v6321_v56, 1  ;;  %v8096_v56 = vld [vmem:[#allocation116_spill] sm:$0xff] }
 0x329   : > { %v4003_v51 = vsel %vm1088_vm13, 1.0, %v7960_v23  ;;  %vm6435_vm5 = vmand %vm681_vm0, %vm1001_vm10  ;;  %vm1795_vm4 = vcmp.eq.s32.totalorder %v5817_v14, %v5867_v33  ;;  %vm2024_vm6 = vcmp.eq.s32.totalorder %v1882_v50, 1  ;;  %vm1000_vm11 = vcmp.eq.s32.totalorder %v8082_v4, 1  ;;  %v8083_v14 = vld [vmem:[#allocation141_spill] sm:$0xff]  ;;  %v8098_v4 = vld [vmem:[#allocation42_spill] sm:$0xff] }
 0x32a   : > { %v2784_v18 = vmax.f32 %v2629_v60, 0.0  ;;  %v2496_v9 = vadd.f32 %v4067_v34, %v4003_v51  ;;  %vm6448_vm3 = vmand %vm1795_vm4, %vm2051_vm15  ;;  %vm1026_vm10 = vcmp.eq.s32.totalorder %v8083_v14, 1  ;;  %vm680_vm15 = vcmp.eq.s32.totalorder %v8084_v49, %v5867_v33 }
 0x32b   : > { %vm2114_vm0 = vmand %vm1794_vm9, %vm2050_vm7  ;;  %v4070_v63 = vsel %vm6448_vm3, 1.0, %v7960_v23  ;;  %v3980_v42 = vsel %vm6435_vm5, 1.0, %v7960_v23  ;;  %vm2053_vm3 = vcmp.eq.s32.totalorder %v6363_v17, 1 }
 0x32c   : > { %v2846_v45 = vpack.c.bf16 %v2784_v18, %v2783_v36  ;;  %v2471_v18 = vadd.f32 %v4042_v61, %v3978_v46  ;;  %v1885_v29 = vpop.permute.xlu1 %1884  ;;  %v2536_v28 = vpack.c.bf16 %v2497_v52, %v2496_v9  ;;  %vm1064_vm4 = vmand %vm680_vm15, %vm1000_vm11  ;;  %v4069_v59 = vsel %vm2114_vm0, 1.0, %v7960_v23  ;;  %v8086_v52 = vld [vmem:[#allocation117_spill] sm:$0xff] }
 0x32d   : > { %vm2025_vm2 = vcmp.eq.s32.totalorder %v1885_v29, 1  ;;  %v3979_v46 = vsel %vm1064_vm4, 1.0, %v7960_v23  ;;  %vm1002_vm5 = vcmp.eq.s32.totalorder %v8086_v52, 1  ;;  %v8087_v29 = vld [vmem:[#allocation143_spill] sm:$0xff]  ;;  %vm1770_vm0 = vcmp.eq.s32.totalorder %v5708_v27, %v5867_v33 }
 0x32e   : > { %2958 = vmatmul.bf16.gmra.mxu1 %v2846_v45  ;;  %v2470_v45 = vadd.f32 %v4041_v12, %v3977_v13  ;;  %vm2089_vm13 = vmand %vm1769_vm8, %vm2025_vm2  ;;  %vm706_vm2 = vcmp.eq.s32.totalorder %v8085_v8, %v5867_v33  ;;  %vm1796_vm4 = vcmp.eq.s32.totalorder %v5834_v19, %v5867_v33  ;;  %v8099_v19 = vld [vmem:[#allocation73_spill] sm:$0xff] }
 0x32f   : > { %v2631_v44 = vpop.f32.mrf.mxu0  ;;  %vm1090_vm7 = vmand %vm706_vm2, %vm1026_vm10  ;;  %vm1797_vm10 = vcmp.eq.s32.totalorder %v5809_v40, %v5867_v33  ;;  %vm1003_vm2 = vcmp.eq.s32.totalorder %v8096_v56, 1 }
 0x330   : > { %v2632_v2 = vadd.f32 %v6257_v54, %v2631_v44  ;;  %v2523_v7 = vpack.c.bf16 %v2471_v18, %v2470_v45  ;;  %v8073_v44 = vld [vmem:[#allocation140_spill] sm:$0xff]  ;;  %v6461_v39 = vpop.permute.xlu2 %1983  ;;  %v4005_v15 = vsel %vm1090_vm7, 1.0, %v7960_v23 }
 0x331   : > { %vm1027_vm12 = vcmp.eq.s32.totalorder %v8073_v44, 1  ;;  %v2498_v18 = vadd.f32 %v4069_v59, %v4005_v15  ;;  %v8101_v15 = vld [vmem:[#allocation120_spill] sm:$0xff] }
 0x332   : > { %2670 = vmatmul.bf16.gmra.mxu0 %v2522_v41  ;;  %2735 = vmatmul.bf16.gmra.mxu2 %v2535_v20  ;;  %v2785_v35 = vmax.f32 %v2632_v2, 0.0  ;;  %v6431_v41 = vpop.permute.xlu0 %1980  ;;  %v8075_v20 = vld [vmem:[#allocation74_spill] sm:$0xff] }
 0x333   : > { %vm707_vm14 = vcmp.eq.s32.totalorder %v8075_v20, %v5867_v33  ;;  %v8113_v20 = vld [vmem:[#allocation41_spill] sm:$0xff] }
 0x334   : > { %vm6439_vm1 = vmand %vm707_vm14, %vm1027_vm12  ;;  %vm1768_vm12 = vcmp.eq.s32.totalorder %v5728_v58, %v5867_v33  ;;  %v4044_v58 = vsel %vm2089_vm13, 1.0, %v7960_v23  ;;  %v1888_v51 = vpop.permute.xlu1 %1887 }
 0x335   : > { %vm2088_vm14 = vmand %vm1768_vm12, %vm2024_vm6  ;;  %v2473_v61 = vadd.f32 %v4044_v58, %v3980_v42  ;;  %vm709_vm6 = vcmp.eq.s32.totalorder %v8089_v48, %v5867_v33  ;;  %vm2026_vm9 = vcmp.eq.s32.totalorder %v1888_v51, 1  ;;  %vm2052_vm12 = vcmp.eq.s32.totalorder %v6367_v3, 1  ;;  %v8097_v3 = vld [vmem:[#allocation130_spill] sm:$0xff]  ;;  %v8102_v51 = vld [vmem:[#allocation133_spill] sm:$0xff] }
 0x336   : > { %vm2090_vm7 = vmand %vm1770_vm0, %vm2026_vm9  ;;  %vm1031_vm0 = vcmp.eq.s32.totalorder %v8102_v51, 1  ;;  %v8128_v51 = vld [vmem:[#allocation45_spill] sm:$0xff] }
 0x337   : > { %v2633_v31 = vpop.f32.mrf.mxu0 }
 0x338   : > { %v2634_v53 = vadd.f32 %v6257_v54, %v2633_v31  ;;  %v4006_v31 = vsel %vm6439_vm1, 1.0, %v7960_v23  ;;  %vm1029_vm1 = vcmp.eq.s32.totalorder %v8087_v29, 1 }
 0x339   : > { %vm6497_vm13 = vmand %vm709_vm6, %vm1029_vm1  ;;  %vm1771_vm1 = vcmp.eq.s32.totalorder %v5737_v37, %v5867_v33 }
 0x33a   : > { %v2786_v60 = vmax.f32 %v2634_v53, 0.0  ;;  %v4043_v53 = vsel %vm2088_vm14, 1.0, %v7960_v23  ;;  %v6478_v16 = vpop.permute.xlu0 %1986  ;;  %v8093_v25 = vsel %vm6497_vm13, 4294967295, %v8092_v25  ;;  %vm6506_vm14 = vmand %vm1797_vm10, %vm2053_vm3  ;;  %vm683_vm3 = vcmp.eq.s32.totalorder %v8098_v4, %v5867_v33 }
 0x33b   : > { %v2472_v34 = vadd.f32 %v4043_v53, %v3979_v46  ;;  %vm708_vm10 = vcmp.eq.s32.totalorder %v8099_v19, %v5867_v33  ;;  %vm1067_vm13 = vmand %vm683_vm3, %vm1003_vm2  ;;  %v4072_v14 = vsel %vm6506_vm14, 1.0, %v7960_v23 }
 0x33c   : > { %v2847_v36 = vpack.c.bf16 %v2786_v60, %v2785_v35  ;;  %v2499_v60 = vadd.f32 %v4070_v63, %v4006_v31  ;;  %v3982_v53 = vsel %vm1067_vm13, 1.0, %v7960_v23 }
 0x33e   : > { %2963 = vmatmul.bf16.gmra.mxu1 %v2847_v36  ;;  %v2537_v26 = vpack.c.bf16 %v2499_v60, %v2498_v18 }
 0x33f   : > { %v2636_v22 = vpop.f32.mrf.mxu0 }
 0x340   : > { %v2637_v47 = vadd.f32 %v6257_v54, %v2636_v22  ;;  %v2524_v22 = vpack.c.bf16 %v2473_v61, %v2472_v34 }
 0x342   : > { %2675 = vmatmul.bf16.gmra.mxu0 %v2523_v7  ;;  %2740 = vmatmul.bf16.gmra.mxu2 %v2536_v28  ;;  %v2787_v50 = vmax.f32 %v2637_v47, 0.0  ;;  %v8088_v7 = vld [vmem:[#allocation27_spill] sm:$0xff]  ;;  %v1891_v28 = vpop.permute.xlu2 %1890 }
 0x343   : > { %vm682_vm8 = vcmp.eq.s32.totalorder %v8088_v7, %v5867_v33  ;;  %vm2027_vm15 = vcmp.eq.s32.totalorder %v1891_v28, 1 }
 0x344   : > { %vm6493_vm11 = vmand %vm682_vm8, %vm1002_vm5  ;;  %vm1028_vm5 = vcmp.eq.s32.totalorder %v8097_v3, 1 }
 0x345   : > { %v2701_v38 = vpop.f32.mrf.mxu2  ;;  %vm2116_vm8 = vmand %vm1796_vm4, %vm2052_vm12  ;;  %vm8100_vm12 = vnez %v8093_v25 }
 0x346   : > { %v2702_v32 = vadd.f32 %v6257_v54, %v2701_v38  ;;  %v6513_v38 = vpop.permute.xlu0 %1989  ;;  %vm2091_vm6 = vmand %vm1771_vm1, %vm2027_vm15  ;;  %v4008_v8 = vsel %vm8100_vm12, 1.0, %v7960_v23  ;;  %v4071_v63 = vsel %vm2116_vm8, 1.0, %v7960_v23  ;;  %vm2055_vm15 = vcmp.eq.s32.totalorder %v6405_v30, 1 }
 0x347   : > { %v2638_v6 = vpop.f32.mrf.mxu0  ;;  %vm1092_vm9 = vmand %vm708_vm10, %vm1028_vm5  ;;  %v4046_v58 = vsel %vm2091_vm6, 1.0, %v7960_v23  ;;  %v2501_v59 = vadd.f32 %v4072_v14, %v4008_v8  ;;  %vm1799_vm5 = vcmp.eq.s32.totalorder %v5849_v43, %v5867_v33  ;;  %vm2054_vm1 = vcmp.eq.s32.totalorder %v6387_v1, 1  ;;  %v8112_v1 = vld [vmem:[#allocation142_spill] sm:$0xff] }
 0x348   : > { %v2639_v57 = vadd.f32 %v6257_v54, %v2638_v6  ;;  %v2813_v45 = vmax.f32 %v2702_v32, 0.0  ;;  %v4045_v6 = vsel %vm2090_vm7, 1.0, %v7960_v23  ;;  %v4007_v61 = vsel %vm1092_vm9, 1.0, %v7960_v23  ;;  %vm6564_vm3 = vmand %vm1799_vm5, %vm2055_vm15 }
 0x349   : > { %v2500_v46 = vadd.f32 %v4071_v63, %v4007_v61  ;;  %vm1773_vm8 = vcmp.eq.s32.totalorder %v5717_v0, %v5867_v33  ;;  %vm1798_vm9 = vcmp.eq.s32.totalorder %v5832_v21, %v5867_v33  ;;  %vm684_vm15 = vcmp.eq.s32.totalorder %v8113_v20, %v5867_v33  ;;  %v8114_v21 = vld [vmem:[#allocation76_spill] sm:$0xff] }
 0x34a   : > { %v2788_v2 = vmax.f32 %v2639_v57, 0.0  ;;  %v3981_v57 = vsel %vm6493_vm11, 1.0, %v7960_v23  ;;  %vm1005_vm11 = vcmp.eq.s32.totalorder %v8101_v15, 1  ;;  %v4074_v17 = vsel %vm6564_vm3, 1.0, %v7960_v23 }
 0x34b   : > { %vm2057_vm3 = vcmp.eq.s32.totalorder %v6431_v41, 1 }
 0x34c   : > { %v2848_v35 = vpack.c.bf16 %v2788_v2, %v2787_v50  ;;  %v2474_v50 = vadd.f32 %v4045_v6, %v3981_v57  ;;  %v6536_v2 = vpop.permute.xlu1 %1992 }
 0x34d   : > { %v2703_v12 = vpop.f32.mrf.mxu2 }
 0x34e   : > { %v2704_v36 = vadd.f32 %v6257_v54, %v2703_v12  ;;  %2968 = vmatmul.bf16.gmra.mxu1 %v2848_v35  ;;  %v2475_v35 = vadd.f32 %v4046_v58, %v3982_v53  ;;  %v1897_v34 = vpop.permute.xlu0 %1896 }
 0x34f   : > { %v2641_v13 = vpop.f32.mrf.mxu0  ;;  %vm2029_vm4 = vcmp.eq.s32.totalorder %v1897_v34, 1 }
 0x350   : > { %v2814_v9 = vmax.f32 %v2704_v36, 0.0  ;;  %v2642_v40 = vadd.f32 %v6257_v54, %v2641_v13  ;;  %v2525_v52 = vpack.c.bf16 %v2475_v35, %v2474_v50  ;;  %v2538_v13 = vpack.c.bf16 %v2501_v59, %v2500_v46  ;;  %vm2093_vm12 = vmand %vm1773_vm8, %vm2029_vm4  ;;  %v8115_v50 = vld [vmem:[#allocation109_spill] sm:$0xff]  ;;  %v8116_v35 = vld [vmem:[#allocation144_spill] sm:$0xff] }
 0x351   : > { %vm710_vm4 = vcmp.eq.s32.totalorder %v8114_v21, %v5867_v33 }
 0x352   : > { %2680 = vmatmul.bf16.gmra.mxu0 %v2524_v22  ;;  %2745 = vmatmul.bf16.gmra.mxu2 %v2537_v26  ;;  %v2861_v44 = vpack.c.bf16 %v2814_v9, %v2813_v45  ;;  %v2789_v37 = vmax.f32 %v2642_v40, 0.0  ;;  %v8103_v45 = vld [vmem:[#allocation30_spill] sm:$0xff]  ;;  %v1894_v9 = vpop.permute.xlu2 %1893  ;;  %v8104_v26 = vld [vmem:[#allocation75_spill] sm:$0xff] }
 0x353   : > { %vm685_vm13 = vcmp.eq.s32.totalorder %v8103_v45, %v5867_v33  ;;  %vm711_vm14 = vcmp.eq.s32.totalorder %v8104_v26, %v5867_v33  ;;  %vm2028_vm6 = vcmp.eq.s32.totalorder %v1894_v9, 1  ;;  %v8129_v9 = vld [vmem:[#allocation60_spill] sm:$0xff] }
 0x354   : > { %3033 = vmatmul.bf16.vlgmr.msra.gmra.mxu3 %v2861_v44  ;;  %vm6551_vm2 = vmand %vm685_vm13, %vm1005_vm11  ;;  %v8111_v44 = vld [vmem:[#allocation104_spill] sm:$0xff]  ;;  %v6571_v48 = vpop.permute.xlu1 %1995  ;;  %vm1030_vm11 = vcmp.eq.s32.totalorder %v8112_v1, 1 }
 0x355   : > { %v2706_v24 = vpop.f32.mrf.mxu2  ;;  %vm6555_vm7 = vmand %vm711_vm14, %vm1031_vm0  ;;  %vm1004_vm10 = vcmp.eq.s32.totalorder %v8111_v44, 1  ;;  %vm1772_vm0 = vcmp.eq.s32.totalorder %v5748_v5, %v5867_v33  ;;  %v3984_v40 = vsel %vm6551_vm2, 1.0, %v7960_v23  ;;  %vm1007_vm2 = vcmp.eq.s32.totalorder %v8115_v50, 1  ;;  %v8136_v50 = vld [vmem:[#allocation77_spill] sm:$0xff] }
 0x356   : > { %v2707_v42 = vadd.f32 %v6257_v54, %v2706_v24  ;;  %vm2118_vm13 = vmand %vm1798_vm9, %vm2054_vm1  ;;  %v4048_v24 = vsel %vm2093_vm12, 1.0, %v7960_v23  ;;  %v4010_v3 = vsel %vm6555_vm7, 1.0, %v7960_v23  ;;  %vm1033_vm7 = vcmp.eq.s32.totalorder %v8116_v35, 1  ;;  %v1900_v46 = vpop.permute.xlu0 %1899 }
 0x357   : > { %v2643_v27 = vpop.f32.mrf.mxu0  ;;  %vm2092_vm14 = vmand %vm1772_vm0, %vm2028_vm6  ;;  %v2503_v6 = vadd.f32 %v4074_v17, %v4010_v3  ;;  %vm2056_vm0 = vcmp.eq.s32.totalorder %v6424_v11, 1  ;;  %v8127_v11 = vld [vmem:[#allocation33_spill] sm:$0xff] }
 0x358   : > { %v2644_v47 = vadd.f32 %v6257_v54, %v2643_v27  ;;  %v2815_v36 = vmax.f32 %v2707_v42, 0.0  ;;  %vm1068_vm5 = vmand %vm684_vm15, %vm1004_vm10  ;;  %v4073_v27 = vsel %vm2118_vm13, 1.0, %v7960_v23  ;;  %v4047_v4 = vsel %vm2092_vm14, 1.0, %v7960_v23 }
 0x359   : > { %vm1094_vm8 = vmand %vm710_vm4, %vm1030_vm11  ;;  %vm1801_vm11 = vcmp.eq.s32.totalorder %v5847_v10, %v5867_v33  ;;  %vm1775_vm13 = vcmp.eq.s32.totalorder %v5755_v62, %v5867_v33  ;;  %vm2030_vm14 = vcmp.eq.s32.totalorder %v1900_v46, 1 }
 0x35a   : > { %v2790_v49 = vmax.f32 %v2644_v47, 0.0  ;;  %v2477_v47 = vadd.f32 %v4048_v24, %v3984_v40  ;;  %vm6620_vm15 = vmand %vm1801_vm11, %vm2057_vm3  ;;  %vm686_vm3 = vcmp.eq.s32.totalorder %v8128_v51, %v5867_v33  ;;  %vm712_vm11 = vcmp.eq.s32.totalorder %v8129_v9, %v5867_v33 }
 0x35c   : > { %v2849_v31 = vpack.c.bf16 %v2790_v49, %v2789_v37  ;;  %v3983_v37 = vsel %vm1068_vm5, 1.0, %v7960_v23  ;;  %v4009_v49 = vsel %vm1094_vm8, 1.0, %v7960_v23  ;;  %vm1800_vm5 = vcmp.eq.s32.totalorder %v5824_v55, %v5867_v33 }
 0x35d   : > { %v2708_v32 = vpop.f32.mrf.mxu2  ;;  %v2476_v8 = vadd.f32 %v4047_v4, %v3983_v37  ;;  %v2502_v58 = vadd.f32 %v4073_v27, %v4009_v49  ;;  %v4076_v55 = vsel %vm6620_vm15, 1.0, %v7960_v23  ;;  %vm2058_vm15 = vcmp.eq.s32.totalorder %v6461_v39, 1  ;;  %v8133_v49 = vld [vmem:[#allocation66_spill] sm:$0xff] }
 0x35e   : > { %v2709_v60 = vadd.f32 %v6257_v54, %v2708_v32  ;;  %2973 = vmatmul.bf16.gmra.mxu1 %v2849_v31  ;;  %v1903_v31 = vpop.permute.xlu1 %1902 }
 0x35f   : > { %v2646_v12 = vpop.f32.mrf.mxu0  ;;  %v2526_v61 = vpack.c.bf16 %v2477_v47, %v2476_v8  ;;  %v2539_v32 = vpack.c.bf16 %v2503_v6, %v2502_v58  ;;  %vm2031_vm9 = vcmp.eq.s32.totalorder %v1903_v31, 1  ;;  %v8132_v6 = vld [vmem:[#allocation167_spill] sm:$0xff]  ;;  %v8134_v8 = vld [vmem:[#allocation136_spill] sm:$0xff] }
 0x360   : > { %v2816_v18 = vmax.f32 %v2709_v60, 0.0  ;;  %v2647_v43 = vadd.f32 %v6257_v54, %v2646_v12  ;;  %v8117_v60 = vld [vmem:[#allocation44_spill] sm:$0xff]  ;;  %v8118_v12 = vld [vmem:[#allocation79_spill] sm:$0xff]  ;;  %vm2095_vm8 = vmand %vm1775_vm13, %vm2031_vm9  ;;  %vm1803_vm13 = vcmp.eq.s32.totalorder %v8132_v6, %v5867_v33 }
 0x361   : > { %vm687_vm1 = vcmp.eq.s32.totalorder %v8117_v60, %v5867_v33  ;;  %vm713_vm6 = vcmp.eq.s32.totalorder %v8118_v12, %v5867_v33  ;;  %v8146_v6 = vld [vmem:[#allocation168_spill] sm:$0xff] }
 0x362   : > { %2685 = vmatmul.bf16.gmra.mxu0 %v2525_v52  ;;  %2750 = vmatmul.bf16.gmra.mxu2 %v2538_v13  ;;  %v2862_v22 = vpack.c.bf16 %v2816_v18, %v2815_v36  ;;  %v2791_v5 = vmax.f32 %v2647_v43, 0.0  ;;  %vm6607_vm10 = vmand %vm687_vm1, %vm1007_vm2  ;;  %v8121_v36 = vmov 0  ;;  %v8125_v52 = vld [vmem:[#allocation119_spill] sm:$0xff]  ;;  %v8126_v13 = vld [vmem:[#allocation145_spill] sm:$0xff] }
 0x363   : > { %vm6611_vm12 = vmand %vm713_vm6, %vm1033_vm7  ;;  %vm1006_vm4 = vcmp.eq.s32.totalorder %v8125_v52, 1  ;;  %vm1032_vm2 = vcmp.eq.s32.totalorder %v8126_v13, 1  ;;  %vm1774_vm7 = vcmp.eq.s32.totalorder %v8127_v11, %v5867_v33  ;;  %v3986_v7 = vsel %vm6607_vm10, 1.0, %v7960_v23  ;;  %v8138_v13 = vld [vmem:[#allocation172_spill] sm:$0xff] }
 0x364   : > { %3038 = vmatmul.bf16.gmra.mxu3 %v2862_v22  ;;  %v8122_v36 = vsel %vm6611_vm12, 4294967295, %v8121_v36  ;;  %vm2120_vm1 = vmand %vm1800_vm5, %vm2056_vm0  ;;  %v4050_v22 = vsel %vm2095_vm8, 1.0, %v7960_v23  ;;  %vm2059_vm10 = vcmp.eq.s32.totalorder %v6478_v16, 1  ;;  %vm1034_vm5 = vcmp.eq.s32.totalorder %v8134_v8, 1  ;;  %v8135_v16 = vld [vmem:[#allocation170_spill] sm:$0xff]  ;;  %v8149_v8 = vld [vmem:[#allocation171_spill] sm:$0xff] }
 0x365   : > { %v2711_v28 = vpop.f32.mrf.mxu2  ;;  %vm2094_vm6 = vmand %vm1774_vm7, %vm2030_vm14  ;;  %vm8130_vm0 = vnez %v8122_v36  ;;  %v2479_v1 = vadd.f32 %v4050_v22, %v3986_v7  ;;  %vm715_vm14 = vcmp.eq.s32.totalorder %v8133_v49, %v5867_v33  ;;  %v8142_v22 = vld [vmem:[#allocation82_spill] sm:$0xff]  ;;  %v8147_v49 = vld [vmem:[#allocation72_spill] sm:$0xff] }
 0x366   : > { %v2712_v19 = vadd.f32 %v6257_v54, %v2711_v28  ;;  %vm1070_vm12 = vmand %vm686_vm3, %vm1006_vm4  ;;  %v4012_v30 = vsel %vm8130_vm0, 1.0, %v7960_v23  ;;  %v4075_v28 = vsel %vm2120_vm1, 1.0, %v7960_v23  ;;  %v4049_v44 = vsel %vm2094_vm6, 1.0, %v7960_v23 }
 0x367   : > { %v2648_v0 = vpop.f32.mrf.mxu0  ;;  %vm1096_vm9 = vmand %vm712_vm11, %vm1032_vm2  ;;  %v2505_v43 = vadd.f32 %v4076_v55, %v4012_v30  ;;  %vm1802_vm2 = vcmp.eq.s32.totalorder %v8135_v16, %v5867_v33  ;;  %vm714_vm1 = vcmp.eq.s32.totalorder %v8136_v50, %v5867_v33  ;;  %vm2061_vm6 = vcmp.eq.s32.totalorder %v6536_v2, 1  ;;  %v8141_v2 = vld [vmem:[#allocation169_spill] sm:$0xff] }
 0x368   : > { %v2649_v25 = vadd.f32 %v6257_v54, %v2648_v0  ;;  %v2817_v59 = vmax.f32 %v2712_v19, 0.0  ;;  %v4011_v21 = vsel %vm1096_vm9, 1.0, %v7960_v23  ;;  %vm2123_vm4 = vmand %vm1803_vm13, %vm2059_vm10  ;;  %vm1805_vm9 = vcmp.eq.s32.totalorder %v8138_v13, %v5867_v33 }
 0x369   : > { %v2504_v24 = vadd.f32 %v4075_v28, %v4011_v21  ;;  %vm2122_vm7 = vmand %vm1802_vm2, %vm2058_vm15  ;;  %v4078_v39 = vsel %vm2123_vm4, 1.0, %v7960_v23  ;;  %vm2060_vm0 = vcmp.eq.s32.totalorder %v6513_v38, 1  ;;  %v6687_v38 = vld [vmem:[%s7570_s4] ss:$0 sm:$0xff]  ;;  %vm2062_vm2 = vcmp.eq.s32.totalorder %v6571_v48, 1  ;;  %v8148_v48 = vld [vmem:[#allocation150_spill] sm:$0xff] }
 0x36a   : > { %v2792_v56 = vmax.f32 %v2649_v25, 0.0  ;;  %v3985_v25 = vsel %vm1070_vm12, 1.0, %v7960_v23  ;;  %vm1098_vm3 = vmand %vm714_vm1, %vm1034_vm5  ;;  %vm716_vm5 = vcmp.eq.s32.totalorder %v8142_v22, %v5867_v33  ;;  %vm1806_vm1 = vcmp.eq.s32.totalorder %v8146_v6, %v5867_v33 }
 0x36b   : > { %v2540_v47 = vpack.c.bf16 %v2505_v43, %v2504_v24  ;;  %v4013_v60 = vsel %vm1098_vm3, 1.0, %v7960_v23 }
 0x36c   : > { %v2850_v14 = vpack.c.bf16 %v2792_v56, %v2791_v5  ;;  %v2478_v5 = vadd.f32 %v4049_v44, %v3985_v25 }
 0x36d   : > { %v2713_v57 = vpop.f32.mrf.mxu2 }
 0x36e   : > { %v2714_v63 = vadd.f32 %v6257_v54, %v2713_v57  ;;  %2978 = vmatmul.bf16.gmra.mxu1 %v2850_v14  ;;  %v2527_v4 = vpack.c.bf16 %v2479_v1, %v2478_v5  ;;  %v8131_v14 = vld [vmem:[#allocation148_spill] sm:$0xff] }
 0x36f   : > { %v2651_v42 = vpop.f32.mrf.mxu0  ;;  %vm1035_vm12 = vcmp.eq.s32.totalorder %v8131_v14, 1 }
 0x370   : > { %v2818_v53 = vmax.f32 %v2714_v63, 0.0  ;;  %v2652_v10 = vadd.f32 %v6257_v54, %v2651_v42  ;;  %vm1099_vm8 = vmand %vm715_vm14, %vm1035_vm12  ;;  %vm1804_vm14 = vcmp.eq.s32.totalorder %v8141_v2, %v5867_v33 }
 0x371   : > { %vm2125_vm12 = vmand %vm1805_vm9, %vm2061_vm6  ;;  %vm718_vm6 = vcmp.eq.s32.totalorder %v8147_v49, %v5867_v33 }
 0x372   : > { %2690 = vmatmul.bf16.gmra.mxu0 %v2526_v61  ;;  %2755 = vmatmul.bf16.gmra.mxu2 %v2539_v32  ;;  %v2863_v15 = vpack.c.bf16 %v2818_v53, %v2817_v59  ;;  %v2793_v26 = vmax.f32 %v2652_v10, 0.0  ;;  %v4014_v59 = vsel %vm1099_vm8, 1.0, %v7960_v23  ;;  %v4077_v53 = vsel %vm2122_vm7, 1.0, %v7960_v23  ;;  %v8137_v10 = vld [vmem:[#allocation139_spill] sm:$0xff]  ;;  %vm2124_vm4 = vmand %vm1804_vm14, %vm2060_vm0 }
 0x373   : > { %v2507_v61 = vadd.f32 %v4078_v39, %v4014_v59  ;;  %vm1037_vm11 = vcmp.eq.s32.totalorder %v8137_v10, 1  ;;  %v4079_v28 = vsel %vm2124_vm4, 1.0, %v7960_v23  ;;  %vm1039_vm0 = vcmp.eq.s32.totalorder %v8148_v48, 1 }
 0x374   : > { %3043 = vmatmul.bf16.gmra.mxu3 %v2863_v15  ;;  %v2506_v15 = vadd.f32 %v4077_v53, %v4013_v60 }
 0x375   : > { %v2716_v18 = vpop.f32.mrf.mxu2 }
 0x376   : > { %v2717_v0 = vadd.f32 %v6257_v54, %v2716_v18  ;;  %v2541_v18 = vpack.c.bf16 %v2507_v61, %v2506_v15 }
 0x377   : > { %v2653_v62 = vpop.f32.mrf.mxu0 }
 0x378   : > { %v2654_v45 = vadd.f32 %v6257_v54, %v2653_v62  ;;  %v2819_v3 = vmax.f32 %v2717_v0, 0.0  ;;  %v8139_v62 = vld [vmem:[#allocation80_spill] sm:$0xff] }
 0x379   : > { %vm717_vm10 = vcmp.eq.s32.totalorder %v8139_v62, %v5867_v33 }
 0x37a   : > { %v2794_v29 = vmax.f32 %v2654_v45, 0.0  ;;  %vm1101_vm13 = vmand %vm717_vm10, %vm1037_vm11  ;;  %v8140_v45 = vld [vmem:[#allocation147_spill] sm:$0xff]  ;;  %vm1807_vm10 = vcmp.eq.s32.totalorder %v8149_v8, %v5867_v33 }
 0x37b   : > { %vm1036_vm15 = vcmp.eq.s32.totalorder %v8140_v45, 1  ;;  %v4016_v30 = vsel %vm1101_vm13, 1.0, %v7960_v23  ;;  %vm2126_vm11 = vmand %vm1806_vm1, %vm2062_vm2 }
 0x37c   : > { %v2851_v20 = vpack.c.bf16 %v2794_v29, %v2793_v26  ;;  %v4080_v26 = vsel %vm2125_vm12, 1.0, %v7960_v23  ;;  %vm1100_vm8 = vmand %vm716_vm5, %vm1036_vm15  ;;  %v4081_v50 = vsel %vm2126_vm11, 1.0, %v7960_v23 }
 0x37d   : > { %v2718_v17 = vpop.f32.mrf.mxu2  ;;  %v2509_v43 = vadd.f32 %v4080_v26, %v4016_v30  ;;  %v4015_v25 = vsel %vm1100_vm8, 1.0, %v7960_v23 }
 0x37e   : > { %v2719_v56 = vadd.f32 %v6257_v54, %v2718_v17  ;;  %2983 = vmatmul.bf16.gmra.mxu1 %v2851_v20  ;;  %v2508_v17 = vadd.f32 %v4079_v28, %v4015_v25 }
 0x37f   : > { %v2656_v40 = vpop.f32.mrf.mxu0 }
 0x380   : > { %v2820_v27 = vmax.f32 %v2719_v56, 0.0  ;;  %v2657_v57 = vadd.f32 %v6257_v54, %v2656_v40 }
 0x382   : > { %2695 = vmatmul.bf16.gmra.mxu0 %v2527_v4  ;;  %2760 = vmatmul.bf16.gmra.mxu2 %v2540_v47  ;;  %v2864_v19 = vpack.c.bf16 %v2820_v27, %v2819_v3  ;;  %v2795_v42 = vmax.f32 %v2657_v57, 0.0  ;;  %v2542_v3 = vpack.c.bf16 %v2509_v43, %v2508_v17  ;;  %v1999_v27 = vpop.permute.xlu2 %1998 }
 0x383   : > { %vm2063_vm3 = vcmp.eq.s32.totalorder %v1999_v27, 1 }
 0x384   : > { %3048 = vmatmul.bf16.gmra.mxu3 %v2864_v19  ;;  %v8144_v19 = vld [vmem:[#allocation151_spill] sm:$0xff]  ;;  %vm2127_vm12 = vmand %vm1807_vm10, %vm2063_vm3 }
 0x385   : > { %v2721_v37 = vpop.f32.mrf.mxu2  ;;  %vm1038_vm7 = vcmp.eq.s32.totalorder %v8144_v19, 1  ;;  %v4082_v59 = vsel %vm2127_vm12, 1.0, %v7960_v23 }
 0x386   : > { %v2722_v32 = vadd.f32 %v6257_v54, %v2721_v37  ;;  %vm1102_vm9 = vmand %vm718_vm6, %vm1038_vm7 }
 0x387   : > { %v2658_v63 = vpop.f32.mrf.mxu0 }
 0x388   : > { %v2659_v58 = vadd.f32 %v6257_v54, %v2658_v63  ;;  %v2821_v36 = vmax.f32 %v2722_v32, 0.0 }
 0x38a   : > { %v2796_v31 = vmax.f32 %v2659_v58, 0.0  ;;  %v8150_v58 = vld [vmem:[#allocation84_spill] sm:$0xff] }
 0x38b   : > { %vm719_vm13 = vcmp.eq.s32.totalorder %v8150_v58, %v5867_v33 }
 0x38c   : > { %v2852_v35 = vpack.c.bf16 %v2796_v31, %v2795_v42  ;;  %vm1103_vm15 = vmand %vm719_vm13, %vm1039_vm0  ;;  %v4017_v31 = vsel %vm1102_vm9, 1.0, %v7960_v23 }
 0x38d   : > { %v2723_v46 = vpop.f32.mrf.mxu2  ;;  %v2510_v61 = vadd.f32 %v4081_v50, %v4017_v31 }
 0x38e   : > { %v2724_v12 = vadd.f32 %v6257_v54, %v2723_v46  ;;  %2988 = vmatmul.bf16.gmra.mxu1 %v2852_v35  ;;  %v4018_v46 = vsel %vm1103_vm15, 1.0, %v7960_v23  ;;  %v6734_v23 = vld [vmem:[%s7568_s2] ss:$0 sm:$0xff] }
 0x38f   : > { %v2661_v34 = vpop.f32.mrf.mxu0  ;;  %v2511_v15 = vadd.f32 %v4082_v59, %v4018_v46 }
 0x390   : > { %v2822_v41 = vmax.f32 %v2724_v12, 0.0  ;;  %v2662_v51 = vadd.f32 %v6257_v54, %v2661_v34 }
 0x392   : > { %2765 = vmatmul.bf16.gmra.mxu2 %v2541_v18  ;;  %v2865_v52 = vpack.c.bf16 %v2822_v41, %v2821_v36  ;;  %v2797_v29 = vmax.f32 %v2662_v51, 0.0  ;;  %v2543_v18 = vpack.c.bf16 %v2511_v15, %v2510_v61 }
 0x394   : > { %3053 = vmatmul.bf16.gmra.mxu3 %v2865_v52 }
 0x395   : > { %v2726_v11 = vpop.f32.mrf.mxu2 }
 0x396   : > { %v2727_v1 = vadd.f32 %v6257_v54, %v2726_v11 }
 0x397   : > { %v2663_v9 = vpop.f32.mrf.mxu0 }
 0x398   : > { %v2664_v55 = vadd.f32 %v6257_v54, %v2663_v9  ;;  %v2823_v56 = vmax.f32 %v2727_v1, 0.0 }
 0x39a   : > { %v2798_v7 = vmax.f32 %v2664_v55, 0.0 }
 0x39b   : > { %v2954_v44 = vpop.f32.mrf.mxu1 }
 0x39c   : > { %v6696_v0 = vadd.f32 %v6687_v38, %v2954_v44  ;;  %v2853_v20 = vpack.c.bf16 %v2798_v7, %v2797_v29 }
 0x39d   : > { %v2728_v21 = vpop.f32.mrf.mxu2 }
 0x39e   : > { %8143 = vst [vmem:[#allocation13_spill] sm:$0xff] %v6696_v0  ;;  %v2729_v24 = vadd.f32 %v6257_v54, %v2728_v21  ;;  %3114 = vmax.xlane.f32.xlu2 %v6696_v0  ;;  %2993 = vmatmul.bf16.gmra.mxu1 %v2853_v20 }
 0x39f   : > { %v2666_v5 = vpop.f32.mrf.mxu0 }
 0x3a0   : > { %v2824_v40 = vmax.f32 %v2729_v24, 0.0  ;;  %v2667_v57 = vadd.f32 %v6257_v54, %v2666_v5 }
 0x3a2   : > { %2770 = vmatmul.bf16.gmra.mxu2 %v2542_v3  ;;  %v2866_v4 = vpack.c.bf16 %v2824_v40, %v2823_v56  ;;  %v2799_v39 = vmax.f32 %v2667_v57, 0.0 }
 0x3a3   : > { %v2956_v47 = vpop.f32.mrf.mxu1 }
 0x3a4   : > { %v6704_v14 = vadd.f32 %v6687_v38, %v2956_v47  ;;  %3058 = vmatmul.bf16.gmra.mxu3 %v2866_v4 }
 0x3a5   : > { %v2731_v37 = vpop.f32.mrf.mxu2 }
 0x3a6   : > { %8145 = vst [vmem:[#allocation10_spill] sm:$0xff] %v6704_v14  ;;  %3116 = vmax.xlane.f32.xlu0 %v6704_v14  ;;  %v2732_v32 = vadd.f32 %v6257_v54, %v2731_v37 }
 0x3a7   : > { %v2668_v16 = vpop.f32.mrf.mxu0 }
 0x3a8   : > { %v2669_v63 = vadd.f32 %v6257_v54, %v2668_v16  ;;  %v2825_v36 = vmax.f32 %v2732_v32, 0.0 }
 0x3aa   : > { %v2800_v42 = vmax.f32 %v2669_v63, 0.0 }
 0x3ab   : > { %v2959_v53 = vpop.f32.mrf.mxu1 }
 0x3ac   : > { %v6723_v35 = vadd.f32 %v6687_v38, %v2959_v53  ;;  %v2854_v60 = vpack.c.bf16 %v2800_v42, %v2799_v39 }
 0x3ad   : > { %v2733_v33 = vpop.f32.mrf.mxu2 }
 0x3ae   : > { %v2734_v12 = vadd.f32 %v6257_v54, %v2733_v33  ;;  %3118 = vmax.xlane.f32.xlu1 %v6723_v35  ;;  %2998 = vmatmul.bf16.gmra.mxu1 %v2854_v60 }
 0x3af   : > { %v2671_v34 = vpop.f32.mrf.mxu0 }
 0x3b0   : > { %v2826_v41 = vmax.f32 %v2734_v12, 0.0  ;;  %v2672_v54 = vadd.f32 %v6734_v23, %v2671_v34 }
 0x3b2   : > { %2775 = vmatmul.bf16.gmra.mxu2 %v2543_v18  ;;  %v2867_v52 = vpack.c.bf16 %v2826_v41, %v2825_v36  ;;  %v2801_v45 = vmax.f32 %v2672_v54, 0.0 }
 0x3b3   : > { %v2961_v10 = vpop.f32.mrf.mxu1 }
 0x3b4   : > { %v6729_v13 = vadd.f32 %v6687_v38, %v2961_v10  ;;  %3063 = vmatmul.bf16.gmra.mxu3 %v2867_v52 }
 0x3b5   : > { %v2736_v11 = vpop.f32.mrf.mxu2 }
 0x3b6   : > { %8151 = vst [vmem:[#allocation93_spill] sm:$0xff] %v6729_v13  ;;  %3120 = vmax.xlane.f32.xlu2 %v6729_v13  ;;  %v2737_v55 = vadd.f32 %v6734_v23, %v2736_v11 }
 0x3b7   : > { %v2673_v62 = vpop.f32.mrf.mxu0 }
 0x3b8   : > { %v2674_v51 = vadd.f32 %v6734_v23, %v2673_v62  ;;  %v2827_v28 = vmax.f32 %v2737_v55, 0.0 }
 0x3ba   : > { %v2802_v2 = vmax.f32 %v2674_v51, 0.0 }
 0x3bb   : > { %v2964_v9 = vpop.f32.mrf.mxu1 }
 0x3bc   : > { %v6741_v22 = vadd.f32 %v6687_v38, %v2964_v9  ;;  %v2855_v26 = vpack.c.bf16 %v2802_v2, %v2801_v45 }
 0x3bd   : > { %v2738_v29 = vpop.f32.mrf.mxu2 }
 0x3be   : > { %8152 = vst [vmem:[#allocation94_spill] sm:$0xff] %v6741_v22  ;;  %v2739_v7 = vadd.f32 %v6734_v23, %v2738_v29  ;;  %3122 = vmax.xlane.f32.xlu2 %v6741_v22  ;;  %3003 = vmatmul.bf16.gmra.mxu1 %v2855_v26 }
 0x3bf   : > { %v2676_v30 = vpop.f32.mrf.mxu0 }
 0x3c0   : > { %v2828_v44 = vmax.f32 %v2739_v7, 0.0  ;;  %v2677_v21 = vadd.f32 %v6734_v23, %v2676_v30 }
 0x3c2   : > { %v2868_v43 = vpack.c.bf16 %v2828_v44, %v2827_v28  ;;  %v2803_v5 = vmax.f32 %v2677_v21, 0.0 }
 0x3c3   : > { %v2966_v1 = vpop.f32.mrf.mxu1 }
 0x3c4   : > { %v6746_v20 = vadd.f32 %v6687_v38, %v2966_v1  ;;  %3068 = vmatmul.bf16.gmra.mxu3 %v2868_v43 }
 0x3c5   : > { %v2741_v25 = vpop.f32.mrf.mxu2 }
 0x3c6   : > { %8153 = vst [vmem:[#allocation86_spill] sm:$0xff] %v6746_v20  ;;  %3124 = vmax.xlane.f32.xlu0 %v6746_v20  ;;  %v2742_v3 = vadd.f32 %v6734_v23, %v2741_v25 }
 0x3c7   : > { %v2678_v17 = vpop.f32.mrf.mxu0 }
 0x3c8   : > { %v2679_v24 = vadd.f32 %v6734_v23, %v2678_v17  ;;  %v2829_v37 = vmax.f32 %v2742_v3, 0.0 }
 0x3ca   : > { %v2804_v56 = vmax.f32 %v2679_v24, 0.0 }
 0x3cb   : > { %v2969_v40 = vpop.f32.mrf.mxu1 }
 0x3cc   : > { %v6753_v27 = vadd.f32 %v6687_v38, %v2969_v40  ;;  %v2856_v4 = vpack.c.bf16 %v2804_v56, %v2803_v5 }
 0x3cd   : > { %v2743_v47 = vpop.f32.mrf.mxu2 }
 0x3ce   : > { %8154 = vst [vmem:[#allocation146_spill] sm:$0xff] %v6753_v27  ;;  %v2744_v19 = vadd.f32 %v6734_v23, %v2743_v47  ;;  %3126 = vmax.xlane.f32.xlu1 %v6753_v27  ;;  %3008 = vmatmul.bf16.gmra.mxu1 %v2856_v4 }
 0x3cf   : > { %v2681_v6 = vpop.f32.mrf.mxu0 }
 0x3d0   : > { %v2830_v49 = vmax.f32 %v2744_v19, 0.0  ;;  %v2682_v63 = vadd.f32 %v6734_v23, %v2681_v6 }
 0x3d2   : > { %v2869_v57 = vpack.c.bf16 %v2830_v49, %v2829_v37  ;;  %v2805_v42 = vmax.f32 %v2682_v63, 0.0 }
 0x3d3   : > { %v2971_v48 = vpop.f32.mrf.mxu1 }
 0x3d4   : > { %v6758_v8 = vadd.f32 %v6687_v38, %v2971_v48  ;;  %3073 = vmatmul.bf16.gmra.mxu3 %v2869_v57 }
 0x3d5   : > { %v2746_v16 = vpop.f32.mrf.mxu2 }
 0x3d6   : > { %3128 = vmax.xlane.f32.xlu2 %v6758_v8  ;;  %v2747_v53 = vadd.f32 %v6734_v23, %v2746_v16 }
 0x3d7   : > { %v2683_v58 = vpop.f32.mrf.mxu0  ;;  %v6762_v50 = vpop.f32.mrf.mxu3 }
 0x3d8   : > { %v2684_v39 = vadd.f32 %v6734_v23, %v2683_v58  ;;  %v2831_v12 = vmax.f32 %v2747_v53, 0.0 }
 0x3da   : > { %v2806_v31 = vmax.f32 %v2684_v39, 0.0 }
 0x3db   : > { %v2974_v59 = vpop.f32.mrf.mxu1 }
 0x3dc   : > { %v2857_v61 = vpack.c.bf16 %v2806_v31, %v2805_v42  ;;  %v6767_v32 = vadd.f32 %v6687_v38, %v2974_v59 }
 0x3dd   : > { %v2748_v60 = vpop.f32.mrf.mxu2 }
 0x3de   : > { %8155 = vst [vmem:[#allocation12_spill] sm:$0xff] %v6767_v32  ;;  %v2749_v46 = vadd.f32 %v6734_v23, %v2748_v60  ;;  %3130 = vmax.xlane.f32.xlu0 %v6767_v32  ;;  %3013 = vmatmul.bf16.gmra.mxu1 %v2857_v61 }
 0x3df   : > { %v2686_v33 = vpop.f32.mrf.mxu0  ;;  %v6771_v15 = vpop.f32.mrf.mxu3 }
 0x3e0   : > { %v2832_v34 = vmax.f32 %v2749_v46, 0.0  ;;  %v2687_v10 = vadd.f32 %v6734_v23, %v2686_v33 }
 0x3e2   : > { %v2870_v36 = vpack.c.bf16 %v2832_v34, %v2831_v12  ;;  %v2807_v51 = vmax.f32 %v2687_v10, 0.0 }
 0x3e3   : > { %v2976_v41 = vpop.f32.mrf.mxu1 }
 0x3e4   : > { %v6774_v18 = vadd.f32 %v6687_v38, %v2976_v41  ;;  %3078 = vmatmul.bf16.gmra.mxu3 %v2870_v36 }
 0x3e5   : > { %v2751_v52 = vpop.f32.mrf.mxu2 }
 0x3e6   : > { %8156 = vst [vmem:[#allocation98_spill] sm:$0xff] %v6774_v18  ;;  %3132 = vmax.xlane.f32.xlu1 %v6774_v18  ;;  %v2752_v9 = vadd.f32 %v6734_v23, %v2751_v52 }
 0x3e7   : > { %v2688_v11 = vpop.f32.mrf.mxu0  ;;  %v6778_v54 = vpop.f32.mrf.mxu3 }
 0x3e8   : > { %v2689_v62 = vadd.f32 %v6734_v23, %v2688_v11  ;;  %v2833_v44 = vmax.f32 %v2752_v9, 0.0 }
 0x3ea   : > { %v2808_v45 = vmax.f32 %v2689_v62, 0.0 }
 0x3eb   : > { %v2979_v2 = vpop.f32.mrf.mxu1 }
 0x3ec   : > { %v2858_v55 = vpack.c.bf16 %v2808_v45, %v2807_v51  ;;  %v6783_v26 = vadd.f32 %v6687_v38, %v2979_v2 }
 0x3ed   : > { %v2753_v29 = vpop.f32.mrf.mxu2 }
 0x3ee   : > { %v2754_v7 = vadd.f32 %v6734_v23, %v2753_v29  ;;  %3134 = vmax.xlane.f32.xlu2 %v6783_v26  ;;  %3018 = vmatmul.bf16.gmra.mxu1 %v2858_v55 }
 0x3ef   : > { %v2691_v30 = vpop.f32.mrf.mxu0  ;;  %v6787_v28 = vpop.f32.mrf.mxu3 }
 0x3f0   : > { %v2834_v43 = vmax.f32 %v2754_v7, 0.0  ;;  %v2692_v24 = vadd.f32 %v6734_v23, %v2691_v30 }
 0x3f2   : > { %v2871_v1 = vpack.c.bf16 %v2834_v43, %v2833_v44  ;;  %v2809_v3 = vmax.f32 %v2692_v24, 0.0 }
 0x3f3   : > { %v2981_v25 = vpop.f32.mrf.mxu1 }
 0x3f4   : > { %v6790_v21 = vadd.f32 %v6687_v38, %v2981_v25  ;;  %3083 = vmatmul.bf16.gmra.mxu3 %v2871_v1 }
 0x3f5   : > { %v2756_v17 = vpop.f32.mrf.mxu2 }
 0x3f6   : > { %8157 = vst [vmem:[#allocation87_spill] sm:$0xff] %v6790_v21  ;;  %3136 = vmax.xlane.f32.xlu0 %v6790_v21  ;;  %v2757_v19 = vadd.f32 %v6734_v23, %v2756_v17 }
 0x3f7   : > { %v2693_v5 = vpop.f32.mrf.mxu0  ;;  %v6794_v56 = vpop.f32.mrf.mxu3 }
 0x3f8   : > { %v2694_v40 = vadd.f32 %v6734_v23, %v2693_v5  ;;  %v2835_v63 = vmax.f32 %v2757_v19, 0.0 }
 0x3fa   : > { %v2810_v4 = vmax.f32 %v2694_v40, 0.0 }
 0x3fb   : > { %v2984_v47 = vpop.f32.mrf.mxu1 }
 0x3fc   : > { %v2859_v6 = vpack.c.bf16 %v2810_v4, %v2809_v3  ;;  %v6799_v37 = vadd.f32 %v6687_v38, %v2984_v47 }
 0x3fd   : > { %v2758_v49 = vpop.f32.mrf.mxu2 }
 0x3fe   : > { %8158 = vst [vmem:[#allocation154_spill] sm:$0xff] %v6799_v37  ;;  %v2759_v57 = vadd.f32 %v6734_v23, %v2758_v49  ;;  %3138 = vmax.xlane.f32.xlu1 %v6799_v37  ;;  %3023 = vmatmul.bf16.gmra.mxu1 %v2859_v6 }
 0x3ff   : > { %v2696_v48 = vpop.f32.mrf.mxu0  ;;  %v6803_v16 = vpop.f32.mrf.mxu3 }
 0x400   : > { %v2836_v58 = vmax.f32 %v2759_v57, 0.0  ;;  %v2697_v53 = vadd.f32 %v6734_v23, %v2696_v48 }
 0x402   : > { %v2872_v39 = vpack.c.bf16 %v2836_v58, %v2835_v63  ;;  %v2811_v33 = vmax.f32 %v2697_v53, 0.0 }
 0x403   : > { %v2986_v42 = vpop.f32.mrf.mxu1 }
 0x404   : > { %v6806_v31 = vadd.f32 %v6687_v38, %v2986_v42  ;;  %3088 = vmatmul.bf16.gmra.mxu3 %v2872_v39 }
 0x405   : > { %v2761_v59 = vpop.f32.mrf.mxu2 }
 0x406   : > { %3140 = vmax.xlane.f32.xlu2 %v6806_v31  ;;  %v2762_v36 = vadd.f32 %v6734_v23, %v2761_v59 }
 0x407   : > { %v2698_v61 = vpop.f32.mrf.mxu0  ;;  %v6810_v60 = vpop.f32.mrf.mxu3 }
 0x408   : > { %v2699_v46 = vadd.f32 %v6734_v23, %v2698_v61  ;;  %v2837_v51 = vmax.f32 %v2762_v36, 0.0 }
 0x40a   : > { %v2812_v12 = vmax.f32 %v2699_v46, 0.0 }
 0x40b   : > { %v2989_v34 = vpop.f32.mrf.mxu1 }
 0x40c   : > { %v2860_v41 = vpack.c.bf16 %v2812_v12, %v2811_v33  ;;  %v6815_v52 = vadd.f32 %v6687_v38, %v2989_v34 }
 0x40d   : > { %v2763_v10 = vpop.f32.mrf.mxu2 }
 0x40e   : > { %8159 = vst [vmem:[#allocation97_spill] sm:$0xff] %v6815_v52  ;;  %v2764_v11 = vadd.f32 %v6734_v23, %v2763_v10  ;;  %3142 = vmax.xlane.f32.xlu0 %v6815_v52  ;;  %3028 = vmatmul.bf16.gmra.mxu1 %v2860_v41 }
 0x40f   : > { %v6819_v62 = vpop.f32.mrf.mxu3 }
 0x410   : > { %v2838_v45 = vmax.f32 %v2764_v11, 0.0 }
 0x412   : > { %v2873_v2 = vpack.c.bf16 %v2838_v45, %v2837_v51 }
 0x413   : > { %v2991_v9 = vpop.f32.mrf.mxu1 }
 0x414   : > { %v6822_v55 = vadd.f32 %v6687_v38, %v2991_v9  ;;  %3093 = vmatmul.bf16.gmra.mxu3 %v2873_v2 }
 0x415   : > { %v2766_v29 = vpop.f32.mrf.mxu2 }
 0x416   : > { %8160 = vst [vmem:[#allocation59_spill] sm:$0xff] %v6822_v55  ;;  %3144 = vmax.xlane.f32.xlu1 %v6822_v55  ;;  %v2767_v44 = vadd.f32 %v6734_v23, %v2766_v29 }
 0x417   : > { %v6825_v7 = vpop.f32.mrf.mxu3 }
 0x418   : > { %v2839_v24 = vmax.f32 %v2767_v44, 0.0 }
 0x41b   : > { %v2994_v30 = vpop.f32.mrf.mxu1 }
 0x41c   : > { %v6829_v43 = vadd.f32 %v6687_v38, %v2994_v30 }
 0x41d   : > { %v2768_v1 = vpop.f32.mrf.mxu2 }
 0x41e   : > { %v2769_v25 = vadd.f32 %v6734_v23, %v2768_v1  ;;  %3146 = vmax.xlane.f32.xlu2 %v6829_v43 }
 0x41f   : > { %v6833_v17 = vpop.f32.mrf.mxu3 }
 0x420   : > { %v2840_v5 = vmax.f32 %v2769_v25, 0.0 }
 0x422   : > { %v2874_v40 = vpack.c.bf16 %v2840_v5, %v2839_v24 }
 0x423   : > { %v2996_v3 = vpop.f32.mrf.mxu1 }
 0x424   : > { %v6836_v4 = vadd.f32 %v6687_v38, %v2996_v3  ;;  %3098 = vmatmul.bf16.gmra.mxu3 %v2874_v40 }
 0x425   : > { %v2771_v47 = vpop.f32.mrf.mxu2 }
 0x426   : > { %8161 = vst [vmem:[#allocation9_spill] sm:$0xff] %v6836_v4  ;;  %3148 = vmax.xlane.f32.xlu0 %v6836_v4  ;;  %v2772_v49 = vadd.f32 %v6734_v23, %v2771_v47 }
 0x427   : > { %v6839_v19 = vpop.f32.mrf.mxu3 }
 0x428   : > { %v2841_v39 = vmax.f32 %v2772_v49, 0.0 }
 0x42b   : > { %v2999_v6 = vpop.f32.mrf.mxu1 }
 0x42c   : > { %v6843_v57 = vadd.f32 %v6687_v38, %v2999_v6 }
 0x42d   : > { %v2773_v48 = vpop.f32.mrf.mxu2 }
 0x42e   : > { %8162 = vst [vmem:[#allocation96_spill] sm:$0xff] %v6843_v57  ;;  %v2774_v63 = vadd.f32 %v6734_v23, %v2773_v48  ;;  %3150 = vmax.xlane.f32.xlu1 %v6843_v57 }
 0x42f   : > { %v6847_v58 = vpop.f32.mrf.mxu3 }
 0x430   : > { %v2842_v42 = vmax.f32 %v2774_v63, 0.0 }
 0x432   : > { %v2875_v59 = vpack.c.bf16 %v2842_v42, %v2841_v39 }
 0x433   : > { %v3001_v53 = vpop.f32.mrf.mxu1 }
 0x434   : > { %v6850_v61 = vadd.f32 %v6687_v38, %v3001_v53  ;;  %3103 = vmatmul.bf16.gmra.mxu3 %v2875_v59 }
 0x435   : > { %v2776_v46 = vpop.f32.mrf.mxu2 }
 0x436   : > { %3152 = vmax.xlane.f32.xlu2 %v6850_v61  ;;  %v2777_v34 = vadd.f32 %v6734_v23, %v2776_v46 }
 0x437   : > { %v6853_v33 = vpop.f32.mrf.mxu3 }
 0x438   : > { %v2843_v51 = vmax.f32 %v2777_v34, 0.0 }
 0x43b   : > { %v3004_v12 = vpop.f32.mrf.mxu1 }
 0x43c   : > { %v6857_v36 = vadd.f32 %v6687_v38, %v3004_v12 }
 0x43d   : > { %v2778_v41 = vpop.f32.mrf.mxu2 }
 0x43e   : > { %8163 = vst [vmem:[#allocation103_spill] sm:$0xff] %v6857_v36  ;;  %v2779_v10 = vadd.f32 %v6734_v23, %v2778_v41  ;;  %3154 = vmax.xlane.f32.xlu0 %v6857_v36 }
 0x43f   : > { %v6861_v11 = vpop.f32.mrf.mxu3 }
 0x440   : > { %v2844_v45 = vmax.f32 %v2779_v10, 0.0 }
 0x442   : > { %v2876_v2 = vpack.c.bf16 %v2844_v45, %v2843_v51 }
 0x443   : > { %v3006_v9 = vpop.f32.mrf.mxu1 }
 0x444   : > { %v6864_v29 = vadd.f32 %v6687_v38, %v3006_v9  ;;  %3108 = vmatmul.bf16.gmra.mxu3 %v2876_v2  ;;  %v6917_v9 = vadd.f32 %v6687_v38, %v6762_v50  ;;  %v6935_v50 = vadd.f32 %v6687_v38, %v6771_v15  ;;  %v6957_v15 = vadd.f32 %v6687_v38, %v6803_v16 }
 0x445   : > { %v6976_v16 = vadd.f32 %v6687_v38, %v6853_v33 }
 0x446   : > { %8164 = vst [vmem:[#allocation58_spill] sm:$0xff] %v6864_v29  ;;  %3156 = vmax.xlane.f32.xlu1 %v6864_v29 }
 0x447   : > { %v6867_v30 = vpop.f32.mrf.mxu3  ;;  %8170 = vst [vmem:[#allocation157_spill] sm:$0xff] %v6917_v9 }
 0x448   : > { %8173 = vst [vmem:[#allocation5_spill] sm:$0xff] %v6935_v50 }
 0x449   : > { %8177 = vst [vmem:[#allocation81_spill] sm:$0xff] %v6957_v15 }
 0x44a   : > { %8181 = vst [vmem:[#allocation156_spill] sm:$0xff] %v6976_v16 }
 0x44b   : > { %v3009_v44 = vpop.f32.mrf.mxu1 }
 0x44c   : > { %v6870_v1 = vadd.f32 %v6687_v38, %v3009_v44 }
 0x44e   : > { %3158 = vmax.xlane.f32.xlu2 %v6870_v1 }
 0x44f   : > { %v6873_v23 = vpop.f32.mrf.mxu3 }
 0x450   : > { %v6995_v33 = vadd.f32 %v6687_v38, %v6873_v23  ;;  %v7012_v23 = vadd.f32 %v6687_v38, %v6867_v30 }
 0x452   : > { %8186 = vst [vmem:[#allocation70_spill] sm:$0xff] %v6995_v33 }
 0x453   : > { %v3011_v25 = vpop.f32.mrf.mxu1  ;;  %8189 = vst [vmem:[#allocation48_spill] sm:$0xff] %v7012_v23 }
 0x454   : > { %v6876_v24 = vadd.f32 %v6687_v38, %v3011_v25 }
 0x456   : > { %8165 = vst [vmem:[#allocation90_spill] sm:$0xff] %v6876_v24  ;;  %3160 = vmax.xlane.f32.xlu0 %v6876_v24 }
 0x457   : > { %v6879_v5 = vpop.f32.mrf.mxu3 }
 0x45b   : > { %v3014_v40 = vpop.f32.mrf.mxu1 }
 0x45c   : > { %v6882_v3 = vadd.f32 %v6687_v38, %v3014_v40 }
 0x45e   : > { %8166 = vst [vmem:[#allocation149_spill] sm:$0xff] %v6882_v3  ;;  %3162 = vmax.xlane.f32.xlu1 %v6882_v3 }
 0x45f   : > { %v6885_v47 = vpop.f32.mrf.mxu3 }
 0x463   : > { %v3016_v6 = vpop.f32.mrf.mxu1 }
 0x464   : > { %v6888_v49 = vadd.f32 %v6687_v38, %v3016_v6  ;;  %v6928_v6 = vadd.f32 %v6687_v38, %v6787_v28  ;;  %v6946_v28 = vadd.f32 %v6687_v38, %v6810_v60  ;;  %v6965_v60 = vadd.f32 %v6687_v38, %v6819_v62  ;;  %v6982_v62 = vpop.xlane.xlu2 %3114 }
 0x465   : > { %8183 = vst [vmem:[#allocation160_spill] sm:$0xff] %v6982_v62 }
 0x466   : > { %3164 = vmax.xlane.f32.xlu2 %v6888_v49  ;;  %8172 = vst [vmem:[#allocation65_spill] sm:$0xff] %v6928_v6 }
 0x467   : > { %v6891_v48 = vpop.f32.mrf.mxu3  ;;  %8175 = vst [vmem:[#allocation71_spill] sm:$0xff] %v6946_v28 }
 0x468   : > { %8179 = vst [vmem:[#allocation15_spill] sm:$0xff] %v6965_v60 }
 0x46b   : > { %v3019_v63 = vpop.f32.mrf.mxu1 }
 0x46c   : > { %v6894_v39 = vadd.f32 %v6687_v38, %v3019_v63 }
 0x46e   : > { %8167 = vst [vmem:[#allocation6_spill] sm:$0xff] %v6894_v39  ;;  %3166 = vmax.xlane.f32.xlu0 %v6894_v39 }
 0x46f   : > { %v6897_v42 = vpop.f32.mrf.mxu3 }
 0x473   : > { %v3021_v59 = vpop.f32.mrf.mxu1 }
 0x474   : > { %v6900_v53 = vadd.f32 %v6687_v38, %v3021_v59  ;;  %v6942_v59 = vadd.f32 %v6687_v38, %v6778_v54  ;;  %v6961_v54 = vadd.f32 %v6687_v38, %v6833_v17  ;;  %v6980_v17 = vadd.f32 %v6687_v38, %v6839_v19 }
 0x475   : > { %v6999_v19 = vadd.f32 %v6687_v38, %v6861_v11  ;;  %v7016_v11 = vadd.f32 %v6687_v38, %v6891_v48  ;;  %v7033_v48 = vadd.f32 %v6687_v38, %v6885_v47 }
 0x476   : > { %8168 = vst [vmem:[#allocation64_spill] sm:$0xff] %v6900_v53  ;;  %3168 = vmax.xlane.f32.xlu1 %v6900_v53 }
 0x477   : > { %v6903_v46 = vpop.f32.mrf.mxu3  ;;  %8174 = vst [vmem:[#allocation63_spill] sm:$0xff] %v6942_v59 }
 0x478   : > { %8178 = vst [vmem:[#allocation89_spill] sm:$0xff] %v6961_v54 }
 0x479   : > { %8182 = vst [vmem:[#allocation123_spill] sm:$0xff] %v6980_v17 }
 0x47a   : > { %8187 = vst [vmem:[#allocation108_spill] sm:$0xff] %v6999_v19 }
 0x47b   : > { %v3024_v12 = vpop.f32.mrf.mxu1  ;;  %8190 = vst [vmem:[#allocation69_spill] sm:$0xff] %v7016_v11 }
 0x47c   : > { %v6906_v34 = vadd.f32 %v6687_v38, %v3024_v12  ;;  %8193 = vst [vmem:[#allocation20_spill] sm:$0xff] %v7033_v48 }
 0x47e   : > { %3170 = vmax.xlane.f32.xlu2 %v6906_v34 }
 0x47f   : > { %v3086_v41 = vpop.f32.mrf.mxu3 }
 0x483   : > { %v3026_v10 = vpop.f32.mrf.mxu1 }
 0x484   : > { %v6910_v51 = vadd.f32 %v6687_v38, %v3026_v10  ;;  %v6950_v10 = vadd.f32 %v6687_v38, %v6794_v56 }
 0x486   : > { %8169 = vst [vmem:[#allocation78_spill] sm:$0xff] %v6910_v51  ;;  %3172 = vmax.xlane.f32.xlu0 %v6910_v51 }
 0x487   : > { %v6913_v45 = vpop.f32.mrf.mxu3  ;;  %8176 = vst [vmem:[#allocation101_spill] sm:$0xff] %v6950_v10 }
 0x48b   : > { %v3029_v2 = vpop.f32.mrf.mxu1 }
 0x48c   : > { %v6920_v44 = vadd.f32 %v6687_v38, %v3029_v2  ;;  %v6972_v2 = vadd.f32 %v6687_v38, %v6825_v7  ;;  %v6991_v7 = vadd.f32 %v6687_v38, %v6847_v58 }
 0x48e   : > { %8171 = vst [vmem:[#allocation102_spill] sm:$0xff] %v6920_v44  ;;  %3178 = vmax.xlane.f32.xlu0 %v6917_v9  ;;  %3174 = vmax.xlane.f32.xlu1 %v6920_v44 }
 0x48f   : > { %v6924_v25 = vpop.f32.mrf.mxu3  ;;  %8180 = vst [vmem:[#allocation16_spill] sm:$0xff] %v6972_v2 }
 0x490   : > { %8185 = vst [vmem:[#allocation122_spill] sm:$0xff] %v6991_v7 }
 0x493   : > { %v3031_v40 = vpop.f32.mrf.mxu1 }
 0x494   : > { %v6931_v63 = vadd.f32 %v6687_v38, %v3031_v40 }
 0x496   : > { %3184 = vmax.xlane.f32.xlu0 %v6928_v6  ;;  %3176 = vmax.xlane.f32.xlu2 %v6931_v63 }
 0x497   : > { %3180 = vmax.xlane.f32.xlu1 %v6935_v50  ;;  %v3094_v12 = vpop.f32.mrf.mxu3 }
 0x49e   : > { %3190 = vmax.xlane.f32.xlu0 %v6946_v28  ;;  %3182 = vmax.xlane.f32.xlu2 %v6942_v59  ;;  %v7036_v28 = vadd.f32 %v6687_v38, %v3086_v41  ;;  %v7053_v41 = vadd.f32 %v6687_v38, %v6903_v46 }
 0x49f   : > { %3186 = vmax.xlane.f32.xlu1 %v6950_v10  ;;  %v3096_v56 = vpop.f32.mrf.mxu3 }
 0x4a0   : > { %8194 = vst [vmem:[#allocation37_spill] sm:$0xff] %v7036_v28  ;;  %v7079_v10 = vadd.f32 %v6687_v38, %v3096_v56 }
 0x4a1   : > { %8197 = vst [vmem:[#allocation152_spill] sm:$0xff] %v7053_v41 }
 0x4a2   : > { %8203 = vst [vmem:[#allocation8_spill] sm:$0xff] %v7079_v10 }
 0x4a6   : > { %3196 = vmax.xlane.f32.xlu0 %v6961_v54  ;;  %3188 = vmax.xlane.f32.xlu2 %v6957_v15  ;;  %v6987_v54 = vpop.xlane.xlu0 %3116 }
 0x4a7   : > { %3192 = vmax.xlane.f32.xlu1 %v6965_v60  ;;  %v3099_v40 = vpop.f32.mrf.mxu3  ;;  %8184 = vst [vmem:[#allocation107_spill] sm:$0xff] %v6987_v54 }
 0x4a8   : > { %v7093_v56 = vadd.f32 %v6687_v38, %v3099_v40 }
 0x4aa   : > { %8205 = vst [vmem:[#allocation153_spill] sm:$0xff] %v7093_v56 }
 0x4ae   : > { %3202 = vmax.xlane.f32.xlu0 %v6976_v16  ;;  %3194 = vmax.xlane.f32.xlu2 %v6972_v2  ;;  %v7001_v16 = vpop.xlane.xlu2 %3120  ;;  %v7008_v58 = vpop.xlane.xlu0 %3124  ;;  %v7056_v2 = vadd.f32 %v6687_v38, %v3094_v12  ;;  %v7073_v12 = vadd.f32 %v6687_v38, %v6924_v25 }
 0x4af   : > { %3198 = vmax.xlane.f32.xlu1 %v6980_v17  ;;  %v7006_v17 = vpop.xlane.xlu1 %3118  ;;  %8188 = vst [vmem:[#allocation34_spill] sm:$0xff] %v7008_v58  ;;  %v3101_v60 = vpop.f32.mrf.mxu3 }
 0x4b0   : > { %8198 = vst [vmem:[#allocation112_spill] sm:$0xff] %v7056_v2  ;;  %v3244_v40 = vsub.f32 %v6723_v35, %v7006_v17 }
 0x4b1   : > { %8201 = vst [vmem:[#allocation95_spill] sm:$0xff] %v7073_v12 }
 0x4b6   : > { %3208 = vmax.xlane.f32.xlu0 %v6995_v33  ;;  %3200 = vmax.xlane.f32.xlu2 %v6991_v7  ;;  %v7020_v33 = vadd.f32 %v6687_v38, %v6879_v5  ;;  %v7029_v30 = vpop.xlane.xlu0 %3130 }
 0x4b7   : > { %3204 = vmax.xlane.f32.xlu1 %v6999_v19  ;;  %v7025_v19 = vpop.xlane.xlu2 %3122  ;;  %v7027_v7 = vpop.xlane.xlu1 %3126  ;;  %8192 = vst [vmem:[#allocation126_spill] sm:$0xff] %v7029_v30 }
 0x4b8   : > { %8191 = vst [vmem:[#allocation91_spill] sm:$0xff] %v7020_v33  ;;  %v3104_v5 = vpop.f32.mrf.mxu3 }
 0x4be   : > { %3214 = vmax.xlane.f32.xlu0 %v7016_v11  ;;  %3206 = vmax.xlane.f32.xlu2 %v7012_v23  ;;  %v7040_v11 = vadd.f32 %v6687_v38, %v6897_v42  ;;  %v7049_v47 = vpop.xlane.xlu0 %3136  ;;  %v7060_v42 = vadd.f32 %v6687_v38, %v6913_v45  ;;  %v7076_v45 = vadd.f32 %v6687_v38, %v3101_v60 }
 0x4bf   : > { %3210 = vmax.xlane.f32.xlu1 %v7020_v33  ;;  %v7045_v33 = vpop.xlane.xlu2 %3128  ;;  %v7047_v23 = vpop.xlane.xlu1 %3132  ;;  %8196 = vst [vmem:[#allocation92_spill] sm:$0xff] %v7049_v47 }
 0x4c0   : > { %8195 = vst [vmem:[#allocation159_spill] sm:$0xff] %v7040_v11 }
 0x4c1   : > { %8199 = vst [vmem:[#allocation7_spill] sm:$0xff] %v7060_v42 }
 0x4c2   : > { %8202 = vst [vmem:[#allocation115_spill] sm:$0xff] %v7076_v45 }
 0x4c6   : > { %3220 = vmax.xlane.f32.xlu0 %v7036_v28  ;;  %3212 = vmax.xlane.f32.xlu2 %v7033_v48  ;;  %v3106_v28 = vpop.f32.mrf.mxu3  ;;  %v7069_v46 = vpop.xlane.xlu0 %3142 }
 0x4c7   : > { %3216 = vmax.xlane.f32.xlu1 %v7040_v11  ;;  %v7065_v11 = vpop.xlane.xlu2 %3134  ;;  %v7067_v48 = vpop.xlane.xlu1 %3138  ;;  %8200 = vst [vmem:[#allocation47_spill] sm:$0xff] %v7069_v46 }
 0x4ce   : > { %3226 = vmax.xlane.f32.xlu0 %v7056_v2  ;;  %3218 = vmax.xlane.f32.xlu2 %v7053_v41  ;;  %v3243_v2 = vsub.f32 %v6704_v14, %v6987_v54  ;;  %v3109_v41 = vpop.f32.mrf.mxu3  ;;  %v7090_v6 = vpop.xlane.xlu0 %3148  ;;  %v3310_v54 = vmul.f32 1.442695, %v3244_v40 }
 0x4cf   : > { %3222 = vmax.xlane.f32.xlu1 %v7060_v42  ;;  %v7086_v42 = vpop.xlane.xlu2 %3140  ;;  %v7088_v25 = vpop.xlane.xlu1 %3144  ;;  %8204 = vst [vmem:[#allocation50_spill] sm:$0xff] %v7090_v6 }
 0x4d0   : > { %v3308_v60 = vmul.f32 1.442695, %v3243_v2  ;;  %v3246_v2 = vsub.f32 %v6741_v22, %v7025_v19 }
 0x4d2   : > { %4237 = vpow2.f32 %v3308_v60  ;;  %v7117_v60 = vadd.f32 %v6687_v38, %v3106_v28  ;;  %v3247_v28 = vsub.f32 %v6746_v20, %v7008_v58 }
 0x4d4   : > { %8209 = vst [vmem:[#allocation19_spill] sm:$0xff] %v7117_v60 }
 0x4d6   : > { %3232 = vmax.xlane.f32.xlu0 %v7076_v45  ;;  %3224 = vmax.xlane.f32.xlu2 %v7073_v12  ;;  %v7096_v45 = vadd.f32 %v6687_v38, %v3109_v41  ;;  %v7099_v12 = vadd.f32 %v6687_v38, %v3104_v5  ;;  %v7114_v14 = vpop.xlane.xlu0 %3154 }
 0x4d7   : > { %3228 = vmax.xlane.f32.xlu1 %v7079_v10  ;;  %v3242_v10 = vsub.f32 %v6696_v0, %v6982_v62  ;;  %v7110_v41 = vpop.xlane.xlu2 %3146  ;;  %v7112_v5 = vpop.xlane.xlu1 %3150  ;;  %8208 = vst [vmem:[#allocation125_spill] sm:$0xff] %v7114_v14 }
 0x4d8   : > { %8206 = vst [vmem:[#allocation83_spill] sm:$0xff] %v7096_v45  ;;  %v3111_v62 = vpop.f32.mrf.mxu3 }
 0x4d9   : > { %8207 = vst [vmem:[#allocation163_spill] sm:$0xff] %v7099_v12  ;;  %v3306_v0 = vmul.f32 1.442695, %v3242_v10  ;;  %v7120_v22 = vadd.f32 %v6687_v38, %v3111_v62  ;;  %v3249_v10 = vsub.f32 %v6758_v8, %v7045_v33 }
 0x4db   : > { %8210 = vst [vmem:[#allocation51_spill] sm:$0xff] %v7120_v22  ;;  %4239 = vpow2.f32 %v3306_v0 }
 0x4de   : > { %3238 = vmax.xlane.f32.xlu0 %v7096_v45  ;;  %3230 = vmax.xlane.f32.xlu2 %v7093_v56  ;;  %v3314_v45 = vmul.f32 1.442695, %v3246_v2  ;;  %v4238_v56 = vpop.eup %4237  ;;  %v7134_v0 = vpop.xlane.xlu0 %3160 }
 0x4df   : > { %3234 = vmax.xlane.f32.xlu1 %v7099_v12  ;;  %v3245_v12 = vsub.f32 %v6729_v13, %v7001_v16  ;;  %v7130_v2 = vpop.xlane.xlu2 %3152  ;;  %v7132_v38 = vpop.xlane.xlu1 %3156  ;;  %8211 = vst [vmem:[#allocation21_spill] sm:$0xff] %v7134_v0 }
 0x4e0   : > { %4241 = vpow2.f32 %v3314_v45 }
 0x4e1   : > { %4243 = vpow2.f32 %v3310_v54  ;;  %v3312_v62 = vmul.f32 1.442695, %v3245_v12  ;;  %v4240_v40 = vpop.eup %4239  ;;  %v3252_v54 = vsub.f32 %v6783_v26, %v7065_v11  ;;  %v3250_v12 = vsub.f32 %v6767_v32, %v7029_v30 }
 0x4e3   : > { %4245 = vpow2.f32 %v3312_v62  ;;  %v3326_v58 = vmul.f32 1.442695, %v3252_v54 }
 0x4e6   : > { %3436 = vadd.xlane.f32.xlu0 %v4238_v56  ;;  %3236 = vmax.xlane.f32.xlu2 %v7117_v60  ;;  %v3320_v56 = vmul.f32 1.442695, %v3249_v10  ;;  %v3316_v60 = vmul.f32 1.442695, %v3247_v28  ;;  %v4242_v45 = vpop.eup %4241  ;;  %v7146_v20 = vpop.xlane.xlu0 %3166 }
 0x4e7   : > { %3240 = vmax.xlane.f32.xlu1 %v7120_v22  ;;  %v4244_v13 = vpop.eup %4243  ;;  %v3248_v22 = vsub.f32 %v6753_v27, %v7027_v7  ;;  %v7142_v10 = vpop.xlane.xlu2 %3158  ;;  %8212 = vst [vmem:[#allocation128_spill] sm:$0xff] %v7146_v20 }
 0x4e8   : > { %4247 = vpow2.f32 %v3320_v56  ;;  %v7144_v28 = vpop.xlane.xlu1 %3162 }
 0x4e9   : > { %4249 = vpow2.f32 %v3316_v60  ;;  %v3318_v62 = vmul.f32 1.442695, %v3248_v22  ;;  %v4246_v27 = vpop.eup %4245  ;;  %v3255_v60 = vsub.f32 %v6806_v31, %v7086_v42  ;;  %v3253_v22 = vsub.f32 %v6790_v21, %v7049_v47 }
 0x4eb   : > { %4251 = vpow2.f32 %v3318_v62  ;;  %v3332_v30 = vmul.f32 1.442695, %v3255_v60 }
 0x4ec   : > { %4253 = vpow2.f32 %v3326_v58 }
 0x4ee   : > { %3442 = vadd.xlane.f32.xlu0 %v4242_v45  ;;  %3434 = vadd.xlane.f32.xlu2 %v4240_v40  ;;  %v3322_v45 = vmul.f32 1.442695, %v3250_v12  ;;  %v4248_v40 = vpop.eup %4247 }
 0x4ef   : > { %3438 = vadd.xlane.f32.xlu1 %v4244_v13  ;;  %v4250_v56 = vpop.eup %4249  ;;  %v3251_v13 = vsub.f32 %v6774_v18, %v7047_v23  ;;  %v7154_v54 = vpop.xlane.xlu2 %3164 }
 0x4f0   : > { %4255 = vpow2.f32 %v3322_v45  ;;  %v7156_v12 = vpop.xlane.xlu1 %3168  ;;  %v3258_v45 = vsub.f32 %v6829_v43, %v7110_v41 }
 0x4f1   : > { %v3324_v62 = vmul.f32 1.442695, %v3251_v13  ;;  %v4252_v18 = vpop.eup %4251  ;;  %v3256_v13 = vsub.f32 %v6815_v52, %v7069_v46 }
 0x4f2   : > { %v3338_v47 = vmul.f32 1.442695, %v3258_v45 }
 0x4f3   : > { %4257 = vpow2.f32 %v3324_v62 }
 0x4f4   : > { %4259 = vpow2.f32 %v3332_v30 }
 0x4f6   : > { %3448 = vadd.xlane.f32.xlu0 %v4248_v40  ;;  %3440 = vadd.xlane.f32.xlu2 %v4246_v27  ;;  %v3328_v40 = vmul.f32 1.442695, %v3253_v22  ;;  %v4254_v27 = vpop.eup %4253 }
 0x4f7   : > { %3444 = vadd.xlane.f32.xlu1 %v4250_v56  ;;  %v4256_v58 = vpop.eup %4255  ;;  %v3254_v56 = vsub.f32 %v6799_v37, %v7067_v48  ;;  %v7166_v60 = vpop.xlane.xlu2 %3170 }
 0x4f8   : > { %4261 = vpow2.f32 %v3328_v40  ;;  %v3261_v40 = vsub.f32 %v6850_v61, %v7130_v2 }
 0x4f9   : > { %v7158_v32 = vpop.xlane.xlu0 %3172  ;;  %v3330_v62 = vmul.f32 1.442695, %v3254_v56  ;;  %v4258_v37 = vpop.eup %4257  ;;  %v3259_v56 = vsub.f32 %v6836_v4, %v7090_v6 }
 0x4fa   : > { %8213 = vst [vmem:[#allocation24_spill] sm:$0xff] %v7158_v32  ;;  %v3344_v46 = vmul.f32 1.442695, %v3261_v40 }
 0x4fb   : > { %4263 = vpow2.f32 %v3330_v62 }
 0x4fc   : > { %4265 = vpow2.f32 %v3338_v47 }
 0x4fe   : > { %3454 = vadd.xlane.f32.xlu0 %v4254_v27  ;;  %3446 = vadd.xlane.f32.xlu2 %v4252_v18  ;;  %v3334_v27 = vmul.f32 1.442695, %v3256_v13  ;;  %v4260_v18 = vpop.eup %4259 }
 0x4ff   : > { %3450 = vadd.xlane.f32.xlu1 %v4256_v58  ;;  %v4262_v30 = vpop.eup %4261  ;;  %v3257_v58 = vsub.f32 %v6822_v55, %v7088_v25 }
 0x500   : > { %4267 = vpow2.f32 %v3334_v27  ;;  %v3264_v27 = vsub.f32 %v6870_v1, %v7142_v10 }
 0x501   : > { %v7168_v22 = vpop.xlane.xlu0 %3178  ;;  %v7170_v21 = vpop.xlane.xlu1 %3174  ;;  %v3336_v52 = vmul.f32 1.442695, %v3257_v58  ;;  %v3262_v58 = vsub.f32 %v6857_v36, %v7114_v14 }
 0x502   : > { %8214 = vst [vmem:[#allocation54_spill] sm:$0xff] %v7168_v22  ;;  %v4264_v55 = vpop.eup %4263  ;;  %v3350_v6 = vmul.f32 1.442695, %v3264_v27 }
 0x503   : > { %4269 = vpow2.f32 %v3336_v52 }
 0x504   : > { %4271 = vpow2.f32 %v3344_v46 }
 0x506   : > { %3460 = vadd.xlane.f32.xlu0 %v4260_v18  ;;  %3452 = vadd.xlane.f32.xlu2 %v4258_v37  ;;  %v3340_v18 = vmul.f32 1.442695, %v3259_v56  ;;  %v4266_v37 = vpop.eup %4265 }
 0x507   : > { %3456 = vadd.xlane.f32.xlu1 %v4262_v30  ;;  %v4268_v47 = vpop.eup %4267  ;;  %v3260_v30 = vsub.f32 %v6843_v57, %v7112_v5 }
 0x508   : > { %4273 = vpow2.f32 %v3340_v18  ;;  %v3267_v18 = vsub.f32 %v6888_v49, %v7154_v54 }
 0x509   : > { %v7178_v45 = vpop.xlane.xlu0 %3184  ;;  %v7180_v13 = vpop.xlane.xlu2 %3176  ;;  %v3342_v4 = vmul.f32 1.442695, %v3260_v30  ;;  %v3265_v30 = vsub.f32 %v6876_v24, %v7134_v0 }
 0x50a   : > { %8215 = vst [vmem:[#allocation162_spill] sm:$0xff] %v7178_v45  ;;  %v7182_v62 = vpop.xlane.xlu1 %3180  ;;  %v4270_v57 = vpop.eup %4269  ;;  %v3356_v14 = vmul.f32 1.442695, %v3267_v18 }
 0x50b   : > { %8216 = vst [vmem:[#allocation85_spill] sm:$0xff] %v7182_v62  ;;  %4275 = vpow2.f32 %v3342_v4 }
 0x50c   : > { %4277 = vpow2.f32 %v3350_v6 }
 0x50e   : > { %3466 = vadd.xlane.f32.xlu0 %v4266_v37  ;;  %3458 = vadd.xlane.f32.xlu2 %v4264_v55  ;;  %v3346_v37 = vmul.f32 1.442695, %v3262_v58  ;;  %v4272_v55 = vpop.eup %4271 }
 0x50f   : > { %3462 = vadd.xlane.f32.xlu1 %v4268_v47  ;;  %v4274_v46 = vpop.eup %4273  ;;  %v3263_v47 = vsub.f32 %v6864_v29, %v7132_v38 }
 0x510   : > { %4279 = vpow2.f32 %v3346_v37  ;;  %v3270_v37 = vsub.f32 %v6906_v34, %v7166_v60 }
 0x511   : > { %v7190_v40 = vpop.xlane.xlu0 %3190  ;;  %v7192_v56 = vpop.xlane.xlu2 %3182  ;;  %v3348_v36 = vmul.f32 1.442695, %v3263_v47  ;;  %v3268_v47 = vsub.f32 %v6894_v39, %v7146_v20 }
 0x512   : > { %8217 = vst [vmem:[#allocation166_spill] sm:$0xff] %v7190_v40  ;;  %v7194_v52 = vpop.xlane.xlu1 %3186  ;;  %v4276_v29 = vpop.eup %4275  ;;  %v3362_v0 = vmul.f32 1.442695, %v3270_v37 }
 0x513   : > { %8218 = vst [vmem:[#allocation129_spill] sm:$0xff] %v7194_v52  ;;  %4281 = vpow2.f32 %v3348_v36 }
 0x514   : > { %4283 = vpow2.f32 %v3356_v14 }
 0x516   : > { %3472 = vadd.xlane.f32.xlu0 %v4272_v55  ;;  %3464 = vadd.xlane.f32.xlu2 %v4270_v57  ;;  %v3352_v55 = vmul.f32 1.442695, %v3265_v30  ;;  %v4278_v57 = vpop.eup %4277 }
 0x517   : > { %3468 = vadd.xlane.f32.xlu1 %v4274_v46  ;;  %v4280_v6 = vpop.eup %4279  ;;  %v3266_v46 = vsub.f32 %v6882_v3, %v7144_v28 }
 0x518   : > { %4285 = vpow2.f32 %v3352_v55  ;;  %v3273_v55 = vsub.f32 %v6931_v63, %v7180_v13 }
 0x519   : > { %v7202_v27 = vpop.xlane.xlu0 %3196  ;;  %v7204_v58 = vpop.xlane.xlu2 %3188  ;;  %v3354_v24 = vmul.f32 1.442695, %v3266_v46  ;;  %v3271_v46 = vsub.f32 %v6910_v51, %v7158_v32 }
 0x51a   : > { %8219 = vst [vmem:[#allocation23_spill] sm:$0xff] %v7202_v27  ;;  %v7206_v4 = vpop.xlane.xlu1 %3192  ;;  %v4282_v3 = vpop.eup %4281  ;;  %v3368_v20 = vmul.f32 1.442695, %v3273_v55 }
 0x51b   : > { %8220 = vst [vmem:[#allocation40_spill] sm:$0xff] %v7204_v58  ;;  %4287 = vpow2.f32 %v3354_v24 }
 0x51c   : > { %8221 = vst [vmem:[#allocation99_spill] sm:$0xff] %v7206_v4  ;;  %4289 = vpow2.f32 %v3362_v0 }
 0x51e   : > { %3478 = vadd.xlane.f32.xlu0 %v4278_v57  ;;  %3470 = vadd.xlane.f32.xlu2 %v4276_v29  ;;  %v3358_v57 = vmul.f32 1.442695, %v3268_v47  ;;  %v4284_v29 = vpop.eup %4283 }
 0x51f   : > { %3474 = vadd.xlane.f32.xlu1 %v4280_v6  ;;  %v4286_v14 = vpop.eup %4285  ;;  %v3269_v6 = vsub.f32 %v6900_v53, %v7156_v12 }
 0x520   : > { %4291 = vpow2.f32 %v3358_v57  ;;  %v3276_v57 = vsub.f32 %v6942_v59, %v7192_v56 }
 0x521   : > { %v7214_v18 = vpop.xlane.xlu0 %3202  ;;  %v7216_v30 = vpop.xlane.xlu2 %3194  ;;  %v3360_v39 = vmul.f32 1.442695, %v3269_v6  ;;  %v3274_v6 = vsub.f32 %v6917_v9, %v7168_v22 }
 0x522   : > { %8222 = vst [vmem:[#allocation132_spill] sm:$0xff] %v7214_v18  ;;  %v7218_v36 = vpop.xlane.xlu1 %3198  ;;  %v4288_v53 = vpop.eup %4287  ;;  %v3374_v32 = vmul.f32 1.442695, %v3276_v57 }
 0x523   : > { %8223 = vst [vmem:[#allocation29_spill] sm:$0xff] %v7216_v30  ;;  %4293 = vpow2.f32 %v3360_v39 }
 0x524   : > { %8224 = vst [vmem:[#allocation43_spill] sm:$0xff] %v7218_v36  ;;  %4295 = vpow2.f32 %v3368_v20 }
 0x526   : > { %3484 = vadd.xlane.f32.xlu0 %v4284_v29  ;;  %3476 = vadd.xlane.f32.xlu2 %v4282_v3  ;;  %v3364_v29 = vmul.f32 1.442695, %v3271_v46  ;;  %v4290_v3 = vpop.eup %4289 }
 0x527   : > { %3480 = vadd.xlane.f32.xlu1 %v4286_v14  ;;  %v4292_v0 = vpop.eup %4291  ;;  %v3272_v14 = vsub.f32 %v6920_v44, %v7170_v21 }
 0x528   : > { %4297 = vpow2.f32 %v3364_v29  ;;  %v3279_v29 = vsub.f32 %v6957_v15, %v7204_v58  ;;  %v8234_v15 = vld [vmem:[#allocation101_spill] sm:$0xff] }
 0x529   : > { %v7226_v37 = vpop.xlane.xlu0 %3208  ;;  %v7228_v47 = vpop.xlane.xlu2 %3200  ;;  %v3366_v51 = vmul.f32 1.442695, %v3272_v14  ;;  %v8230_v14 = vld [vmem:[#allocation65_spill] sm:$0xff] }
 0x52a   : > { %8225 = vst [vmem:[#allocation165_spill] sm:$0xff] %v7226_v37  ;;  %v7230_v24 = vpop.xlane.xlu1 %3204  ;;  %v4294_v44 = vpop.eup %4293  ;;  %v3277_v9 = vsub.f32 %v8230_v14, %v7178_v45  ;;  %v3380_v59 = vmul.f32 1.442695, %v3279_v29 }
 0x52b   : > { %8226 = vst [vmem:[#allocation100_spill] sm:$0xff] %v7228_v47  ;;  %4299 = vpow2.f32 %v3366_v51 }
 0x52c   : > { %8227 = vst [vmem:[#allocation155_spill] sm:$0xff] %v7230_v24  ;;  %4301 = vpow2.f32 %v3374_v32 }
 0x52e   : > { %3490 = vadd.xlane.f32.xlu0 %v4290_v3  ;;  %3482 = vadd.xlane.f32.xlu2 %v4288_v53  ;;  %v3370_v3 = vmul.f32 1.442695, %v3274_v6  ;;  %v4296_v53 = vpop.eup %4295 }
 0x52f   : > { %3486 = vadd.xlane.f32.xlu1 %v4292_v0  ;;  %v4298_v20 = vpop.eup %4297  ;;  %v3275_v0 = vsub.f32 %v6935_v50, %v7182_v62 }
 0x530   : > { %4303 = vpow2.f32 %v3370_v3  ;;  %v8235_v3 = vld [vmem:[#allocation16_spill] sm:$0xff] }
 0x531   : > { %v7238_v55 = vpop.xlane.xlu0 %3214  ;;  %v7240_v46 = vpop.xlane.xlu2 %3206  ;;  %v3372_v22 = vmul.f32 1.442695, %v3275_v0  ;;  %v3282_v14 = vsub.f32 %v8235_v3, %v7216_v30  ;;  %v8236_v0 = vld [vmem:[#allocation71_spill] sm:$0xff] }
 0x532   : > { %8228 = vst [vmem:[#allocation118_spill] sm:$0xff] %v7240_v46  ;;  %v7242_v39 = vpop.xlane.xlu1 %3210  ;;  %v4300_v50 = vpop.eup %4299  ;;  %v3280_v45 = vsub.f32 %v8236_v0, %v7190_v40  ;;  %v8238_v3 = vld [vmem:[#allocation15_spill] sm:$0xff] }
 0x533   : > { %8229 = vst [vmem:[#allocation11_spill] sm:$0xff] %v7242_v39  ;;  %4305 = vpow2.f32 %v3372_v22  ;;  %v3386_v58 = vmul.f32 1.442695, %v3282_v14 }
 0x534   : > { %4307 = vpow2.f32 %v3380_v59 }
 0x536   : > { %3496 = vadd.xlane.f32.xlu0 %v4296_v53  ;;  %3488 = vadd.xlane.f32.xlu2 %v4294_v44  ;;  %v3376_v53 = vmul.f32 1.442695, %v3277_v9  ;;  %v4302_v44 = vpop.eup %4301 }
 0x537   : > { %3492 = vadd.xlane.f32.xlu1 %v4298_v20  ;;  %v4304_v32 = vpop.eup %4303  ;;  %v3278_v20 = vsub.f32 %v8234_v15, %v7194_v52 }
 0x538   : > { %4309 = vpow2.f32 %v3376_v53  ;;  %v8239_v53 = vld [vmem:[#allocation122_spill] sm:$0xff] }
 0x539   : > { %v7250_v57 = vpop.xlane.xlu0 %3220  ;;  %v7252_v6 = vpop.xlane.xlu2 %3212  ;;  %v3378_v62 = vmul.f32 1.442695, %v3278_v20  ;;  %v3285_v0 = vsub.f32 %v8239_v53, %v7228_v47  ;;  %v8240_v20 = vld [vmem:[#allocation89_spill] sm:$0xff]  ;;  %v8241_v53 = vld [vmem:[#allocation123_spill] sm:$0xff] }
 0x53a   : > { %8231 = vst [vmem:[#allocation53_spill] sm:$0xff] %v7250_v57  ;;  %v7254_v51 = vpop.xlane.xlu1 %3216  ;;  %v4306_v15 = vpop.eup %4305  ;;  %v3283_v40 = vsub.f32 %v8240_v20, %v7202_v27 }
 0x53b   : > { %8232 = vst [vmem:[#allocation106_spill] sm:$0xff] %v7252_v6  ;;  %4311 = vpow2.f32 %v3378_v62  ;;  %v3392_v30 = vmul.f32 1.442695, %v3285_v0 }
 0x53c   : > { %8233 = vst [vmem:[#allocation131_spill] sm:$0xff] %v7254_v51  ;;  %4313 = vpow2.f32 %v3386_v58 }
 0x53e   : > { %3502 = vadd.xlane.f32.xlu0 %v4302_v44  ;;  %3494 = vadd.xlane.f32.xlu2 %v4300_v50  ;;  %v3382_v44 = vmul.f32 1.442695, %v3280_v45  ;;  %v4308_v50 = vpop.eup %4307 }
 0x53f   : > { %3498 = vadd.xlane.f32.xlu1 %v4304_v32  ;;  %v4310_v59 = vpop.eup %4309  ;;  %v3281_v32 = vsub.f32 %v8238_v3, %v7206_v4 }
 0x540   : > { %4315 = vpow2.f32 %v3382_v44  ;;  %v8242_v44 = vld [vmem:[#allocation48_spill] sm:$0xff] }
 0x541   : > { %v7262_v29 = vpop.xlane.xlu0 %3226  ;;  %v7264_v9 = vpop.xlane.xlu2 %3218  ;;  %v3384_v52 = vmul.f32 1.442695, %v3281_v32  ;;  %v3288_v20 = vsub.f32 %v8242_v44, %v7240_v46  ;;  %v8243_v32 = vld [vmem:[#allocation156_spill] sm:$0xff] }
 0x542   : > { %8237 = vst [vmem:[#allocation14_spill] sm:$0xff] %v7264_v9  ;;  %v7266_v22 = vpop.xlane.xlu1 %3222  ;;  %v4312_v3 = vpop.eup %4311  ;;  %v3286_v27 = vsub.f32 %v8243_v32, %v7214_v18  ;;  %v8244_v44 = vld [vmem:[#allocation108_spill] sm:$0xff] }
 0x543   : > { %4317 = vpow2.f32 %v3384_v52  ;;  %v3398_v47 = vmul.f32 1.442695, %v3288_v20 }
 0x544   : > { %4319 = vpow2.f32 %v3392_v30 }
 0x546   : > { %3508 = vadd.xlane.f32.xlu0 %v4308_v50  ;;  %3500 = vadd.xlane.f32.xlu2 %v4306_v15  ;;  %v3388_v50 = vmul.f32 1.442695, %v3283_v40  ;;  %v4314_v15 = vpop.eup %4313 }
 0x547   : > { %3504 = vadd.xlane.f32.xlu1 %v4310_v59  ;;  %v4316_v58 = vpop.eup %4315  ;;  %v3284_v59 = vsub.f32 %v8241_v53, %v7218_v36 }
 0x548   : > { %4321 = vpow2.f32 %v3388_v50  ;;  %v8245_v50 = vld [vmem:[#allocation20_spill] sm:$0xff] }
 0x549   : > { %v7274_v14 = vpop.xlane.xlu0 %3232  ;;  %v7276_v45 = vpop.xlane.xlu2 %3224  ;;  %v3390_v4 = vmul.f32 1.442695, %v3284_v59  ;;  %v3291_v32 = vsub.f32 %v8245_v50, %v7252_v6  ;;  %v8246_v59 = vld [vmem:[#allocation70_spill] sm:$0xff] }
 0x54a   : > { %v7278_v62 = vpop.xlane.xlu1 %3228  ;;  %v4318_v53 = vpop.eup %4317  ;;  %v3289_v20 = vsub.f32 %v8246_v59, %v7226_v37  ;;  %v8248_v59 = vld [vmem:[#allocation152_spill] sm:$0xff] }
 0x54b   : > { %4323 = vpow2.f32 %v3390_v4 }
 0x54c   : > { %4325 = vpow2.f32 %v3398_v47  ;;  %v3400_v47 = vmul.f32 1.442695, %v3289_v20 }
 0x54e   : > { %3514 = vadd.xlane.f32.xlu0 %v4314_v15  ;;  %3506 = vadd.xlane.f32.xlu2 %v4312_v3  ;;  %v3394_v15 = vmul.f32 1.442695, %v3286_v27  ;;  %v4320_v3 = vpop.eup %4319 }
 0x54f   : > { %3510 = vadd.xlane.f32.xlu1 %v4316_v58  ;;  %v4322_v30 = vpop.eup %4321  ;;  %v3287_v58 = vsub.f32 %v8244_v44, %v7230_v24  ;;  %v3404_v44 = vmul.f32 1.442695, %v3291_v32  ;;  %v8249_v32 = vld [vmem:[#allocation69_spill] sm:$0xff] }
 0x550   : > { %4327 = vpow2.f32 %v3394_v15  ;;  %v3292_v37 = vsub.f32 %v8249_v32, %v7238_v55  ;;  %v8252_v32 = vld [vmem:[#allocation159_spill] sm:$0xff] }
 0x551   : > { %v7286_v0 = vpop.xlane.xlu0 %3238  ;;  %v7288_v40 = vpop.xlane.xlu2 %3230  ;;  %v3396_v36 = vmul.f32 1.442695, %v3287_v58  ;;  %v3294_v58 = vsub.f32 %v8248_v59, %v7264_v9 }
 0x552   : > { %v7290_v52 = vpop.xlane.xlu1 %3234  ;;  %v3406_v59 = vmul.f32 1.442695, %v3292_v37 }
 0x556   : > { %3520 = vadd.xlane.f32.xlu0 %v4320_v3  ;;  %3512 = vadd.xlane.f32.xlu2 %v4318_v53  ;;  %v4324_v53 = vpop.eup %4323 }
 0x557   : > { %3516 = vadd.xlane.f32.xlu1 %v4322_v30  ;;  %v4326_v3 = vpop.eup %4325  ;;  %v8247_v30 = vld [vmem:[#allocation91_spill] sm:$0xff] }
 0x558   : > { %v4328_v24 = vpop.eup %4327  ;;  %v3290_v15 = vsub.f32 %v8247_v30, %v7242_v39 }
 0x559   : > { %v3437_v18 = vpop.xlane.xlu0 %3436  ;;  %v7298_v27 = vpop.xlane.xlu2 %3236 }
 0x55a   : > { %4329 = vlog2.f32 %v3437_v18  ;;  %v7300_v4 = vpop.xlane.xlu1 %3240  ;;  %v3402_v6 = vmul.f32 1.442695, %v3290_v15  ;;  %v8253_v15 = vld [vmem:[#allocation95_spill] sm:$0xff] }
 0x55b   : > { %4331 = vpow2.f32 %v3396_v36 }
 0x55c   : > { %4333 = vpow2.f32 %v3404_v44 }
 0x55d   : > { %4335 = vpow2.f32 %v3400_v47  ;;  %v8251_v47 = vld [vmem:[#allocation10_spill] sm:$0xff] }
 0x55e   : > { %3526 = vadd.xlane.f32.xlu0 %v4326_v3  ;;  %3518 = vadd.xlane.f32.xlu2 %v4324_v53  ;;  %v3410_v3 = vmul.f32 1.442695, %v3294_v58  ;;  %v8250_v53 = vld [vmem:[#allocation107_spill] sm:$0xff]  ;;  %v3297_v58 = vsub.f32 %v8253_v15, %v7276_v45 }
 0x55f   : > { %3522 = vadd.xlane.f32.xlu1 %v4328_v24 }
 0x560   : > { %v4330_v18 = vpop.eup %4329 }
 0x561   : > { %v3565_v20 = vmul.f32 0.6931472, %v4330_v18  ;;  %v3443_v36 = vpop.xlane.xlu0 %3442  ;;  %v3435_v50 = vpop.xlane.xlu2 %3434  ;;  %v3293_v18 = vsub.f32 %v8252_v32, %v7254_v51 }
 0x562   : > { %4337 = vlog2.f32 %v3443_v36  ;;  %v3439_v30 = vpop.xlane.xlu1 %3438  ;;  %v4332_v39 = vpop.eup %4331 }
 0x563   : > { %v3691_v44 = vadd.f32 %v3565_v20, %v8250_v53  ;;  %4339 = vlog2.f32 %v3435_v50  ;;  %v4334_v24 = vpop.eup %4333  ;;  %v8254_v50 = vld [vmem:[#allocation37_spill] sm:$0xff] }
 0x564   : > { %4341 = vlog2.f32 %v3439_v30  ;;  %v4336_v46 = vpop.eup %4335  ;;  %v3295_v30 = vsub.f32 %v8254_v50, %v7250_v57 }
 0x565   : > { %v3755_v9 = vsub.f32 %v8251_v47, %v3691_v44  ;;  %4343 = vpow2.f32 %v3402_v6  ;;  %v3416_v47 = vmul.f32 1.442695, %v3297_v58  ;;  %v8257_v58 = vld [vmem:[#allocation7_spill] sm:$0xff] }
 0x566   : > { %3532 = vadd.xlane.f32.xlu0 %v4334_v24  ;;  %3524 = vadd.xlane.f32.xlu2 %v4332_v39  ;;  %4345 = vpow2.f32 %v3410_v3  ;;  %v3408_v39 = vmul.f32 1.442695, %v3293_v18 }
 0x567   : > { %3819 = vst [vmem:[%s7317_s17 + $0x8] sm:$0xff] %v3755_v9  ;;  %3528 = vadd.xlane.f32.xlu1 %v4336_v46  ;;  %4347 = vpow2.f32 %v3406_v59  ;;  %v3412_v9 = vmul.f32 1.442695, %v3295_v30  ;;  %v8255_v59 = vld [vmem:[#allocation160_spill] sm:$0xff]  ;;  %v8259_v30 = vld [vmem:[#allocation153_spill] sm:$0xff] }
 0x568   : > { %v4338_v37 = vpop.eup %4337 }
 0x569   : > { %v4340_v6 = vpop.eup %4339  ;;  %v3571_v20 = vmul.f32 0.6931472, %v4338_v37  ;;  %v3449_v36 = vpop.xlane.xlu0 %3448  ;;  %v8256_v37 = vld [vmem:[#allocation94_spill] sm:$0xff] }
 0x56a   : > { %v3441_v53 = vpop.xlane.xlu2 %3440  ;;  %v4342_v44 = vpop.eup %4341  ;;  %v3563_v3 = vmul.f32 0.6931472, %v4340_v6  ;;  %4349 = vlog2.f32 %v3449_v36 }
 0x56b   : > { %v3445_v24 = vpop.xlane.xlu1 %3444  ;;  %v3694_v32 = vadd.f32 %v3571_v20, %v7025_v19  ;;  %v3567_v15 = vmul.f32 0.6931472, %v4342_v44  ;;  %4351 = vlog2.f32 %v3441_v53  ;;  %v4344_v46 = vpop.eup %4343  ;;  %v3296_v19 = vsub.f32 %v8257_v58, %v7266_v22  ;;  %v8258_v20 = vld [vmem:[#allocation13_spill] sm:$0xff] }
 0x56c   : > { %v3690_v51 = vadd.f32 %v3563_v3, %v8255_v59  ;;  %4353 = vlog2.f32 %v3445_v24  ;;  %v4346_v50 = vpop.eup %4345  ;;  %v3300_v53 = vsub.f32 %v8259_v30, %v7288_v40 }
 0x56d   : > { %v3758_v57 = vsub.f32 %v8256_v37, %v3694_v32  ;;  %v3692_v18 = vadd.f32 %v3567_v15, %v7006_v17  ;;  %v4348_v6 = vpop.eup %4347  ;;  %4355 = vpow2.f32 %v3408_v39  ;;  %v8260_v17 = vld [vmem:[#allocation112_spill] sm:$0xff] }
 0x56e   : > { %v3754_v36 = vsub.f32 %v8258_v20, %v3690_v51  ;;  %3538 = vadd.xlane.f32.xlu0 %v4346_v50  ;;  %3530 = vadd.xlane.f32.xlu2 %v4344_v46  ;;  %4357 = vpow2.f32 %v3416_v47  ;;  %v3298_v15 = vsub.f32 %v8260_v17, %v7262_v29  ;;  %v3414_v47 = vmul.f32 1.442695, %v3296_v19 }
 0x56f   : > { %3822 = vst [vmem:[%s7317_s17 + $0x20] sm:$0xff] %v3758_v57  ;;  %v3756_v32 = vsub.f32 %v6723_v35, %v3692_v18  ;;  %3534 = vadd.xlane.f32.xlu1 %v4348_v6  ;;  %4359 = vpow2.f32 %v3412_v9  ;;  %v3422_v57 = vmul.f32 1.442695, %v3300_v53  ;;  %v8262_v53 = vld [vmem:[#allocation8_spill] sm:$0xff] }
 0x570   : > { %v4350_v44 = vpop.eup %4349  ;;  %3818 = vst [vmem:[%s7317_s17] sm:$0xff] %v3754_v36  ;;  %v3418_v18 = vmul.f32 1.442695, %v3298_v15 }
 0x571   : > { %v4352_v39 = vpop.eup %4351  ;;  %3820 = vst [vmem:[%s7317_s17 + $0x10] sm:$0xff] %v3756_v32  ;;  %v3577_v3 = vmul.f32 0.6931472, %v4350_v44  ;;  %v3455_v51 = vpop.xlane.xlu0 %3454  ;;  %v8261_v32 = vld [vmem:[#allocation34_spill] sm:$0xff] }
 0x572   : > { %v3447_v50 = vpop.xlane.xlu2 %3446  ;;  %v4354_v24 = vpop.eup %4353  ;;  %v3569_v46 = vmul.f32 0.6931472, %v4352_v39  ;;  %4361 = vlog2.f32 %v3455_v51  ;;  %v8263_v39 = vld [vmem:[#allocation93_spill] sm:$0xff]  ;;  %v8265_v51 = vld [vmem:[#allocation86_spill] sm:$0xff] }
 0x573   : > { %v3451_v59 = vpop.xlane.xlu1 %3450  ;;  %v3697_v35 = vadd.f32 %v3577_v3, %v7045_v33  ;;  %v3573_v37 = vmul.f32 0.6931472, %v4354_v24  ;;  %4363 = vlog2.f32 %v3447_v50  ;;  %v4356_v9 = vpop.eup %4355  ;;  %v3299_v33 = vsub.f32 %v8262_v53, %v7278_v62  ;;  %v8266_v24 = vld [vmem:[#allocation115_spill] sm:$0xff] }
 0x574   : > { %v3693_v6 = vadd.f32 %v3569_v46, %v7001_v16  ;;  %4365 = vlog2.f32 %v3451_v59  ;;  %v4358_v20 = vpop.eup %4357  ;;  %v8264_v16 = vld [vmem:[#allocation19_spill] sm:$0xff] }
 0x575   : > { %v3761_v36 = vsub.f32 %v6758_v8, %v3697_v35  ;;  %v3695_v19 = vadd.f32 %v3573_v37, %v8261_v32  ;;  %v4360_v44 = vpop.eup %4359  ;;  %4367 = vpow2.f32 %v3414_v47  ;;  %v3303_v15 = vsub.f32 %v8264_v16, %v7298_v27 }
 0x576   : > { %v3757_v3 = vsub.f32 %v8263_v39, %v3693_v6  ;;  %3544 = vadd.xlane.f32.xlu0 %v4358_v20  ;;  %3536 = vadd.xlane.f32.xlu2 %v4356_v9  ;;  %4369 = vpow2.f32 %v3422_v57  ;;  %v3301_v47 = vsub.f32 %v8266_v24, %v7274_v14  ;;  %v3420_v57 = vmul.f32 1.442695, %v3299_v33 }
 0x577   : > { %3825 = vst [vmem:[%s7317_s17 + $0x38] sm:$0xff] %v3761_v36  ;;  %v3759_v8 = vsub.f32 %v8265_v51, %v3695_v19  ;;  %3540 = vadd.xlane.f32.xlu1 %v4360_v44  ;;  %4371 = vpow2.f32 %v3418_v18  ;;  %v3428_v36 = vmul.f32 1.442695, %v3303_v15  ;;  %v8268_v15 = vld [vmem:[#allocation146_spill] sm:$0xff] }
 0x578   : > { %v4362_v50 = vpop.eup %4361  ;;  %3821 = vst [vmem:[%s7317_s17 + $0x18] sm:$0xff] %v3757_v3  ;;  %v3424_v44 = vmul.f32 1.442695, %v3301_v47 }
 0x579   : > { %v4364_v46 = vpop.eup %4363  ;;  %3823 = vst [vmem:[%s7317_s17 + $0x28] sm:$0xff] %v3759_v8  ;;  %v3583_v59 = vmul.f32 0.6931472, %v4362_v50  ;;  %v3461_v35 = vpop.xlane.xlu0 %3460  ;;  %v8267_v8 = vld [vmem:[#allocation126_spill] sm:$0xff] }
 0x57a   : > { %v3453_v37 = vpop.xlane.xlu2 %3452  ;;  %v4366_v9 = vpop.eup %4365  ;;  %v3575_v6 = vmul.f32 0.6931472, %v4364_v46  ;;  %4373 = vlog2.f32 %v3461_v35 }
 0x57b   : > { %v3457_v20 = vpop.xlane.xlu1 %3456  ;;  %v3700_v32 = vadd.f32 %v3583_v59, %v7065_v11  ;;  %v3579_v19 = vmul.f32 0.6931472, %v4366_v9  ;;  %4375 = vlog2.f32 %v3453_v37  ;;  %v4368_v18 = vpop.eup %4367  ;;  %v8269_v11 = vld [vmem:[#allocation163_spill] sm:$0xff] }
 0x57c   : > { %v3696_v39 = vadd.f32 %v3575_v6, %v7027_v7  ;;  %4377 = vlog2.f32 %v3457_v20  ;;  %v4370_v3 = vpop.eup %4369  ;;  %v3302_v59 = vsub.f32 %v8269_v11, %v7290_v52  ;;  %v8270_v7 = vld [vmem:[#allocation12_spill] sm:$0xff] }
 0x57d   : > { %v3764_v51 = vsub.f32 %v6783_v26, %v3700_v32  ;;  %v3698_v33 = vadd.f32 %v3579_v19, %v8267_v8  ;;  %v4372_v50 = vpop.eup %4371  ;;  %4379 = vpow2.f32 %v3420_v57  ;;  %v8271_v26 = vld [vmem:[#allocation83_spill] sm:$0xff] }
 0x57e   : > { %v3760_v46 = vsub.f32 %v8268_v15, %v3696_v39  ;;  %3550 = vadd.xlane.f32.xlu0 %v4370_v3  ;;  %3542 = vadd.xlane.f32.xlu2 %v4368_v18  ;;  %4381 = vpow2.f32 %v3428_v36  ;;  %v3304_v37 = vsub.f32 %v8271_v26, %v7286_v0  ;;  %v3426_v36 = vmul.f32 1.442695, %v3302_v59  ;;  %v8272_v15 = vld [vmem:[#allocation92_spill] sm:$0xff] }
 0x57f   : > { %3828 = vst [vmem:[%s7317_s17 + $0x50] sm:$0xff] %v3764_v51  ;;  %v3762_v47 = vsub.f32 %v8270_v7, %v3698_v33  ;;  %3546 = vadd.xlane.f32.xlu1 %v4372_v50  ;;  %4383 = vpow2.f32 %v3424_v44 }
 0x580   : > { %v4374_v35 = vpop.eup %4373  ;;  %3824 = vst [vmem:[%s7317_s17 + $0x30] sm:$0xff] %v3760_v46  ;;  %v3430_v51 = vmul.f32 1.442695, %v3304_v37  ;;  %v8275_v37 = vld [vmem:[#allocation87_spill] sm:$0xff] }
 0x581   : > { %v4376_v9 = vpop.eup %4375  ;;  %3826 = vst [vmem:[%s7317_s17 + $0x40] sm:$0xff] %v3762_v47  ;;  %v3589_v57 = vmul.f32 0.6931472, %v4374_v35  ;;  %v3467_v6 = vpop.xlane.xlu0 %3466  ;;  %v8273_v47 = vld [vmem:[#allocation98_spill] sm:$0xff] }
 0x582   : > { %v3459_v20 = vpop.xlane.xlu2 %3458  ;;  %v4378_v32 = vpop.eup %4377  ;;  %v3581_v19 = vmul.f32 0.6931472, %v4376_v9  ;;  %4385 = vlog2.f32 %v3467_v6 }
 0x583   : > { %v3463_v18 = vpop.xlane.xlu1 %3462  ;;  %v3703_v39 = vadd.f32 %v3589_v57, %v7086_v42  ;;  %v3585_v3 = vmul.f32 0.6931472, %v4378_v32  ;;  %4387 = vlog2.f32 %v3459_v20  ;;  %v4380_v44 = vpop.eup %4379  ;;  %v8274_v42 = vld [vmem:[#allocation51_spill] sm:$0xff] }
 0x584   : > { %v3699_v8 = vadd.f32 %v3581_v19, %v7047_v23  ;;  %4389 = vlog2.f32 %v3463_v18  ;;  %v4382_v33 = vpop.eup %4381  ;;  %v3305_v35 = vsub.f32 %v8274_v42, %v7300_v4 }
 0x585   : > { %v3767_v50 = vsub.f32 %v6806_v31, %v3703_v39  ;;  %v3701_v46 = vadd.f32 %v3585_v3, %v8272_v15  ;;  %v4384_v7 = vpop.eup %4383  ;;  %4391 = vpow2.f32 %v3426_v36 }
 0x586   : > { %v3763_v59 = vsub.f32 %v8273_v47, %v3699_v8  ;;  %3556 = vadd.xlane.f32.xlu0 %v4382_v33  ;;  %3548 = vadd.xlane.f32.xlu2 %v4380_v44  ;;  %4393 = vpow2.f32 %v3430_v51  ;;  %v3432_v36 = vmul.f32 1.442695, %v3305_v35  ;;  %v8276_v33 = vld [vmem:[#allocation47_spill] sm:$0xff]  ;;  %v8278_v47 = vld [vmem:[#allocation97_spill] sm:$0xff] }
 0x587   : > { %3831 = vst [vmem:[%s7317_s17 + $0x68] sm:$0xff] %v3767_v50  ;;  %v3765_v23 = vsub.f32 %v8275_v37, %v3701_v46  ;;  %3552 = vadd.xlane.f32.xlu1 %v4384_v7  ;;  %v8277_v46 = vld [vmem:[#allocation154_spill] sm:$0xff] }
 0x588   : > { %v4386_v9 = vpop.eup %4385  ;;  %3827 = vst [vmem:[%s7317_s17 + $0x48] sm:$0xff] %v3763_v59 }
 0x589   : > { %v4388_v57 = vpop.eup %4387  ;;  %3829 = vst [vmem:[%s7317_s17 + $0x58] sm:$0xff] %v3765_v23  ;;  %v3595_v31 = vmul.f32 0.6931472, %v4386_v9  ;;  %v3473_v6 = vpop.xlane.xlu0 %3472 }
 0x58a   : > { %v3465_v20 = vpop.xlane.xlu2 %3464  ;;  %v4390_v32 = vpop.eup %4389  ;;  %v3587_v19 = vmul.f32 0.6931472, %v4388_v57  ;;  %4395 = vlog2.f32 %v3473_v6 }
 0x58b   : > { %v3469_v18 = vpop.xlane.xlu1 %3468  ;;  %v3706_v39 = vadd.f32 %v3595_v31, %v7110_v41  ;;  %v3591_v3 = vmul.f32 0.6931472, %v4390_v32  ;;  %4397 = vlog2.f32 %v3465_v20  ;;  %v4392_v51 = vpop.eup %4391 }
 0x58c   : > { %v3702_v44 = vadd.f32 %v3587_v19, %v7067_v48  ;;  %4399 = vlog2.f32 %v3469_v18  ;;  %v4394_v15 = vpop.eup %4393  ;;  %v8279_v18 = vld [vmem:[#allocation50_spill] sm:$0xff] }
 0x58d   : > { %v3770_v8 = vsub.f32 %v6829_v43, %v3706_v39  ;;  %v3704_v50 = vadd.f32 %v3591_v3, %v8276_v33  ;;  %4401 = vpow2.f32 %v3432_v36  ;;  %v8280_v39 = vld [vmem:[#allocation59_spill] sm:$0xff] }
 0x58e   : > { %v3766_v7 = vsub.f32 %v8277_v46, %v3702_v44  ;;  %3554 = vadd.xlane.f32.xlu2 %v4392_v51  ;;  %v8281_v44 = vld [vmem:[#allocation9_spill] sm:$0xff] }
 0x58f   : > { %3834 = vst [vmem:[%s7317_s17 + $0x80] sm:$0xff] %v3770_v8  ;;  %v3768_v41 = vsub.f32 %v8278_v47, %v3704_v50  ;;  %3558 = vadd.xlane.f32.xlu1 %v4394_v15 }
 0x590   : > { %v4396_v59 = vpop.eup %4395  ;;  %3830 = vst [vmem:[%s7317_s17 + $0x60] sm:$0xff] %v3766_v7 }
 0x591   : > { %v4398_v35 = vpop.eup %4397  ;;  %3832 = vst [vmem:[%s7317_s17 + $0x70] sm:$0xff] %v3768_v41  ;;  %v3601_v48 = vmul.f32 0.6931472, %v4396_v59  ;;  %v3479_v37 = vpop.xlane.xlu0 %3478 }
 0x592   : > { %v3471_v23 = vpop.xlane.xlu2 %3470  ;;  %v4400_v43 = vpop.eup %4399  ;;  %v3593_v9 = vmul.f32 0.6931472, %v4398_v35  ;;  %4403 = vlog2.f32 %v3479_v37  ;;  %v8282_v35 = vld [vmem:[#allocation125_spill] sm:$0xff]  ;;  %v8283_v37 = vld [vmem:[#allocation96_spill] sm:$0xff] }
 0x593   : > { %v3475_v57 = vpop.xlane.xlu1 %3474  ;;  %v3709_v31 = vadd.f32 %v3601_v48, %v7130_v2  ;;  %v3597_v6 = vmul.f32 0.6931472, %v4400_v43  ;;  %4405 = vlog2.f32 %v3471_v23  ;;  %v4402_v32 = vpop.eup %4401  ;;  %v8284_v43 = vld [vmem:[#allocation103_spill] sm:$0xff] }
 0x594   : > { %v3705_v20 = vadd.f32 %v3593_v9, %v7088_v25  ;;  %4407 = vlog2.f32 %v3475_v57 }
 0x595   : > { %v3773_v19 = vsub.f32 %v6850_v61, %v3709_v31  ;;  %v3707_v36 = vadd.f32 %v3597_v6, %v8279_v18 }
 0x596   : > { %v3769_v3 = vsub.f32 %v8280_v39, %v3705_v20  ;;  %3560 = vadd.xlane.f32.xlu2 %v4402_v32 }
 0x597   : > { %3837 = vst [vmem:[%s7317_s17 + $0x98] sm:$0xff] %v3773_v19  ;;  %v3771_v51 = vsub.f32 %v8281_v44, %v3707_v36 }
 0x598   : > { %v4404_v8 = vpop.eup %4403  ;;  %3833 = vst [vmem:[%s7317_s17 + $0x78] sm:$0xff] %v3769_v3  ;;  %v8285_v3 = vld [vmem:[#allocation21_spill] sm:$0xff] }
 0x599   : > { %v4406_v33 = vpop.eup %4405  ;;  %3835 = vst [vmem:[%s7317_s17 + $0x88] sm:$0xff] %v3771_v51  ;;  %v3607_v2 = vmul.f32 0.6931472, %v4404_v8  ;;  %v3485_v50 = vpop.xlane.xlu0 %3484  ;;  %v8286_v51 = vld [vmem:[#allocation58_spill] sm:$0xff] }
 0x59a   : > { %v3477_v25 = vpop.xlane.xlu2 %3476  ;;  %v4408_v15 = vpop.eup %4407  ;;  %v3599_v46 = vmul.f32 0.6931472, %v4406_v33  ;;  %4409 = vlog2.f32 %v3485_v50  ;;  %v8287_v33 = vld [vmem:[#allocation90_spill] sm:$0xff] }
 0x59b   : > { %v3481_v61 = vpop.xlane.xlu1 %3480  ;;  %v3712_v7 = vadd.f32 %v3607_v2, %v7142_v10  ;;  %v3603_v47 = vmul.f32 0.6931472, %v4408_v15  ;;  %4411 = vlog2.f32 %v3477_v25 }
 0x59c   : > { %v3708_v41 = vadd.f32 %v3599_v46, %v7112_v5  ;;  %4413 = vlog2.f32 %v3481_v61 }
 0x59d   : > { %v3776_v59 = vsub.f32 %v6870_v1, %v3712_v7  ;;  %v3710_v48 = vadd.f32 %v3603_v47, %v8282_v35  ;;  %v8288_v35 = vld [vmem:[#allocation128_spill] sm:$0xff] }
 0x59e   : > { %v3772_v23 = vsub.f32 %v8283_v37, %v3708_v41  ;;  %v8289_v37 = vld [vmem:[#allocation149_spill] sm:$0xff] }
 0x59f   : > { %3840 = vst [vmem:[%s7317_s17 + $0xb0] sm:$0xff] %v3776_v59  ;;  %v3774_v9 = vsub.f32 %v8284_v43, %v3710_v48  ;;  %v8290_v43 = vld [vmem:[#allocation6_spill] sm:$0xff] }
 0x5a0   : > { %v4410_v57 = vpop.eup %4409  ;;  %3836 = vst [vmem:[%s7317_s17 + $0x90] sm:$0xff] %v3772_v23 }
 0x5a1   : > { %v4412_v31 = vpop.eup %4411  ;;  %3838 = vst [vmem:[%s7317_s17 + $0xa0] sm:$0xff] %v3774_v9  ;;  %v3613_v10 = vmul.f32 0.6931472, %v4410_v57  ;;  %v3491_v6 = vpop.xlane.xlu0 %3490 }
 0x5a2   : > { %v3483_v20 = vpop.xlane.xlu2 %3482  ;;  %v4414_v5 = vpop.eup %4413  ;;  %v3605_v32 = vmul.f32 0.6931472, %v4412_v31  ;;  %4415 = vlog2.f32 %v3491_v6 }
 0x5a3   : > { %v3487_v1 = vpop.xlane.xlu1 %3486  ;;  %v3715_v19 = vadd.f32 %v3613_v10, %v7154_v54  ;;  %v3609_v18 = vmul.f32 0.6931472, %v4414_v5  ;;  %4417 = vlog2.f32 %v3483_v20 }
 0x5a4   : > { %v3711_v36 = vadd.f32 %v3605_v32, %v7132_v38  ;;  %4419 = vlog2.f32 %v3487_v1 }
 0x5a5   : > { %v3779_v39 = vsub.f32 %v6888_v49, %v3715_v19  ;;  %v3713_v44 = vadd.f32 %v3609_v18, %v8285_v3  ;;  %v8291_v18 = vld [vmem:[#allocation24_spill] sm:$0xff] }
 0x5a6   : > { %v3775_v8 = vsub.f32 %v8286_v51, %v3711_v36 }
 0x5a7   : > { %3843 = vst [vmem:[%s7317_s17 + $0xc8] sm:$0xff] %v3779_v39  ;;  %v3777_v2 = vsub.f32 %v8287_v33, %v3713_v44  ;;  %v8292_v39 = vld [vmem:[#allocation64_spill] sm:$0xff]  ;;  %v8293_v44 = vld [vmem:[#allocation78_spill] sm:$0xff] }
 0x5a8   : > { %v4416_v50 = vpop.eup %4415  ;;  %3839 = vst [vmem:[%s7317_s17 + $0xa8] sm:$0xff] %v3775_v8 }
 0x5a9   : > { %v4418_v25 = vpop.eup %4417  ;;  %3841 = vst [vmem:[%s7317_s17 + $0xb8] sm:$0xff] %v3777_v2  ;;  %v3619_v54 = vmul.f32 0.6931472, %v4416_v50  ;;  %v3497_v15 = vpop.xlane.xlu0 %3496 }
 0x5aa   : > { %v3489_v46 = vpop.xlane.xlu2 %3488  ;;  %v4420_v38 = vpop.eup %4419  ;;  %v3611_v61 = vmul.f32 0.6931472, %v4418_v25  ;;  %4421 = vlog2.f32 %v3497_v15 }
 0x5ab   : > { %v3493_v49 = vpop.xlane.xlu1 %3492  ;;  %v3718_v7 = vadd.f32 %v3619_v54, %v7166_v60  ;;  %v3615_v47 = vmul.f32 0.6931472, %v4420_v38  ;;  %4423 = vlog2.f32 %v3489_v46  ;;  %v8294_v38 = vld [vmem:[#allocation63_spill] sm:$0xff] }
 0x5ac   : > { %v3714_v41 = vadd.f32 %v3611_v61, %v7144_v28  ;;  %4425 = vlog2.f32 %v3493_v49  ;;  %v8295_v49 = vld [vmem:[#allocation54_spill] sm:$0xff] }
 0x5ad   : > { %v3782_v59 = vsub.f32 %v6906_v34, %v3718_v7  ;;  %v3716_v48 = vadd.f32 %v3615_v47, %v8288_v35  ;;  %v8296_v47 = vld [vmem:[#allocation102_spill] sm:$0xff] }
 0x5ae   : > { %v3778_v23 = vsub.f32 %v8289_v37, %v3714_v41 }
 0x5af   : > { %3846 = vst [vmem:[%s7317_s17 + $0xe0] sm:$0xff] %v3782_v59  ;;  %v3780_v9 = vsub.f32 %v8290_v43, %v3716_v48  ;;  %v8297_v59 = vld [vmem:[#allocation157_spill] sm:$0xff] }
 0x5b0   : > { %v4422_v57 = vpop.eup %4421  ;;  %3842 = vst [vmem:[%s7317_s17 + $0xc0] sm:$0xff] %v3778_v23 }
 0x5b1   : > { %v4424_v31 = vpop.eup %4423  ;;  %3844 = vst [vmem:[%s7317_s17 + $0xd0] sm:$0xff] %v3780_v9  ;;  %v3625_v60 = vmul.f32 0.6931472, %v4422_v57  ;;  %v3503_v10 = vpop.xlane.xlu0 %3502 }
 0x5b2   : > { %v3495_v6 = vpop.xlane.xlu2 %3494  ;;  %v4426_v28 = vpop.eup %4425  ;;  %v3617_v20 = vmul.f32 0.6931472, %v4424_v31  ;;  %4427 = vlog2.f32 %v3503_v10  ;;  %v8298_v31 = vld [vmem:[#allocation40_spill] sm:$0xff] }
 0x5b3   : > { %v3499_v34 = vpop.xlane.xlu1 %3498  ;;  %v3721_v5 = vadd.f32 %v3625_v60, %v7180_v13  ;;  %v3621_v32 = vmul.f32 0.6931472, %v4426_v28  ;;  %4429 = vlog2.f32 %v3495_v6  ;;  %v8299_v6 = vld [vmem:[#allocation85_spill] sm:$0xff] }
 0x5b4   : > { %v3717_v1 = vadd.f32 %v3617_v20, %v7156_v12  ;;  %4431 = vlog2.f32 %v3499_v34  ;;  %v8300_v20 = vld [vmem:[#allocation81_spill] sm:$0xff] }
 0x5b5   : > { %v3785_v19 = vsub.f32 %v6931_v63, %v3721_v5  ;;  %v3719_v36 = vadd.f32 %v3621_v32, %v8291_v18  ;;  %v8301_v5 = vld [vmem:[#allocation162_spill] sm:$0xff]  ;;  %v8303_v18 = vld [vmem:[#allocation65_spill] sm:$0xff] }
 0x5b6   : > { %v3781_v3 = vsub.f32 %v8292_v39, %v3717_v1  ;;  %v8302_v1 = vld [vmem:[#allocation5_spill] sm:$0xff] }
 0x5b7   : > { %3849 = vst [vmem:[%s7317_s17 + $0xf8] sm:$0xff] %v3785_v19  ;;  %v3783_v51 = vsub.f32 %v8293_v44, %v3719_v36 }
 0x5b8   : > { %v4428_v8 = vpop.eup %4427  ;;  %3845 = vst [vmem:[%s7317_s17 + $0xd8] sm:$0xff] %v3781_v3 }
 0x5b9   : > { %v4430_v33 = vpop.eup %4429  ;;  %3847 = vst [vmem:[%s7317_s17 + $0xe8] sm:$0xff] %v3783_v51  ;;  %v3631_v13 = vmul.f32 0.6931472, %v4428_v8  ;;  %v3509_v2 = vpop.xlane.xlu0 %3508 }
 0x5ba   : > { %v3501_v50 = vpop.xlane.xlu2 %3500  ;;  %v4432_v12 = vpop.eup %4431  ;;  %v3623_v25 = vmul.f32 0.6931472, %v4430_v33  ;;  %4433 = vlog2.f32 %v3509_v2 }
 0x5bb   : > { %v3505_v63 = vpop.xlane.xlu1 %3504  ;;  %v3724_v54 = vadd.f32 %v3631_v13, %v7192_v56  ;;  %v3627_v15 = vmul.f32 0.6931472, %v4432_v12  ;;  %4435 = vlog2.f32 %v3501_v50  ;;  %v8304_v50 = vld [vmem:[#allocation29_spill] sm:$0xff] }
 0x5bc   : > { %v3720_v46 = vadd.f32 %v3623_v25, %v7170_v21  ;;  %4437 = vlog2.f32 %v3505_v63  ;;  %v8305_v63 = vld [vmem:[#allocation129_spill] sm:$0xff] }
 0x5bd   : > { %v3788_v61 = vsub.f32 %v8294_v38, %v3724_v54  ;;  %v3722_v7 = vadd.f32 %v3627_v15, %v8295_v49  ;;  %v8306_v15 = vld [vmem:[#allocation16_spill] sm:$0xff]  ;;  %v8307_v38 = vld [vmem:[#allocation166_spill] sm:$0xff]  ;;  %v8308_v49 = vld [vmem:[#allocation101_spill] sm:$0xff] }
 0x5be   : > { %v3784_v41 = vsub.f32 %v8296_v47, %v3720_v46  ;;  %v8309_v47 = vld [vmem:[#allocation71_spill] sm:$0xff] }
 0x5bf   : > { %3852 = vst [vmem:[%s7317_s17 + $0x110] sm:$0xff] %v3788_v61  ;;  %v3786_v35 = vsub.f32 %v8297_v59, %v3722_v7 }
 0x5c0   : > { %v4434_v48 = vpop.eup %4433  ;;  %3848 = vst [vmem:[%s7317_s17 + $0xf0] sm:$0xff] %v3784_v41 }
 0x5c1   : > { %v4436_v37 = vpop.eup %4435  ;;  %3850 = vst [vmem:[%s7317_s17 + $0x100] sm:$0xff] %v3786_v35  ;;  %v3637_v56 = vmul.f32 0.6931472, %v4434_v48  ;;  %v3515_v23 = vpop.xlane.xlu0 %3514 }
 0x5c2   : > { %v3507_v43 = vpop.xlane.xlu2 %3506  ;;  %v4438_v21 = vpop.eup %4437  ;;  %v3629_v9 = vmul.f32 0.6931472, %v4436_v37  ;;  %4439 = vlog2.f32 %v3515_v23 }
 0x5c3   : > { %v3511_v57 = vpop.xlane.xlu1 %3510  ;;  %v3727_v60 = vadd.f32 %v3637_v56, %v8298_v31  ;;  %v3633_v10 = vmul.f32 0.6931472, %v4438_v21  ;;  %4441 = vlog2.f32 %v3507_v43 }
 0x5c4   : > { %v3723_v28 = vadd.f32 %v3629_v9, %v8299_v6  ;;  %4443 = vlog2.f32 %v3511_v57  ;;  %v8310_v9 = vld [vmem:[#allocation100_spill] sm:$0xff]  ;;  %v8312_v6 = vld [vmem:[#allocation122_spill] sm:$0xff] }
 0x5c5   : > { %v3791_v34 = vsub.f32 %v8300_v20, %v3727_v60  ;;  %v3725_v32 = vadd.f32 %v3633_v10, %v8301_v5  ;;  %v8311_v60 = vld [vmem:[#allocation99_spill] sm:$0xff] }
 0x5c6   : > { %v3787_v19 = vsub.f32 %v8302_v1, %v3723_v28  ;;  %v8313_v20 = vld [vmem:[#allocation23_spill] sm:$0xff]  ;;  %v8315_v1 = vld [vmem:[#allocation89_spill] sm:$0xff] }
 0x5c7   : > { %3855 = vst [vmem:[%s7317_s17 + $0x128] sm:$0xff] %v3791_v34  ;;  %v3789_v36 = vsub.f32 %v8303_v18, %v3725_v32  ;;  %v8314_v5 = vld [vmem:[#allocation15_spill] sm:$0xff] }
 0x5c8   : > { %v4440_v39 = vpop.eup %4439  ;;  %3851 = vst [vmem:[%s7317_s17 + $0x108] sm:$0xff] %v3787_v19 }
 0x5c9   : > { %v4442_v3 = vpop.eup %4441  ;;  %3853 = vst [vmem:[%s7317_s17 + $0x118] sm:$0xff] %v3789_v36  ;;  %v3643_v44 = vmul.f32 0.6931472, %v4440_v39  ;;  %v3521_v51 = vpop.xlane.xlu0 %3520 }
 0x5ca   : > { %v3513_v8 = vpop.xlane.xlu2 %3512  ;;  %v4444_v33 = vpop.eup %4443  ;;  %v3635_v13 = vmul.f32 0.6931472, %v4442_v3  ;;  %4445 = vlog2.f32 %v3521_v51 }
 0x5cb   : > { %v3517_v2 = vpop.xlane.xlu1 %3516  ;;  %v3730_v12 = vadd.f32 %v3643_v44, %v8304_v50  ;;  %v3639_v25 = vmul.f32 0.6931472, %v4444_v33  ;;  %4447 = vlog2.f32 %v3513_v8 }
 0x5cc   : > { %v3726_v54 = vadd.f32 %v3635_v13, %v8305_v63  ;;  %4449 = vlog2.f32 %v3517_v2  ;;  %v8316_v13 = vld [vmem:[#allocation118_spill] sm:$0xff]  ;;  %v8318_v63 = vld [vmem:[#allocation48_spill] sm:$0xff] }
 0x5cd   : > { %v3794_v46 = vsub.f32 %v8306_v15, %v3730_v12  ;;  %v3728_v61 = vadd.f32 %v3639_v25, %v8307_v38  ;;  %v8317_v12 = vld [vmem:[#allocation43_spill] sm:$0xff]  ;;  %v8319_v15 = vld [vmem:[#allocation132_spill] sm:$0xff] }
 0x5ce   : > { %v3790_v7 = vsub.f32 %v8308_v49, %v3726_v54  ;;  %v8320_v38 = vld [vmem:[#allocation123_spill] sm:$0xff]  ;;  %v8321_v49 = vld [vmem:[#allocation156_spill] sm:$0xff] }
 0x5cf   : > { %3858 = vst [vmem:[%s7317_s17 + $0x140] sm:$0xff] %v3794_v46  ;;  %v3792_v41 = vsub.f32 %v8309_v47, %v3728_v61 }
 0x5d0   : > { %v4446_v59 = vpop.eup %4445  ;;  %3854 = vst [vmem:[%s7317_s17 + $0x120] sm:$0xff] %v3790_v7 }
 0x5d1   : > { %v4448_v35 = vpop.eup %4447  ;;  %3856 = vst [vmem:[%s7317_s17 + $0x130] sm:$0xff] %v3792_v41  ;;  %v3649_v48 = vmul.f32 0.6931472, %v4446_v59  ;;  %v3527_v37 = vpop.xlane.xlu0 %3526 }
 0x5d2   : > { %v3519_v56 = vpop.xlane.xlu2 %3518  ;;  %v4450_v23 = vpop.eup %4449  ;;  %v3641_v43 = vmul.f32 0.6931472, %v4448_v35  ;;  %4451 = vlog2.f32 %v3527_v37 }
 0x5d3   : > { %v3523_v21 = vpop.xlane.xlu1 %3522  ;;  %v3733_v57 = vadd.f32 %v3649_v48, %v8310_v9  ;;  %v3645_v31 = vmul.f32 0.6931472, %v4450_v23  ;;  %4453 = vlog2.f32 %v3519_v56 }
 0x5d4   : > { %v3729_v10 = vadd.f32 %v3641_v43, %v8311_v60  ;;  %4455 = vlog2.f32 %v3523_v21  ;;  %v8322_v43 = vld [vmem:[#allocation106_spill] sm:$0xff]  ;;  %v8324_v60 = vld [vmem:[#allocation20_spill] sm:$0xff] }
 0x5d5   : > { %v3797_v28 = vsub.f32 %v8312_v6, %v3733_v57  ;;  %v3731_v34 = vadd.f32 %v3645_v31, %v8313_v20  ;;  %v8323_v57 = vld [vmem:[#allocation155_spill] sm:$0xff]  ;;  %v8325_v6 = vld [vmem:[#allocation165_spill] sm:$0xff]  ;;  %v8326_v20 = vld [vmem:[#allocation108_spill] sm:$0xff] }
 0x5d6   : > { %v3793_v32 = vsub.f32 %v8314_v5, %v3729_v10  ;;  %v8327_v5 = vld [vmem:[#allocation70_spill] sm:$0xff] }
 0x5d7   : > { %3861 = vst [vmem:[%s7317_s17 + $0x158] sm:$0xff] %v3797_v28  ;;  %v3795_v19 = vsub.f32 %v8315_v1, %v3731_v34 }
 0x5d8   : > { %v4452_v18 = vpop.eup %4451  ;;  %3857 = vst [vmem:[%s7317_s17 + $0x138] sm:$0xff] %v3793_v32 }
 0x5d9   : > { %v4454_v36 = vpop.eup %4453  ;;  %3859 = vst [vmem:[%s7317_s17 + $0x148] sm:$0xff] %v3795_v19  ;;  %v3655_v39 = vmul.f32 0.6931472, %v4452_v18  ;;  %v3533_v3 = vpop.xlane.xlu0 %3532 }
 0x5da   : > { %v3525_v44 = vpop.xlane.xlu2 %3524  ;;  %v4456_v51 = vpop.eup %4455  ;;  %v3647_v8 = vmul.f32 0.6931472, %v4454_v36  ;;  %4457 = vlog2.f32 %v3533_v3 }
 0x5db   : > { %v3529_v33 = vpop.xlane.xlu1 %3528  ;;  %v3736_v2 = vadd.f32 %v3655_v39, %v8316_v13  ;;  %v3651_v50 = vmul.f32 0.6931472, %v4456_v51  ;;  %4459 = vlog2.f32 %v3525_v44 }
 0x5dc   : > { %v3732_v25 = vadd.f32 %v3647_v8, %v8317_v12  ;;  %4461 = vlog2.f32 %v3529_v33  ;;  %v8328_v8 = vld [vmem:[#allocation14_spill] sm:$0xff]  ;;  %v8330_v12 = vld [vmem:[#allocation152_spill] sm:$0xff] }
 0x5dd   : > { %v3800_v54 = vsub.f32 %v8318_v63, %v3736_v2  ;;  %v3734_v46 = vadd.f32 %v3651_v50, %v8319_v15  ;;  %v8329_v2 = vld [vmem:[#allocation11_spill] sm:$0xff] }
 0x5de   : > { %v3796_v61 = vsub.f32 %v8320_v38, %v3732_v25 }
 0x5df   : > { %3864 = vst [vmem:[%s7317_s17 + $0x170] sm:$0xff] %v3800_v54  ;;  %v3798_v7 = vsub.f32 %v8321_v49, %v3734_v46  ;;  %v8331_v54 = vld [vmem:[#allocation91_spill] sm:$0xff]  ;;  %v8332_v46 = vld [vmem:[#allocation69_spill] sm:$0xff] }
 0x5e0   : > { %v4458_v47 = vpop.eup %4457  ;;  %3860 = vst [vmem:[%s7317_s17 + $0x150] sm:$0xff] %v3796_v61 }
 0x5e1   : > { %v4460_v41 = vpop.eup %4459  ;;  %3862 = vst [vmem:[%s7317_s17 + $0x160] sm:$0xff] %v3798_v7  ;;  %v3661_v59 = vmul.f32 0.6931472, %v4458_v47  ;;  %v3539_v35 = vpop.xlane.xlu0 %3538 }
 0x5e2   : > { %v3531_v48 = vpop.xlane.xlu2 %3530  ;;  %v4462_v37 = vpop.eup %4461  ;;  %v3653_v56 = vmul.f32 0.6931472, %v4460_v41  ;;  %4463 = vlog2.f32 %v3539_v35 }
 0x5e3   : > { %v3535_v23 = vpop.xlane.xlu1 %3534  ;;  %v3739_v21 = vadd.f32 %v3661_v59, %v8322_v43  ;;  %v3657_v9 = vmul.f32 0.6931472, %v4462_v37  ;;  %4465 = vlog2.f32 %v3531_v48  ;;  %v8334_v43 = vld [vmem:[#allocation95_spill] sm:$0xff] }
 0x5e4   : > { %v3735_v31 = vadd.f32 %v3653_v56, %v8323_v57  ;;  %4467 = vlog2.f32 %v3535_v23  ;;  %v8333_v56 = vld [vmem:[#allocation131_spill] sm:$0xff] }
 0x5e5   : > { %v3803_v10 = vsub.f32 %v8324_v60, %v3739_v21  ;;  %v3737_v28 = vadd.f32 %v3657_v9, %v8325_v6  ;;  %v8335_v9 = vld [vmem:[#allocation53_spill] sm:$0xff] }
 0x5e6   : > { %v3799_v34 = vsub.f32 %v8326_v20, %v3735_v31  ;;  %v8336_v31 = vld [vmem:[#allocation159_spill] sm:$0xff] }
 0x5e7   : > { %3867 = vst [vmem:[%s7317_s17 + $0x188] sm:$0xff] %v3803_v10  ;;  %v3801_v32 = vsub.f32 %v8327_v5, %v3737_v28  ;;  %v8337_v10 = vld [vmem:[#allocation37_spill] sm:$0xff] }
 0x5e8   : > { %v4464_v1 = vpop.eup %4463  ;;  %3863 = vst [vmem:[%s7317_s17 + $0x168] sm:$0xff] %v3799_v34 }
 0x5e9   : > { %v4466_v19 = vpop.eup %4465  ;;  %3865 = vst [vmem:[%s7317_s17 + $0x178] sm:$0xff] %v3801_v32  ;;  %v3667_v18 = vmul.f32 0.6931472, %v4464_v1  ;;  %v3545_v36 = vpop.xlane.xlu0 %3544 }
 0x5ea   : > { %v3537_v39 = vpop.xlane.xlu2 %3536  ;;  %v4468_v3 = vpop.eup %4467  ;;  %v3659_v44 = vmul.f32 0.6931472, %v4466_v19  ;;  %4469 = vlog2.f32 %v3545_v36 }
 0x5eb   : > { %v3541_v51 = vpop.xlane.xlu1 %3540  ;;  %v3742_v33 = vadd.f32 %v3667_v18, %v8328_v8  ;;  %v3663_v13 = vmul.f32 0.6931472, %v4468_v3  ;;  %4471 = vlog2.f32 %v3537_v39 }
 0x5ec   : > { %v3738_v50 = vadd.f32 %v3659_v44, %v8329_v2  ;;  %4473 = vlog2.f32 %v3541_v51 }
 0x5ed   : > { %v3806_v25 = vsub.f32 %v8330_v12, %v3742_v33  ;;  %v3740_v63 = vadd.f32 %v3663_v13, %v7238_v55 }
 0x5ee   : > { %v3802_v15 = vsub.f32 %v8331_v54, %v3738_v50 }
 0x5ef   : > { %3870 = vst [vmem:[%s7317_s17 + $0x1a0] sm:$0xff] %v3806_v25  ;;  %v3804_v38 = vsub.f32 %v8332_v46, %v3740_v63 }
 0x5f0   : > { %v4470_v61 = vpop.eup %4469  ;;  %3866 = vst [vmem:[%s7317_s17 + $0x180] sm:$0xff] %v3802_v15 }
 0x5f1   : > { %v4472_v49 = vpop.eup %4471  ;;  %3868 = vst [vmem:[%s7317_s17 + $0x190] sm:$0xff] %v3804_v38  ;;  %v3673_v7 = vmul.f32 0.6931472, %v4470_v61  ;;  %v3551_v47 = vpop.xlane.xlu0 %3550 }
 0x5f2   : > { %v3543_v41 = vpop.xlane.xlu2 %3542  ;;  %v4474_v59 = vpop.eup %4473  ;;  %v3665_v35 = vmul.f32 0.6931472, %v4472_v49  ;;  %4475 = vlog2.f32 %v3551_v47 }
 0x5f3   : > { %v3547_v48 = vpop.xlane.xlu1 %3546  ;;  %v3745_v55 = vadd.f32 %v3673_v7, %v7276_v45  ;;  %v3669_v37 = vmul.f32 0.6931472, %v4474_v59  ;;  %4477 = vlog2.f32 %v3543_v41 }
 0x5f4   : > { %v3741_v23 = vadd.f32 %v3665_v35, %v8333_v56  ;;  %4479 = vlog2.f32 %v3547_v48 }
 0x5f5   : > { %v3809_v21 = vsub.f32 %v8334_v43, %v3745_v55  ;;  %v3743_v57 = vadd.f32 %v3669_v37, %v8335_v9 }
 0x5f6   : > { %v3805_v60 = vsub.f32 %v8336_v31, %v3741_v23 }
 0x5f7   : > { %3873 = vst [vmem:[%s7317_s17 + $0x1b8] sm:$0xff] %v3809_v21  ;;  %v3807_v6 = vsub.f32 %v8337_v10, %v3743_v57 }
 0x5f8   : > { %v4476_v28 = vpop.eup %4475  ;;  %3869 = vst [vmem:[%s7317_s17 + $0x198] sm:$0xff] %v3805_v60 }
 0x5f9   : > { %v4478_v20 = vpop.eup %4477  ;;  %3871 = vst [vmem:[%s7317_s17 + $0x1a8] sm:$0xff] %v3807_v6  ;;  %v3679_v45 = vmul.f32 0.6931472, %v4476_v28  ;;  %v3557_v34 = vpop.xlane.xlu0 %3556 }
 0x5fa   : > { %v3549_v5 = vpop.xlane.xlu2 %3548  ;;  %v4480_v32 = vpop.eup %4479  ;;  %v3671_v1 = vmul.f32 0.6931472, %v4478_v20  ;;  %4481 = vlog2.f32 %v3557_v34 }
 0x5fb   : > { %v3553_v19 = vpop.xlane.xlu1 %3552  ;;  %v3748_v18 = vadd.f32 %v3679_v45, %v7288_v40  ;;  %v3675_v36 = vmul.f32 0.6931472, %v4480_v32  ;;  %4483 = vlog2.f32 %v3549_v5 }
 0x5fc   : > { %v3744_v39 = vadd.f32 %v3671_v1, %v7266_v22  ;;  %4485 = vlog2.f32 %v3553_v19 }
 0x5fd   : > { %v3812_v3 = vsub.f32 %v8259_v30, %v3748_v18  ;;  %v3746_v44 = vadd.f32 %v3675_v36, %v7262_v29 }
 0x5fe   : > { %v3808_v51 = vsub.f32 %v8257_v58, %v3744_v39 }
 0x5ff   : > { %3876 = vst [vmem:[%s7317_s17 + $0x1d0] sm:$0xff] %v3812_v3  ;;  %v3810_v8 = vsub.f32 %v8260_v17, %v3746_v44 }
 0x600   : > { %v4482_v33 = vpop.eup %4481  ;;  %3872 = vst [vmem:[%s7317_s17 + $0x1b0] sm:$0xff] %v3808_v51 }
 0x601   : > { %v4484_v13 = vpop.eup %4483  ;;  %3874 = vst [vmem:[%s7317_s17 + $0x1c0] sm:$0xff] %v3810_v8  ;;  %v3685_v40 = vmul.f32 0.6931472, %v4482_v33 }
 0x602   : > { %v3555_v2 = vpop.xlane.xlu2 %3554  ;;  %v4486_v50 = vpop.eup %4485  ;;  %v3677_v22 = vmul.f32 0.6931472, %v4484_v13 }
 0x603   : > { %4487 = vlog2.f32 %v3555_v2  ;;  %v3559_v30 = vpop.xlane.xlu1 %3558  ;;  %v3751_v29 = vadd.f32 %v3685_v40, %v7298_v27  ;;  %v3681_v12 = vmul.f32 0.6931472, %v4486_v50 }
 0x604   : > { %4489 = vlog2.f32 %v3559_v30  ;;  %v3747_v58 = vadd.f32 %v3677_v22, %v7278_v62 }
 0x605   : > { %v3815_v17 = vsub.f32 %v8264_v16, %v3751_v29  ;;  %v3749_v25 = vadd.f32 %v3681_v12, %v7274_v14 }
 0x606   : > { %v3811_v63 = vsub.f32 %v8262_v53, %v3747_v58 }
 0x607   : > { %3879 = vst [vmem:[%s7317_s17 + $0x1e8] sm:$0xff] %v3815_v17  ;;  %v3813_v54 = vsub.f32 %v8266_v24, %v3749_v25 }
 0x608   : > { %3875 = vst [vmem:[%s7317_s17 + $0x1c8] sm:$0xff] %v3811_v63 }
 0x609   : > { %v4488_v15 = vpop.eup %4487  ;;  %3877 = vst [vmem:[%s7317_s17 + $0x1d8] sm:$0xff] %v3813_v54 }
 0x60a   : > { %v4490_v46 = vpop.eup %4489  ;;  %v3683_v27 = vmul.f32 0.6931472, %v4488_v15  ;;  %v3561_v38 = vpop.xlane.xlu2 %3560 }
 0x60b   : > { %v3687_v62 = vmul.f32 0.6931472, %v4490_v46  ;;  %4491 = vlog2.f32 %v3561_v38 }
 0x60c   : > { %v3750_v16 = vadd.f32 %v3683_v27, %v7290_v52 }
 0x60d   : > { %v3752_v14 = vadd.f32 %v3687_v62, %v7286_v0 }
 0x60e   : > { %v3814_v53 = vsub.f32 %v8269_v11, %v3750_v16 }
 0x60f   : > { %v3816_v24 = vsub.f32 %v8271_v26, %v3752_v14 }
 0x610   : > { %3878 = vst [vmem:[%s7317_s17 + $0x1e0] sm:$0xff] %v3814_v53 }
 0x611   : > { %v4492_v61 = vpop.eup %4491  ;;  %3880 = vst [vmem:[%s7317_s17 + $0x1f0] sm:$0xff] %v3816_v24 }
 0x612   : > { %v3689_v49 = vmul.f32 0.6931472, %v4492_v61 }
 0x614   : > { %v3753_v0 = vadd.f32 %v3689_v49, %v7300_v4 }
 0x616   : > { %v3817_v52 = vsub.f32 %v8274_v42, %v3753_v0 }
 0x618   : > { %3881 = vst [vmem:[%s7317_s17 + $0x1f8] sm:$0xff] %v3817_v52 }
 0x619   : > { %4585 = shalt.err (!%p4582_p2)
}
 0x61a   : > { %s4625_s14 = smov 128   ;;  %s4626_s15 = smov 8  }
 0x61b   : > { %4185 = dma.vmem_to_hbm [thread:$0]  (%p4692_p5), %s3896_s6, 8192, %s3898_s26, %s3883_s30, %s4625_s14, %s4625_s14, %s4626_s15  }
 0x61c PF: > { %p4191_p3 = scmp.ge.s32.totalorder %s4620_s21, 2  ;;  %s3912_s16 = sand.u32 1, %s4608_s18  }
 0x61d   : > { %s3913_s17 = scalar_lea.sflag [#allocation3], %s3912_s16 }
 0x61e   : > { %p4188_p4 = pnand %p4191_p3, %p4696_p6 }
 0x620   : > { %p4189_p7 = pneg %p4188_p4 }
 0x622   : > { %4603 = dma.done.wait (%p4189_p7), %s3913_s17, 8192  }
 0x623   : > { %4605 = vsyncadd (%p4189_p7), %s3913_s17, 4294959104  ;;  %p15_p8 = scmp.ge.s32.totalorder %s4680_s24, 6   ;;  %s8338_s18 = smov %s4612_s19 }
 0x624   : > { %s8339_s19 = smov %s4616_s20  ;;  %s8340_s20 = smov %s4690_s27 }
 0x625   : > { %s8341_s21 = smov %s4680_s24  ;;  %17 = sbr.rel (!%p15_p8) target bundleno = 3 (0x3), region = 73 }
 0x62a   :  { %3919 = vsyncpa [#allocation3], 1 }
 0x62b   :  { %3921 = vsyncpa [#allocation3 + $0x1], 1 }

</bundles_post_ra>
